<compile_context>
chip_gen: v5e
topology: v5e:2x2
jax: 0.10.0
libtpu: 0.0.40
codegen_flags: <defaults>
</compile_context>

<pallas_src>
import jax
import jax.numpy as jnp
from jax.experimental import pallas as pl
from jax.experimental.pallas import tpu as pltpu


# ----------------------------------------------------------------------------
# Fused encoder + decoder + attention kernel (everything VMEM-resident).
# ----------------------------------------------------------------------------
def _nmt_kernel(src_ref, tgt_ref, mask_ref,
                enc_wih_ref, enc_whh_ref, enc_b_ref,
                dec_wih_ref, dec_whh_ref, dec_b_ref,
                attn_w_ref, out_wc_ref, out_wh_ref,
                dec_out_ref, attn_ref,
                mem_scr, hdec_scr):
    f32, bf16 = jnp.float32, jnp.bfloat16
    S, B, H = mem_scr.shape
    T = hdec_scr.shape[0]

    mask = mask_ref[...]                                  # (B, S): 1 valid, 0 pad

    def lstm_step(pre_t, h, c, w_hh):
        # One recurrent MXU op per step; gate order (i, f, g, o) as torch.nn.LSTM.
        gates = pre_t + jnp.dot(h.astype(bf16), w_hh,
                                preferred_element_type=f32)        # (B, 4H)
        sg = jax.nn.sigmoid(gates)                                 # full-width EUP
        tg = jnp.tanh(gates)
        i = sg[:, 0 * H:1 * H]
        f = sg[:, 1 * H:2 * H]
        g = tg[:, 2 * H:3 * H]
        o = sg[:, 3 * H:4 * H]
        c_new = f * c + i * g
        h_new = o * jnp.tanh(c_new)
        return h_new, c_new

    # ---------------- Encoder ----------------
    enc_whh = enc_whh_ref[...]                            # (H, 4H) bf16
    # Input projections for the whole source sequence at once (bias folded in).
    enc_pre = (jnp.dot(src_ref[...], enc_wih_ref[...],
                       preferred_element_type=f32)
               + enc_b_ref[...])                          # (S*B, 4H) f32

    h = jnp.zeros((B, H), f32)
    c = jnp.zeros((B, H), f32)
    h_fin = jnp.zeros((B, H), f32)
    c_fin = jnp.zeros((B, H), f32)
    for t in range(S):                                    # sequential recurrence
        h, c = lstm_step(enc_pre[t * B:(t + 1) * B, :], h, c, enc_whh)
        mem_scr[t] = h                                    # memory bank, time-major
        valid = mask[:, t:t + 1] > 0.0                    # (B, 1)
        h_fin = jnp.where(valid, h, h_fin)                # final state at the last
        c_fin = jnp.where(valid, c, c_fin)                # valid step (packed seq)

    # ---------------- Decoder LSTM recurrence ----------------
    dec_whh = dec_whh_ref[...]
    dec_pre = (jnp.dot(tgt_ref[...], dec_wih_ref[...],
                       preferred_element_type=f32)
               + dec_b_ref[...])                          # (T*B, 4H) f32

    h, c = h_fin, c_fin                                   # decoder.init_state
    for t in range(T):
        h, c = lstm_step(dec_pre[t * B:(t + 1) * B, :], h, c, dec_whh)
        hdec_scr[t] = h

    # -------- Luong "general" attention + output projection, batched over T ---
    mem = mem_scr[...]                                    # (S, B, H) f32
    hdec = hdec_scr[...]                                  # (T, B, H) f32
    w_attn = attn_w_ref[...]                              # (H, H) bf16
    w_out_c = out_wc_ref[...]
    w_out_h = out_wh_ref[...]
    neg = jnp.where(mask > 0.0, 0.0, -1e9)                # (B, S) additive mask

    for b in range(B):  # B is tiny here; plain 2D matmuls with M = T.
        # TODO(synk): at production batch sizes make this a leading "parallel"
        # grid axis (v7x second TensorCore) instead of an unrolled loop.
        hb = hdec[:, b, :].astype(bf16)                   # (T, H)
        mb = mem[:, b, :].astype(bf16)                    # (S, H)
        q = jnp.dot(hb, w_attn, preferred_element_type=f32)            # (T, H)
        sc = jax.lax.dot_general(q.astype(bf16), mb,
                                 (((1,), (1,)), ((), ())),
                                 preferred_element_type=f32)           # (T, S)
        sc = sc + neg[b:b + 1, :]
        sc = sc - jnp.max(sc, axis=-1, keepdims=True)
        p = jnp.exp(sc)
        a = p * pl.reciprocal(jnp.sum(p, axis=-1, keepdims=True),
                              approx=True)                             # (T, S)
        ctx = jnp.dot(a.astype(bf16), mb, preferred_element_type=f32)  # (T, H)
        ob = jnp.tanh(
            jnp.dot(ctx.astype(bf16), w_out_c, preferred_element_type=f32)
            + jnp.dot(hb, w_out_h, preferred_element_type=f32))        # (T, H)
        dec_out_ref[:, b:b + 1, :] = ob[:, None, :]
        attn_ref[:, b:b + 1, :] = a[:, None, :]


def nmt_fused(src2d, tgt2d, mask,
              enc_w_ih, enc_w_hh, enc_b, dec_w_ih, dec_w_hh, dec_b,
              attn_w, out_w_c, out_w_h):
    B, S = mask.shape
    SB, E = src2d.shape
    TB = tgt2d.shape[0]
    T = TB // B
    H = enc_w_hh.shape[0]

    def full(shape):
        return pl.BlockSpec(shape, lambda i, _n=len(shape): (0,) * _n)

    return pl.pallas_call(
        _nmt_kernel,
        out_shape=(jax.ShapeDtypeStruct((T, B, H), jnp.float32),   # dec_out
                   jax.ShapeDtypeStruct((T, B, S), jnp.float32)),  # attn 'std'
        grid_spec=pltpu.PrefetchScalarGridSpec(
            num_scalar_prefetch=0,
            grid=(1,),                      # everything VMEM-resident, single step
            in_specs=[
                full((SB, E)),              # embedded src, (S*B, E) bf16
                full((TB, E)),              # embedded dec_in, (T*B, E) bf16
                full((B, S)),               # src validity mask
                full((E, 4 * H)), full((H, 4 * H)), full((1, 4 * H)),  # enc LSTM
                full((E, 4 * H)), full((H, 4 * H)), full((1, 4 * H)),  # dec LSTM
                full((H, H)), full((H, H)), full((H, H)),              # attn / W_out
            ],
            out_specs=(full((T, B, H)), full((T, B, S))),
            scratch_shapes=[pltpu.VMEM((S, B, H), jnp.float32),   # memory bank
                            pltpu.VMEM((T, B, H), jnp.float32)],  # decoder h_t
        ),
        # TODO(synk): at production sizes set vmem_limit_bytes explicitly and
        # tile the decoder over target chunks before scaling this fully
        # resident design to v7x (64 MiB VMEM).
        compiler_params=pltpu.CompilerParams(
            dimension_semantics=("arbitrary",)),
    )(src2d, tgt2d, mask, enc_w_ih, enc_w_hh, enc_b,
      dec_w_ih, dec_w_hh, dec_b, attn_w, out_w_c, out_w_h)


# ----------------------------------------------------------------------------
# NMTModel.forward equivalent
# ----------------------------------------------------------------------------
def init_params(key, vocab=16, emb=32, hidden=32):
    ks = jax.random.split(key, 11)
    n = lambda k, shape: (0.1 * jax.random.normal(k, shape)).astype(jnp.float32)
    return dict(
        src_embed=n(ks[0], (vocab, emb)),
        tgt_embed=n(ks[1], (vocab, emb)),
        # LSTM weights fused over gates, column order (i, f, g, o); biases
        # correspond to PyTorch's b_ih + b_hh pre-summed.
        enc_w_ih=n(ks[2], (emb, 4 * hidden)),
        enc_w_hh=n(ks[3], (hidden, 4 * hidden)),
        enc_b=n(ks[4], (1, 4 * hidden)),
        dec_w_ih=n(ks[5], (emb, 4 * hidden)),
        dec_w_hh=n(ks[6], (hidden, 4 * hidden)),
        dec_b=n(ks[7], (1, 4 * hidden)),
        attn_w=n(ks[8], (hidden, hidden)),     # Luong "general" score weight
        out_w_c=n(ks[9], (hidden, hidden)),    # W_out, context half
        out_w_h=n(ks[10], (hidden, hidden)),   # W_out, hidden half
    )


@jax.jit
def nmt_forward(params, src, tgt, lengths):
    """src: (src_len, B, 1) int32, tgt: (tgt_len, B, 1) int32, lengths: (B,).

    Returns (dec_out (tgt_len-1, B, H), {'std': attn (tgt_len-1, B, src_len)}).
    """
    dec_in = tgt[:-1]                                    # tgt[:-1] as in forward()
    S, B = src.shape[0], src.shape[1]
    T = dec_in.shape[0]
    bf16 = jnp.bfloat16

    # Embedding lookups (gathers) stay in XLA; MXU operands pre-cast to bf16.
    src_emb = params['src_embed'][src[:, :, 0]]          # (S, B, E)
    tgt_emb = params['tgt_embed'][dec_in[:, :, 0]]       # (T, B, E)
    src2d = src_emb.reshape(S * B, -1).astype(bf16)
    tgt2d = tgt_emb.reshape(T * B, -1).astype(bf16)

    # decoder.init_state / memory_lengths mask
    mask = (jnp.arange(S)[None, :] < lengths[:, None]).astype(jnp.float32)

    dec_out, attn_std = nmt_fused(
        src2d, tgt2d, mask,
        params['enc_w_ih'].astype(bf16), params['enc_w_hh'].astype(bf16),
        params['enc_b'],
        params['dec_w_ih'].astype(bf16), params['dec_w_hh'].astype(bf16),
        params['dec_b'],
        params['attn_w'].astype(bf16), params['out_w_c'].astype(bf16),
        params['out_w_h'].astype(bf16))

    # TODO(synk): eval-time bookkeeping (self.generator argmax preds, list
    # appends of src/tgt/gate traces) is host-side Python state, not kernel
    # compute; re-expose the h/c/i/f/o traces behind a debug flag if needed.
    return dec_out, {'std': attn_std}


if __name__ == "__main__":
    key = jax.random.PRNGKey(0)
    pkey, skey, tkey = jax.random.split(key, 3)

    VOCAB, EMB, HID = 16, 32, 32
    SRC_LEN, TGT_LEN, BATCH = 8, 9, 2

    params = init_params(pkey, vocab=VOCAB, emb=EMB, hidden=HID)
    src = jax.random.randint(skey, (SRC_LEN, BATCH, 1), 0, VOCAB, dtype=jnp.int32)
    tgt = jax.random.randint(tkey, (TGT_LEN, BATCH, 1), 0, VOCAB, dtype=jnp.int32)
    lengths = jnp.array([SRC_LEN, 5], dtype=jnp.int32)

    dec_out, attns = nmt_forward(params, src, tgt, lengths)
    jax.block_until_ready((dec_out, attns['std']))

    assert dec_out.shape == (TGT_LEN - 1, BATCH, HID)
    assert attns['std'].shape == (TGT_LEN - 1, BATCH, SRC_LEN)
    assert bool(jnp.all(jnp.isfinite(dec_out)))
    assert bool(jnp.all(jnp.isfinite(attns['std'])))
    # attention rows are (approximately, given approx reciprocal) distributions
    assert bool(jnp.allclose(jnp.sum(attns['std'], axis=-1), 1.0, atol=2e-3))
    # padded source positions of the short row get (near-)zero attention
    assert bool(jnp.all(attns['std'][:, 1, int(lengths[1]):] < 1e-6))

    print("KERNEL_OK")
</pallas_src>

<mosaic_0001>
module attributes {stable_mosaic.version = 11 : i64} {
  func.func @_nmt_kernel(%arg0: i32, %arg1: memref<16x32xbf16, #tpu.memory_space<vmem>>, %arg2: memref<16x32xbf16, #tpu.memory_space<vmem>>, %arg3: memref<2x8xf32, #tpu.memory_space<vmem>>, %arg4: memref<32x128xbf16, #tpu.memory_space<vmem>>, %arg5: memref<32x128xbf16, #tpu.memory_space<vmem>>, %arg6: memref<1x128xf32, #tpu.memory_space<vmem>>, %arg7: memref<32x128xbf16, #tpu.memory_space<vmem>>, %arg8: memref<32x128xbf16, #tpu.memory_space<vmem>>, %arg9: memref<1x128xf32, #tpu.memory_space<vmem>>, %arg10: memref<32x32xbf16, #tpu.memory_space<vmem>>, %arg11: memref<32x32xbf16, #tpu.memory_space<vmem>>, %arg12: memref<32x32xbf16, #tpu.memory_space<vmem>>, %arg13: memref<8x2x32xf32, #tpu.memory_space<vmem>>, %arg14: memref<8x2x8xf32, #tpu.memory_space<vmem>>, %arg15: memref<8x2x32xf32, #tpu.memory_space<vmem>>, %arg16: memref<8x2x32xf32, #tpu.memory_space<vmem>>) attributes {dimension_semantics = [#tpu.dimension_semantics<arbitrary>], iteration_bounds = array<i64: 1>, scalar_prefetch = 0 : i64, scratch_operands = 2 : i64, tpu.core_type = #tpu.core_type<tc>, window_params = [{pipeline_mode = #tpu.pipeline_mode<synchronous>, transform_indices = @transform_0, window_bounds = array<i64: 16, 32>}, {pipeline_mode = #tpu.pipeline_mode<synchronous>, transform_indices = @transform_1, window_bounds = array<i64: 16, 32>}, {pipeline_mode = #tpu.pipeline_mode<synchronous>, transform_indices = @transform_2, window_bounds = array<i64: 2, 8>}, {pipeline_mode = #tpu.pipeline_mode<synchronous>, transform_indices = @transform_3, window_bounds = array<i64: 32, 128>}, {pipeline_mode = #tpu.pipeline_mode<synchronous>, transform_indices = @transform_4, window_bounds = array<i64: 32, 128>}, {pipeline_mode = #tpu.pipeline_mode<synchronous>, transform_indices = @transform_5, window_bounds = array<i64: 1, 128>}, {pipeline_mode = #tpu.pipeline_mode<synchronous>, transform_indices = @transform_6, window_bounds = array<i64: 32, 128>}, {pipeline_mode = #tpu.pipeline_mode<synchronous>, transform_indices = @transform_7, window_bounds = array<i64: 32, 128>}, {pipeline_mode = #tpu.pipeline_mode<synchronous>, transform_indices = @transform_8, window_bounds = array<i64: 1, 128>}, {pipeline_mode = #tpu.pipeline_mode<synchronous>, transform_indices = @transform_9, window_bounds = array<i64: 32, 32>}, {pipeline_mode = #tpu.pipeline_mode<synchronous>, transform_indices = @transform_10, window_bounds = array<i64: 32, 32>}, {pipeline_mode = #tpu.pipeline_mode<synchronous>, transform_indices = @transform_11, window_bounds = array<i64: 32, 32>}, {pipeline_mode = #tpu.pipeline_mode<synchronous>, transform_indices = @transform_12, window_bounds = array<i64: 8, 2, 32>}, {pipeline_mode = #tpu.pipeline_mode<synchronous>, transform_indices = @transform_13, window_bounds = array<i64: 8, 2, 8>}]} {
    %c0 = arith.constant 0 : index
    %c0_0 = arith.constant 0 : index
    %0 = vector.load %arg3[%c0, %c0_0] : memref<2x8xf32, #tpu.memory_space<vmem>>, vector<2x8xf32>
    %c0_1 = arith.constant 0 : index
    %c0_2 = arith.constant 0 : index
    %1 = vector.load %arg5[%c0_1, %c0_2] : memref<32x128xbf16, #tpu.memory_space<vmem>>, vector<32x128xbf16>
    %c0_3 = arith.constant 0 : index
    %c0_4 = arith.constant 0 : index
    %2 = vector.load %arg1[%c0_3, %c0_4] : memref<16x32xbf16, #tpu.memory_space<vmem>>, vector<16x32xbf16>
    %c0_5 = arith.constant 0 : index
    %c0_6 = arith.constant 0 : index
    %3 = vector.load %arg4[%c0_5, %c0_6] : memref<32x128xbf16, #tpu.memory_space<vmem>>, vector<32x128xbf16>
    %cst = arith.constant dense<0.000000e+00> : vector<16x128xf32>
    %4 = tpu.matmul %2, %3, %cst {dimension_numbers = #tpu.dot_dimension_numbers<[1], [0], [0], [1], [0, 0, 1, 1], [], []>} : vector<16x32xbf16>, vector<32x128xbf16>, vector<16x128xf32> -> vector<16x128xf32>
    %c0_7 = arith.constant 0 : index
    %c0_8 = arith.constant 0 : index
    %5 = vector.load %arg6[%c0_7, %c0_8] : memref<1x128xf32, #tpu.memory_space<vmem>>, vector<1x128xf32>
    %6 = vector.broadcast %5 : vector<1x128xf32> to vector<16x128xf32>
    %7 = arith.addf %4, %6 : vector<16x128xf32>
    %cst_9 = arith.constant 0.000000e+00 : f32
    %8 = vector.broadcast %cst_9 : f32 to vector<2x32xf32>
    %cst_10 = arith.constant 0.000000e+00 : f32
    %9 = vector.broadcast %cst_10 : f32 to vector<2x32xf32>
    %cst_11 = arith.constant 0.000000e+00 : f32
    %10 = vector.broadcast %cst_11 : f32 to vector<2x32xf32>
    %cst_12 = arith.constant 0.000000e+00 : f32
    %11 = vector.broadcast %cst_12 : f32 to vector<2x32xf32>
    %12 = vector.extract_strided_slice %7 {offsets = [0, 0], sizes = [2, 128], strides = [1, 1]} : vector<16x128xf32> to vector<2x128xf32>
    %13 = arith.truncf %8 : vector<2x32xf32> to vector<2x32xbf16>
    %cst_13 = arith.constant dense<0.000000e+00> : vector<2x128xf32>
    %14 = tpu.matmul %13, %1, %cst_13 {dimension_numbers = #tpu.dot_dimension_numbers<[1], [0], [0], [1], [0, 0, 1, 1], [], []>} : vector<2x32xbf16>, vector<32x128xbf16>, vector<2x128xf32> -> vector<2x128xf32>
    %15 = arith.addf %12, %14 : vector<2x128xf32>
    %16 = arith.negf %15 : vector<2x128xf32>
    %17 = math.exp %16 : vector<2x128xf32>
    %cst_14 = arith.constant 1.000000e+00 : f32
    %18 = vector.broadcast %cst_14 : f32 to vector<2x128xf32>
    %19 = arith.addf %18, %17 : vector<2x128xf32>
    %20 = arith.divf %18, %19 : vector<2x128xf32>
    %21 = math.tanh %15 : vector<2x128xf32>
    %22 = vector.extract_strided_slice %20 {offsets = [0, 0], sizes = [2, 32], strides = [1, 1]} : vector<2x128xf32> to vector<2x32xf32>
    %23 = vector.extract_strided_slice %20 {offsets = [0, 32], sizes = [2, 32], strides = [1, 1]} : vector<2x128xf32> to vector<2x32xf32>
    %24 = vector.extract_strided_slice %21 {offsets = [0, 64], sizes = [2, 32], strides = [1, 1]} : vector<2x128xf32> to vector<2x32xf32>
    %25 = vector.extract_strided_slice %20 {offsets = [0, 96], sizes = [2, 32], strides = [1, 1]} : vector<2x128xf32> to vector<2x32xf32>
    %26 = arith.mulf %23, %9 : vector<2x32xf32>
    %27 = arith.mulf %22, %24 : vector<2x32xf32>
    %28 = arith.addf %26, %27 : vector<2x32xf32>
    %29 = math.tanh %28 : vector<2x32xf32>
    %30 = arith.mulf %25, %29 : vector<2x32xf32>
    %c0_15 = arith.constant 0 : index
    %c0_16 = arith.constant 0 : index
    %c0_17 = arith.constant 0 : index
    %31 = vector.load %arg15[%c0_15, %c0_16, %c0_17] : memref<8x2x32xf32, #tpu.memory_space<vmem>>, vector<1x2x32xf32>
    %32 = vector.shape_cast %31 : vector<1x2x32xf32> to vector<2x32xf32>
    %33 = vector.shape_cast %30 : vector<2x32xf32> to vector<1x2x32xf32>
    tpu.vector_store %arg15[%c0_15, %c0_16, %c0_17], %33 {strides = array<i32>} : memref<8x2x32xf32, #tpu.memory_space<vmem>>, vector<1x2x32xf32>,
    %34 = vector.extract_strided_slice %0 {offsets = [0, 0], sizes = [2, 1], strides = [1, 1]} : vector<2x8xf32> to vector<2x1xf32>
    %cst_18 = arith.constant 0.000000e+00 : f32
    %35 = vector.broadcast %cst_18 : f32 to vector<2x1xf32>
    %36 = arith.cmpf ogt, %34, %35 : vector<2x1xf32>
    %37 = vector.shape_cast %36 : vector<2x1xi1> to vector<2x1xi1>
    %38 = vector.broadcast %37 : vector<2x1xi1> to vector<2x32xi1>
    %39 = arith.select %38, %30, %10 : vector<2x32xi1>, vector<2x32xf32>
    %40 = vector.shape_cast %36 : vector<2x1xi1> to vector<2x1xi1>
    %41 = vector.broadcast %40 : vector<2x1xi1> to vector<2x32xi1>
    %42 = arith.select %41, %28, %11 : vector<2x32xi1>, vector<2x32xf32>
    %43 = vector.extract_strided_slice %7 {offsets = [2, 0], sizes = [2, 128], strides = [1, 1]} : vector<16x128xf32> to vector<2x128xf32>
    %44 = arith.truncf %30 : vector<2x32xf32> to vector<2x32xbf16>
    %cst_19 = arith.constant dense<0.000000e+00> : vector<2x128xf32>
    %45 = tpu.matmul %44, %1, %cst_19 {dimension_numbers = #tpu.dot_dimension_numbers<[1], [0], [0], [1], [0, 0, 1, 1], [], []>} : vector<2x32xbf16>, vector<32x128xbf16>, vector<2x128xf32> -> vector<2x128xf32>
    %46 = arith.addf %43, %45 : vector<2x128xf32>
    %47 = arith.negf %46 : vector<2x128xf32>
    %48 = math.exp %47 : vector<2x128xf32>
    %cst_20 = arith.constant 1.000000e+00 : f32
    %49 = vector.broadcast %cst_20 : f32 to vector<2x128xf32>
    %50 = arith.addf %49, %48 : vector<2x128xf32>
    %51 = arith.divf %49, %50 : vector<2x128xf32>
    %52 = math.tanh %46 : vector<2x128xf32>
    %53 = vector.extract_strided_slice %51 {offsets = [0, 0], sizes = [2, 32], strides = [1, 1]} : vector<2x128xf32> to vector<2x32xf32>
    %54 = vector.extract_strided_slice %51 {offsets = [0, 32], sizes = [2, 32], strides = [1, 1]} : vector<2x128xf32> to vector<2x32xf32>
    %55 = vector.extract_strided_slice %52 {offsets = [0, 64], sizes = [2, 32], strides = [1, 1]} : vector<2x128xf32> to vector<2x32xf32>
    %56 = vector.extract_strided_slice %51 {offsets = [0, 96], sizes = [2, 32], strides = [1, 1]} : vector<2x128xf32> to vector<2x32xf32>
    %57 = arith.mulf %54, %28 : vector<2x32xf32>
    %58 = arith.mulf %53, %55 : vector<2x32xf32>
    %59 = arith.addf %57, %58 : vector<2x32xf32>
    %60 = math.tanh %59 : vector<2x32xf32>
    %61 = arith.mulf %56, %60 : vector<2x32xf32>
    %c1 = arith.constant 1 : index
    %c0_21 = arith.constant 0 : index
    %c0_22 = arith.constant 0 : index
    %62 = vector.load %arg15[%c1, %c0_21, %c0_22] : memref<8x2x32xf32, #tpu.memory_space<vmem>>, vector<1x2x32xf32>
    %63 = vector.shape_cast %62 : vector<1x2x32xf32> to vector<2x32xf32>
    %64 = vector.shape_cast %61 : vector<2x32xf32> to vector<1x2x32xf32>
    tpu.vector_store %arg15[%c1, %c0_21, %c0_22], %64 {strides = array<i32>} : memref<8x2x32xf32, #tpu.memory_space<vmem>>, vector<1x2x32xf32>,
    %65 = vector.extract_strided_slice %0 {offsets = [0, 1], sizes = [2, 1], strides = [1, 1]} : vector<2x8xf32> to vector<2x1xf32>
    %cst_23 = arith.constant 0.000000e+00 : f32
    %66 = vector.broadcast %cst_23 : f32 to vector<2x1xf32>
    %67 = arith.cmpf ogt, %65, %66 : vector<2x1xf32>
    %68 = vector.shape_cast %67 : vector<2x1xi1> to vector<2x1xi1>
    %69 = vector.broadcast %68 : vector<2x1xi1> to vector<2x32xi1>
    %70 = arith.select %69, %61, %39 : vector<2x32xi1>, vector<2x32xf32>
    %71 = vector.shape_cast %67 : vector<2x1xi1> to vector<2x1xi1>
    %72 = vector.broadcast %71 : vector<2x1xi1> to vector<2x32xi1>
    %73 = arith.select %72, %59, %42 : vector<2x32xi1>, vector<2x32xf32>
    %74 = vector.extract_strided_slice %7 {offsets = [4, 0], sizes = [2, 128], strides = [1, 1]} : vector<16x128xf32> to vector<2x128xf32>
    %75 = arith.truncf %61 : vector<2x32xf32> to vector<2x32xbf16>
    %cst_24 = arith.constant dense<0.000000e+00> : vector<2x128xf32>
    %76 = tpu.matmul %75, %1, %cst_24 {dimension_numbers = #tpu.dot_dimension_numbers<[1], [0], [0], [1], [0, 0, 1, 1], [], []>} : vector<2x32xbf16>, vector<32x128xbf16>, vector<2x128xf32> -> vector<2x128xf32>
    %77 = arith.addf %74, %76 : vector<2x128xf32>
    %78 = arith.negf %77 : vector<2x128xf32>
    %79 = math.exp %78 : vector<2x128xf32>
    %cst_25 = arith.constant 1.000000e+00 : f32
    %80 = vector.broadcast %cst_25 : f32 to vector<2x128xf32>
    %81 = arith.addf %80, %79 : vector<2x128xf32>
    %82 = arith.divf %80, %81 : vector<2x128xf32>
    %83 = math.tanh %77 : vector<2x128xf32>
    %84 = vector.extract_strided_slice %82 {offsets = [0, 0], sizes = [2, 32], strides = [1, 1]} : vector<2x128xf32> to vector<2x32xf32>
    %85 = vector.extract_strided_slice %82 {offsets = [0, 32], sizes = [2, 32], strides = [1, 1]} : vector<2x128xf32> to vector<2x32xf32>
    %86 = vector.extract_strided_slice %83 {offsets = [0, 64], sizes = [2, 32], strides = [1, 1]} : vector<2x128xf32> to vector<2x32xf32>
    %87 = vector.extract_strided_slice %82 {offsets = [0, 96], sizes = [2, 32], strides = [1, 1]} : vector<2x128xf32> to vector<2x32xf32>
    %88 = arith.mulf %85, %59 : vector<2x32xf32>
    %89 = arith.mulf %84, %86 : vector<2x32xf32>
    %90 = arith.addf %88, %89 : vector<2x32xf32>
    %91 = math.tanh %90 : vector<2x32xf32>
    %92 = arith.mulf %87, %91 : vector<2x32xf32>
    %c2 = arith.constant 2 : index
    %c0_26 = arith.constant 0 : index
    %c0_27 = arith.constant 0 : index
    %93 = vector.load %arg15[%c2, %c0_26, %c0_27] : memref<8x2x32xf32, #tpu.memory_space<vmem>>, vector<1x2x32xf32>
    %94 = vector.shape_cast %93 : vector<1x2x32xf32> to vector<2x32xf32>
    %95 = vector.shape_cast %92 : vector<2x32xf32> to vector<1x2x32xf32>
    tpu.vector_store %arg15[%c2, %c0_26, %c0_27], %95 {strides = array<i32>} : memref<8x2x32xf32, #tpu.memory_space<vmem>>, vector<1x2x32xf32>,
    %96 = vector.extract_strided_slice %0 {offsets = [0, 2], sizes = [2, 1], strides = [1, 1]} : vector<2x8xf32> to vector<2x1xf32>
    %cst_28 = arith.constant 0.000000e+00 : f32
    %97 = vector.broadcast %cst_28 : f32 to vector<2x1xf32>
    %98 = arith.cmpf ogt, %96, %97 : vector<2x1xf32>
    %99 = vector.shape_cast %98 : vector<2x1xi1> to vector<2x1xi1>
    %100 = vector.broadcast %99 : vector<2x1xi1> to vector<2x32xi1>
    %101 = arith.select %100, %92, %70 : vector<2x32xi1>, vector<2x32xf32>
    %102 = vector.shape_cast %98 : vector<2x1xi1> to vector<2x1xi1>
    %103 = vector.broadcast %102 : vector<2x1xi1> to vector<2x32xi1>
    %104 = arith.select %103, %90, %73 : vector<2x32xi1>, vector<2x32xf32>
    %105 = vector.extract_strided_slice %7 {offsets = [6, 0], sizes = [2, 128], strides = [1, 1]} : vector<16x128xf32> to vector<2x128xf32>
    %106 = arith.truncf %92 : vector<2x32xf32> to vector<2x32xbf16>
    %cst_29 = arith.constant dense<0.000000e+00> : vector<2x128xf32>
    %107 = tpu.matmul %106, %1, %cst_29 {dimension_numbers = #tpu.dot_dimension_numbers<[1], [0], [0], [1], [0, 0, 1, 1], [], []>} : vector<2x32xbf16>, vector<32x128xbf16>, vector<2x128xf32> -> vector<2x128xf32>
    %108 = arith.addf %105, %107 : vector<2x128xf32>
    %109 = arith.negf %108 : vector<2x128xf32>
    %110 = math.exp %109 : vector<2x128xf32>
    %cst_30 = arith.constant 1.000000e+00 : f32
    %111 = vector.broadcast %cst_30 : f32 to vector<2x128xf32>
    %112 = arith.addf %111, %110 : vector<2x128xf32>
    %113 = arith.divf %111, %112 : vector<2x128xf32>
    %114 = math.tanh %108 : vector<2x128xf32>
    %115 = vector.extract_strided_slice %113 {offsets = [0, 0], sizes = [2, 32], strides = [1, 1]} : vector<2x128xf32> to vector<2x32xf32>
    %116 = vector.extract_strided_slice %113 {offsets = [0, 32], sizes = [2, 32], strides = [1, 1]} : vector<2x128xf32> to vector<2x32xf32>
    %117 = vector.extract_strided_slice %114 {offsets = [0, 64], sizes = [2, 32], strides = [1, 1]} : vector<2x128xf32> to vector<2x32xf32>
    %118 = vector.extract_strided_slice %113 {offsets = [0, 96], sizes = [2, 32], strides = [1, 1]} : vector<2x128xf32> to vector<2x32xf32>
    %119 = arith.mulf %116, %90 : vector<2x32xf32>
    %120 = arith.mulf %115, %117 : vector<2x32xf32>
    %121 = arith.addf %119, %120 : vector<2x32xf32>
    %122 = math.tanh %121 : vector<2x32xf32>
    %123 = arith.mulf %118, %122 : vector<2x32xf32>
    %c3 = arith.constant 3 : index
    %c0_31 = arith.constant 0 : index
    %c0_32 = arith.constant 0 : index
    %124 = vector.load %arg15[%c3, %c0_31, %c0_32] : memref<8x2x32xf32, #tpu.memory_space<vmem>>, vector<1x2x32xf32>
    %125 = vector.shape_cast %124 : vector<1x2x32xf32> to vector<2x32xf32>
    %126 = vector.shape_cast %123 : vector<2x32xf32> to vector<1x2x32xf32>
    tpu.vector_store %arg15[%c3, %c0_31, %c0_32], %126 {strides = array<i32>} : memref<8x2x32xf32, #tpu.memory_space<vmem>>, vector<1x2x32xf32>,
    %127 = vector.extract_strided_slice %0 {offsets = [0, 3], sizes = [2, 1], strides = [1, 1]} : vector<2x8xf32> to vector<2x1xf32>
    %cst_33 = arith.constant 0.000000e+00 : f32
    %128 = vector.broadcast %cst_33 : f32 to vector<2x1xf32>
    %129 = arith.cmpf ogt, %127, %128 : vector<2x1xf32>
    %130 = vector.shape_cast %129 : vector<2x1xi1> to vector<2x1xi1>
    %131 = vector.broadcast %130 : vector<2x1xi1> to vector<2x32xi1>
    %132 = arith.select %131, %123, %101 : vector<2x32xi1>, vector<2x32xf32>
    %133 = vector.shape_cast %129 : vector<2x1xi1> to vector<2x1xi1>
    %134 = vector.broadcast %133 : vector<2x1xi1> to vector<2x32xi1>
    %135 = arith.select %134, %121, %104 : vector<2x32xi1>, vector<2x32xf32>
    %136 = vector.extract_strided_slice %7 {offsets = [8, 0], sizes = [2, 128], strides = [1, 1]} : vector<16x128xf32> to vector<2x128xf32>
    %137 = arith.truncf %123 : vector<2x32xf32> to vector<2x32xbf16>
    %cst_34 = arith.constant dense<0.000000e+00> : vector<2x128xf32>
    %138 = tpu.matmul %137, %1, %cst_34 {dimension_numbers = #tpu.dot_dimension_numbers<[1], [0], [0], [1], [0, 0, 1, 1], [], []>} : vector<2x32xbf16>, vector<32x128xbf16>, vector<2x128xf32> -> vector<2x128xf32>
    %139 = arith.addf %136, %138 : vector<2x128xf32>
    %140 = arith.negf %139 : vector<2x128xf32>
    %141 = math.exp %140 : vector<2x128xf32>
    %cst_35 = arith.constant 1.000000e+00 : f32
    %142 = vector.broadcast %cst_35 : f32 to vector<2x128xf32>
    %143 = arith.addf %142, %141 : vector<2x128xf32>
    %144 = arith.divf %142, %143 : vector<2x128xf32>
    %145 = math.tanh %139 : vector<2x128xf32>
    %146 = vector.extract_strided_slice %144 {offsets = [0, 0], sizes = [2, 32], strides = [1, 1]} : vector<2x128xf32> to vector<2x32xf32>
    %147 = vector.extract_strided_slice %144 {offsets = [0, 32], sizes = [2, 32], strides = [1, 1]} : vector<2x128xf32> to vector<2x32xf32>
    %148 = vector.extract_strided_slice %145 {offsets = [0, 64], sizes = [2, 32], strides = [1, 1]} : vector<2x128xf32> to vector<2x32xf32>
    %149 = vector.extract_strided_slice %144 {offsets = [0, 96], sizes = [2, 32], strides = [1, 1]} : vector<2x128xf32> to vector<2x32xf32>
    %150 = arith.mulf %147, %121 : vector<2x32xf32>
    %151 = arith.mulf %146, %148 : vector<2x32xf32>
    %152 = arith.addf %150, %151 : vector<2x32xf32>
    %153 = math.tanh %152 : vector<2x32xf32>
    %154 = arith.mulf %149, %153 : vector<2x32xf32>
    %c4 = arith.constant 4 : index
    %c0_36 = arith.constant 0 : index
    %c0_37 = arith.constant 0 : index
    %155 = vector.load %arg15[%c4, %c0_36, %c0_37] : memref<8x2x32xf32, #tpu.memory_space<vmem>>, vector<1x2x32xf32>
    %156 = vector.shape_cast %155 : vector<1x2x32xf32> to vector<2x32xf32>
    %157 = vector.shape_cast %154 : vector<2x32xf32> to vector<1x2x32xf32>
    tpu.vector_store %arg15[%c4, %c0_36, %c0_37], %157 {strides = array<i32>} : memref<8x2x32xf32, #tpu.memory_space<vmem>>, vector<1x2x32xf32>,
    %158 = vector.extract_strided_slice %0 {offsets = [0, 4], sizes = [2, 1], strides = [1, 1]} : vector<2x8xf32> to vector<2x1xf32>
    %cst_38 = arith.constant 0.000000e+00 : f32
    %159 = vector.broadcast %cst_38 : f32 to vector<2x1xf32>
    %160 = arith.cmpf ogt, %158, %159 : vector<2x1xf32>
    %161 = vector.shape_cast %160 : vector<2x1xi1> to vector<2x1xi1>
    %162 = vector.broadcast %161 : vector<2x1xi1> to vector<2x32xi1>
    %163 = arith.select %162, %154, %132 : vector<2x32xi1>, vector<2x32xf32>
    %164 = vector.shape_cast %160 : vector<2x1xi1> to vector<2x1xi1>
    %165 = vector.broadcast %164 : vector<2x1xi1> to vector<2x32xi1>
    %166 = arith.select %165, %152, %135 : vector<2x32xi1>, vector<2x32xf32>
    %167 = vector.extract_strided_slice %7 {offsets = [10, 0], sizes = [2, 128], strides = [1, 1]} : vector<16x128xf32> to vector<2x128xf32>
    %168 = arith.truncf %154 : vector<2x32xf32> to vector<2x32xbf16>
    %cst_39 = arith.constant dense<0.000000e+00> : vector<2x128xf32>
    %169 = tpu.matmul %168, %1, %cst_39 {dimension_numbers = #tpu.dot_dimension_numbers<[1], [0], [0], [1], [0, 0, 1, 1], [], []>} : vector<2x32xbf16>, vector<32x128xbf16>, vector<2x128xf32> -> vector<2x128xf32>
    %170 = arith.addf %167, %169 : vector<2x128xf32>
    %171 = arith.negf %170 : vector<2x128xf32>
    %172 = math.exp %171 : vector<2x128xf32>
    %cst_40 = arith.constant 1.000000e+00 : f32
    %173 = vector.broadcast %cst_40 : f32 to vector<2x128xf32>
    %174 = arith.addf %173, %172 : vector<2x128xf32>
    %175 = arith.divf %173, %174 : vector<2x128xf32>
    %176 = math.tanh %170 : vector<2x128xf32>
    %177 = vector.extract_strided_slice %175 {offsets = [0, 0], sizes = [2, 32], strides = [1, 1]} : vector<2x128xf32> to vector<2x32xf32>
    %178 = vector.extract_strided_slice %175 {offsets = [0, 32], sizes = [2, 32], strides = [1, 1]} : vector<2x128xf32> to vector<2x32xf32>
    %179 = vector.extract_strided_slice %176 {offsets = [0, 64], sizes = [2, 32], strides = [1, 1]} : vector<2x128xf32> to vector<2x32xf32>
    %180 = vector.extract_strided_slice %175 {offsets = [0, 96], sizes = [2, 32], strides = [1, 1]} : vector<2x128xf32> to vector<2x32xf32>
    %181 = arith.mulf %178, %152 : vector<2x32xf32>
    %182 = arith.mulf %177, %179 : vector<2x32xf32>
    %183 = arith.addf %181, %182 : vector<2x32xf32>
    %184 = math.tanh %183 : vector<2x32xf32>
    %185 = arith.mulf %180, %184 : vector<2x32xf32>
    %c5 = arith.constant 5 : index
    %c0_41 = arith.constant 0 : index
    %c0_42 = arith.constant 0 : index
    %186 = vector.load %arg15[%c5, %c0_41, %c0_42] : memref<8x2x32xf32, #tpu.memory_space<vmem>>, vector<1x2x32xf32>
    %187 = vector.shape_cast %186 : vector<1x2x32xf32> to vector<2x32xf32>
    %188 = vector.shape_cast %185 : vector<2x32xf32> to vector<1x2x32xf32>
    tpu.vector_store %arg15[%c5, %c0_41, %c0_42], %188 {strides = array<i32>} : memref<8x2x32xf32, #tpu.memory_space<vmem>>, vector<1x2x32xf32>,
    %189 = vector.extract_strided_slice %0 {offsets = [0, 5], sizes = [2, 1], strides = [1, 1]} : vector<2x8xf32> to vector<2x1xf32>
    %cst_43 = arith.constant 0.000000e+00 : f32
    %190 = vector.broadcast %cst_43 : f32 to vector<2x1xf32>
    %191 = arith.cmpf ogt, %189, %190 : vector<2x1xf32>
    %192 = vector.shape_cast %191 : vector<2x1xi1> to vector<2x1xi1>
    %193 = vector.broadcast %192 : vector<2x1xi1> to vector<2x32xi1>
    %194 = arith.select %193, %185, %163 : vector<2x32xi1>, vector<2x32xf32>
    %195 = vector.shape_cast %191 : vector<2x1xi1> to vector<2x1xi1>
    %196 = vector.broadcast %195 : vector<2x1xi1> to vector<2x32xi1>
    %197 = arith.select %196, %183, %166 : vector<2x32xi1>, vector<2x32xf32>
    %198 = vector.extract_strided_slice %7 {offsets = [12, 0], sizes = [2, 128], strides = [1, 1]} : vector<16x128xf32> to vector<2x128xf32>
    %199 = arith.truncf %185 : vector<2x32xf32> to vector<2x32xbf16>
    %cst_44 = arith.constant dense<0.000000e+00> : vector<2x128xf32>
    %200 = tpu.matmul %199, %1, %cst_44 {dimension_numbers = #tpu.dot_dimension_numbers<[1], [0], [0], [1], [0, 0, 1, 1], [], []>} : vector<2x32xbf16>, vector<32x128xbf16>, vector<2x128xf32> -> vector<2x128xf32>
    %201 = arith.addf %198, %200 : vector<2x128xf32>
    %202 = arith.negf %201 : vector<2x128xf32>
    %203 = math.exp %202 : vector<2x128xf32>
    %cst_45 = arith.constant 1.000000e+00 : f32
    %204 = vector.broadcast %cst_45 : f32 to vector<2x128xf32>
    %205 = arith.addf %204, %203 : vector<2x128xf32>
    %206 = arith.divf %204, %205 : vector<2x128xf32>
    %207 = math.tanh %201 : vector<2x128xf32>
    %208 = vector.extract_strided_slice %206 {offsets = [0, 0], sizes = [2, 32], strides = [1, 1]} : vector<2x128xf32> to vector<2x32xf32>
    %209 = vector.extract_strided_slice %206 {offsets = [0, 32], sizes = [2, 32], strides = [1, 1]} : vector<2x128xf32> to vector<2x32xf32>
    %210 = vector.extract_strided_slice %207 {offsets = [0, 64], sizes = [2, 32], strides = [1, 1]} : vector<2x128xf32> to vector<2x32xf32>
    %211 = vector.extract_strided_slice %206 {offsets = [0, 96], sizes = [2, 32], strides = [1, 1]} : vector<2x128xf32> to vector<2x32xf32>
    %212 = arith.mulf %209, %183 : vector<2x32xf32>
    %213 = arith.mulf %208, %210 : vector<2x32xf32>
    %214 = arith.addf %212, %213 : vector<2x32xf32>
    %215 = math.tanh %214 : vector<2x32xf32>
    %216 = arith.mulf %211, %215 : vector<2x32xf32>
    %c6 = arith.constant 6 : index
    %c0_46 = arith.constant 0 : index
    %c0_47 = arith.constant 0 : index
    %217 = vector.load %arg15[%c6, %c0_46, %c0_47] : memref<8x2x32xf32, #tpu.memory_space<vmem>>, vector<1x2x32xf32>
    %218 = vector.shape_cast %217 : vector<1x2x32xf32> to vector<2x32xf32>
    %219 = vector.shape_cast %216 : vector<2x32xf32> to vector<1x2x32xf32>
    tpu.vector_store %arg15[%c6, %c0_46, %c0_47], %219 {strides = array<i32>} : memref<8x2x32xf32, #tpu.memory_space<vmem>>, vector<1x2x32xf32>,
    %220 = vector.extract_strided_slice %0 {offsets = [0, 6], sizes = [2, 1], strides = [1, 1]} : vector<2x8xf32> to vector<2x1xf32>
    %cst_48 = arith.constant 0.000000e+00 : f32
    %221 = vector.broadcast %cst_48 : f32 to vector<2x1xf32>
    %222 = arith.cmpf ogt, %220, %221 : vector<2x1xf32>
    %223 = vector.shape_cast %222 : vector<2x1xi1> to vector<2x1xi1>
    %224 = vector.broadcast %223 : vector<2x1xi1> to vector<2x32xi1>
    %225 = arith.select %224, %216, %194 : vector<2x32xi1>, vector<2x32xf32>
    %226 = vector.shape_cast %222 : vector<2x1xi1> to vector<2x1xi1>
    %227 = vector.broadcast %226 : vector<2x1xi1> to vector<2x32xi1>
    %228 = arith.select %227, %214, %197 : vector<2x32xi1>, vector<2x32xf32>
    %229 = vector.extract_strided_slice %7 {offsets = [14, 0], sizes = [2, 128], strides = [1, 1]} : vector<16x128xf32> to vector<2x128xf32>
    %230 = arith.truncf %216 : vector<2x32xf32> to vector<2x32xbf16>
    %cst_49 = arith.constant dense<0.000000e+00> : vector<2x128xf32>
    %231 = tpu.matmul %230, %1, %cst_49 {dimension_numbers = #tpu.dot_dimension_numbers<[1], [0], [0], [1], [0, 0, 1, 1], [], []>} : vector<2x32xbf16>, vector<32x128xbf16>, vector<2x128xf32> -> vector<2x128xf32>
    %232 = arith.addf %229, %231 : vector<2x128xf32>
    %233 = arith.negf %232 : vector<2x128xf32>
    %234 = math.exp %233 : vector<2x128xf32>
    %cst_50 = arith.constant 1.000000e+00 : f32
    %235 = vector.broadcast %cst_50 : f32 to vector<2x128xf32>
    %236 = arith.addf %235, %234 : vector<2x128xf32>
    %237 = arith.divf %235, %236 : vector<2x128xf32>
    %238 = math.tanh %232 : vector<2x128xf32>
    %239 = vector.extract_strided_slice %237 {offsets = [0, 0], sizes = [2, 32], strides = [1, 1]} : vector<2x128xf32> to vector<2x32xf32>
    %240 = vector.extract_strided_slice %237 {offsets = [0, 32], sizes = [2, 32], strides = [1, 1]} : vector<2x128xf32> to vector<2x32xf32>
    %241 = vector.extract_strided_slice %238 {offsets = [0, 64], sizes = [2, 32], strides = [1, 1]} : vector<2x128xf32> to vector<2x32xf32>
    %242 = vector.extract_strided_slice %237 {offsets = [0, 96], sizes = [2, 32], strides = [1, 1]} : vector<2x128xf32> to vector<2x32xf32>
    %243 = arith.mulf %240, %214 : vector<2x32xf32>
    %244 = arith.mulf %239, %241 : vector<2x32xf32>
    %245 = arith.addf %243, %244 : vector<2x32xf32>
    %246 = math.tanh %245 : vector<2x32xf32>
    %247 = arith.mulf %242, %246 : vector<2x32xf32>
    %c7 = arith.constant 7 : index
    %c0_51 = arith.constant 0 : index
    %c0_52 = arith.constant 0 : index
    %248 = vector.load %arg15[%c7, %c0_51, %c0_52] : memref<8x2x32xf32, #tpu.memory_space<vmem>>, vector<1x2x32xf32>
    %249 = vector.shape_cast %248 : vector<1x2x32xf32> to vector<2x32xf32>
    %250 = vector.shape_cast %247 : vector<2x32xf32> to vector<1x2x32xf32>
    tpu.vector_store %arg15[%c7, %c0_51, %c0_52], %250 {strides = array<i32>} : memref<8x2x32xf32, #tpu.memory_space<vmem>>, vector<1x2x32xf32>,
    %251 = vector.extract_strided_slice %0 {offsets = [0, 7], sizes = [2, 1], strides = [1, 1]} : vector<2x8xf32> to vector<2x1xf32>
    %cst_53 = arith.constant 0.000000e+00 : f32
    %252 = vector.broadcast %cst_53 : f32 to vector<2x1xf32>
    %253 = arith.cmpf ogt, %251, %252 : vector<2x1xf32>
    %254 = vector.shape_cast %253 : vector<2x1xi1> to vector<2x1xi1>
    %255 = vector.broadcast %254 : vector<2x1xi1> to vector<2x32xi1>
    %256 = arith.select %255, %247, %225 : vector<2x32xi1>, vector<2x32xf32>
    %257 = vector.shape_cast %253 : vector<2x1xi1> to vector<2x1xi1>
    %258 = vector.broadcast %257 : vector<2x1xi1> to vector<2x32xi1>
    %259 = arith.select %258, %245, %228 : vector<2x32xi1>, vector<2x32xf32>
    %c0_54 = arith.constant 0 : index
    %c0_55 = arith.constant 0 : index
    %260 = vector.load %arg8[%c0_54, %c0_55] : memref<32x128xbf16, #tpu.memory_space<vmem>>, vector<32x128xbf16>
    %c0_56 = arith.constant 0 : index
    %c0_57 = arith.constant 0 : index
    %261 = vector.load %arg2[%c0_56, %c0_57] : memref<16x32xbf16, #tpu.memory_space<vmem>>, vector<16x32xbf16>
    %c0_58 = arith.constant 0 : index
    %c0_59 = arith.constant 0 : index
    %262 = vector.load %arg7[%c0_58, %c0_59] : memref<32x128xbf16, #tpu.memory_space<vmem>>, vector<32x128xbf16>
    %cst_60 = arith.constant dense<0.000000e+00> : vector<16x128xf32>
    %263 = tpu.matmul %261, %262, %cst_60 {dimension_numbers = #tpu.dot_dimension_numbers<[1], [0], [0], [1], [0, 0, 1, 1], [], []>} : vector<16x32xbf16>, vector<32x128xbf16>, vector<16x128xf32> -> vector<16x128xf32>
    %c0_61 = arith.constant 0 : index
    %c0_62 = arith.constant 0 : index
    %264 = vector.load %arg9[%c0_61, %c0_62] : memref<1x128xf32, #tpu.memory_space<vmem>>, vector<1x128xf32>
    %265 = vector.broadcast %264 : vector<1x128xf32> to vector<16x128xf32>
    %266 = arith.addf %263, %265 : vector<16x128xf32>
    %267 = vector.extract_strided_slice %266 {offsets = [0, 0], sizes = [2, 128], strides = [1, 1]} : vector<16x128xf32> to vector<2x128xf32>
    %268 = arith.truncf %256 : vector<2x32xf32> to vector<2x32xbf16>
    %cst_63 = arith.constant dense<0.000000e+00> : vector<2x128xf32>
    %269 = tpu.matmul %268, %260, %cst_63 {dimension_numbers = #tpu.dot_dimension_numbers<[1], [0], [0], [1], [0, 0, 1, 1], [], []>} : vector<2x32xbf16>, vector<32x128xbf16>, vector<2x128xf32> -> vector<2x128xf32>
    %270 = arith.addf %267, %269 : vector<2x128xf32>
    %271 = arith.negf %270 : vector<2x128xf32>
    %272 = math.exp %271 : vector<2x128xf32>
    %cst_64 = arith.constant 1.000000e+00 : f32
    %273 = vector.broadcast %cst_64 : f32 to vector<2x128xf32>
    %274 = arith.addf %273, %272 : vector<2x128xf32>
    %275 = arith.divf %273, %274 : vector<2x128xf32>
    %276 = math.tanh %270 : vector<2x128xf32>
    %277 = vector.extract_strided_slice %275 {offsets = [0, 0], sizes = [2, 32], strides = [1, 1]} : vector<2x128xf32> to vector<2x32xf32>
    %278 = vector.extract_strided_slice %275 {offsets = [0, 32], sizes = [2, 32], strides = [1, 1]} : vector<2x128xf32> to vector<2x32xf32>
    %279 = vector.extract_strided_slice %276 {offsets = [0, 64], sizes = [2, 32], strides = [1, 1]} : vector<2x128xf32> to vector<2x32xf32>
    %280 = vector.extract_strided_slice %275 {offsets = [0, 96], sizes = [2, 32], strides = [1, 1]} : vector<2x128xf32> to vector<2x32xf32>
    %281 = arith.mulf %278, %259 : vector<2x32xf32>
    %282 = arith.mulf %277, %279 : vector<2x32xf32>
    %283 = arith.addf %281, %282 : vector<2x32xf32>
    %284 = math.tanh %283 : vector<2x32xf32>
    %285 = arith.mulf %280, %284 : vector<2x32xf32>
    %c0_65 = arith.constant 0 : index
    %c0_66 = arith.constant 0 : index
    %c0_67 = arith.constant 0 : index
    %286 = vector.load %arg16[%c0_65, %c0_66, %c0_67] : memref<8x2x32xf32, #tpu.memory_space<vmem>>, vector<1x2x32xf32>
    %287 = vector.shape_cast %286 : vector<1x2x32xf32> to vector<2x32xf32>
    %288 = vector.shape_cast %285 : vector<2x32xf32> to vector<1x2x32xf32>
    tpu.vector_store %arg16[%c0_65, %c0_66, %c0_67], %288 {strides = array<i32>} : memref<8x2x32xf32, #tpu.memory_space<vmem>>, vector<1x2x32xf32>,
    %289 = vector.extract_strided_slice %266 {offsets = [2, 0], sizes = [2, 128], strides = [1, 1]} : vector<16x128xf32> to vector<2x128xf32>
    %290 = arith.truncf %285 : vector<2x32xf32> to vector<2x32xbf16>
    %cst_68 = arith.constant dense<0.000000e+00> : vector<2x128xf32>
    %291 = tpu.matmul %290, %260, %cst_68 {dimension_numbers = #tpu.dot_dimension_numbers<[1], [0], [0], [1], [0, 0, 1, 1], [], []>} : vector<2x32xbf16>, vector<32x128xbf16>, vector<2x128xf32> -> vector<2x128xf32>
    %292 = arith.addf %289, %291 : vector<2x128xf32>
    %293 = arith.negf %292 : vector<2x128xf32>
    %294 = math.exp %293 : vector<2x128xf32>
    %cst_69 = arith.constant 1.000000e+00 : f32
    %295 = vector.broadcast %cst_69 : f32 to vector<2x128xf32>
    %296 = arith.addf %295, %294 : vector<2x128xf32>
    %297 = arith.divf %295, %296 : vector<2x128xf32>
    %298 = math.tanh %292 : vector<2x128xf32>
    %299 = vector.extract_strided_slice %297 {offsets = [0, 0], sizes = [2, 32], strides = [1, 1]} : vector<2x128xf32> to vector<2x32xf32>
    %300 = vector.extract_strided_slice %297 {offsets = [0, 32], sizes = [2, 32], strides = [1, 1]} : vector<2x128xf32> to vector<2x32xf32>
    %301 = vector.extract_strided_slice %298 {offsets = [0, 64], sizes = [2, 32], strides = [1, 1]} : vector<2x128xf32> to vector<2x32xf32>
    %302 = vector.extract_strided_slice %297 {offsets = [0, 96], sizes = [2, 32], strides = [1, 1]} : vector<2x128xf32> to vector<2x32xf32>
    %303 = arith.mulf %300, %283 : vector<2x32xf32>
    %304 = arith.mulf %299, %301 : vector<2x32xf32>
    %305 = arith.addf %303, %304 : vector<2x32xf32>
    %306 = math.tanh %305 : vector<2x32xf32>
    %307 = arith.mulf %302, %306 : vector<2x32xf32>
    %c1_70 = arith.constant 1 : index
    %c0_71 = arith.constant 0 : index
    %c0_72 = arith.constant 0 : index
    %308 = vector.load %arg16[%c1_70, %c0_71, %c0_72] : memref<8x2x32xf32, #tpu.memory_space<vmem>>, vector<1x2x32xf32>
    %309 = vector.shape_cast %308 : vector<1x2x32xf32> to vector<2x32xf32>
    %310 = vector.shape_cast %307 : vector<2x32xf32> to vector<1x2x32xf32>
    tpu.vector_store %arg16[%c1_70, %c0_71, %c0_72], %310 {strides = array<i32>} : memref<8x2x32xf32, #tpu.memory_space<vmem>>, vector<1x2x32xf32>,
    %311 = vector.extract_strided_slice %266 {offsets = [4, 0], sizes = [2, 128], strides = [1, 1]} : vector<16x128xf32> to vector<2x128xf32>
    %312 = arith.truncf %307 : vector<2x32xf32> to vector<2x32xbf16>
    %cst_73 = arith.constant dense<0.000000e+00> : vector<2x128xf32>
    %313 = tpu.matmul %312, %260, %cst_73 {dimension_numbers = #tpu.dot_dimension_numbers<[1], [0], [0], [1], [0, 0, 1, 1], [], []>} : vector<2x32xbf16>, vector<32x128xbf16>, vector<2x128xf32> -> vector<2x128xf32>
    %314 = arith.addf %311, %313 : vector<2x128xf32>
    %315 = arith.negf %314 : vector<2x128xf32>
    %316 = math.exp %315 : vector<2x128xf32>
    %cst_74 = arith.constant 1.000000e+00 : f32
    %317 = vector.broadcast %cst_74 : f32 to vector<2x128xf32>
    %318 = arith.addf %317, %316 : vector<2x128xf32>
    %319 = arith.divf %317, %318 : vector<2x128xf32>
    %320 = math.tanh %314 : vector<2x128xf32>
    %321 = vector.extract_strided_slice %319 {offsets = [0, 0], sizes = [2, 32], strides = [1, 1]} : vector<2x128xf32> to vector<2x32xf32>
    %322 = vector.extract_strided_slice %319 {offsets = [0, 32], sizes = [2, 32], strides = [1, 1]} : vector<2x128xf32> to vector<2x32xf32>
    %323 = vector.extract_strided_slice %320 {offsets = [0, 64], sizes = [2, 32], strides = [1, 1]} : vector<2x128xf32> to vector<2x32xf32>
    %324 = vector.extract_strided_slice %319 {offsets = [0, 96], sizes = [2, 32], strides = [1, 1]} : vector<2x128xf32> to vector<2x32xf32>
    %325 = arith.mulf %322, %305 : vector<2x32xf32>
    %326 = arith.mulf %321, %323 : vector<2x32xf32>
    %327 = arith.addf %325, %326 : vector<2x32xf32>
    %328 = math.tanh %327 : vector<2x32xf32>
    %329 = arith.mulf %324, %328 : vector<2x32xf32>
    %c2_75 = arith.constant 2 : index
    %c0_76 = arith.constant 0 : index
    %c0_77 = arith.constant 0 : index
    %330 = vector.load %arg16[%c2_75, %c0_76, %c0_77] : memref<8x2x32xf32, #tpu.memory_space<vmem>>, vector<1x2x32xf32>
    %331 = vector.shape_cast %330 : vector<1x2x32xf32> to vector<2x32xf32>
    %332 = vector.shape_cast %329 : vector<2x32xf32> to vector<1x2x32xf32>
    tpu.vector_store %arg16[%c2_75, %c0_76, %c0_77], %332 {strides = array<i32>} : memref<8x2x32xf32, #tpu.memory_space<vmem>>, vector<1x2x32xf32>,
    %333 = vector.extract_strided_slice %266 {offsets = [6, 0], sizes = [2, 128], strides = [1, 1]} : vector<16x128xf32> to vector<2x128xf32>
    %334 = arith.truncf %329 : vector<2x32xf32> to vector<2x32xbf16>
    %cst_78 = arith.constant dense<0.000000e+00> : vector<2x128xf32>
    %335 = tpu.matmul %334, %260, %cst_78 {dimension_numbers = #tpu.dot_dimension_numbers<[1], [0], [0], [1], [0, 0, 1, 1], [], []>} : vector<2x32xbf16>, vector<32x128xbf16>, vector<2x128xf32> -> vector<2x128xf32>
    %336 = arith.addf %333, %335 : vector<2x128xf32>
    %337 = arith.negf %336 : vector<2x128xf32>
    %338 = math.exp %337 : vector<2x128xf32>
    %cst_79 = arith.constant 1.000000e+00 : f32
    %339 = vector.broadcast %cst_79 : f32 to vector<2x128xf32>
    %340 = arith.addf %339, %338 : vector<2x128xf32>
    %341 = arith.divf %339, %340 : vector<2x128xf32>
    %342 = math.tanh %336 : vector<2x128xf32>
    %343 = vector.extract_strided_slice %341 {offsets = [0, 0], sizes = [2, 32], strides = [1, 1]} : vector<2x128xf32> to vector<2x32xf32>
    %344 = vector.extract_strided_slice %341 {offsets = [0, 32], sizes = [2, 32], strides = [1, 1]} : vector<2x128xf32> to vector<2x32xf32>
    %345 = vector.extract_strided_slice %342 {offsets = [0, 64], sizes = [2, 32], strides = [1, 1]} : vector<2x128xf32> to vector<2x32xf32>
    %346 = vector.extract_strided_slice %341 {offsets = [0, 96], sizes = [2, 32], strides = [1, 1]} : vector<2x128xf32> to vector<2x32xf32>
    %347 = arith.mulf %344, %327 : vector<2x32xf32>
    %348 = arith.mulf %343, %345 : vector<2x32xf32>
    %349 = arith.addf %347, %348 : vector<2x32xf32>
    %350 = math.tanh %349 : vector<2x32xf32>
    %351 = arith.mulf %346, %350 : vector<2x32xf32>
    %c3_80 = arith.constant 3 : index
    %c0_81 = arith.constant 0 : index
    %c0_82 = arith.constant 0 : index
    %352 = vector.load %arg16[%c3_80, %c0_81, %c0_82] : memref<8x2x32xf32, #tpu.memory_space<vmem>>, vector<1x2x32xf32>
    %353 = vector.shape_cast %352 : vector<1x2x32xf32> to vector<2x32xf32>
    %354 = vector.shape_cast %351 : vector<2x32xf32> to vector<1x2x32xf32>
    tpu.vector_store %arg16[%c3_80, %c0_81, %c0_82], %354 {strides = array<i32>} : memref<8x2x32xf32, #tpu.memory_space<vmem>>, vector<1x2x32xf32>,
    %355 = vector.extract_strided_slice %266 {offsets = [8, 0], sizes = [2, 128], strides = [1, 1]} : vector<16x128xf32> to vector<2x128xf32>
    %356 = arith.truncf %351 : vector<2x32xf32> to vector<2x32xbf16>
    %cst_83 = arith.constant dense<0.000000e+00> : vector<2x128xf32>
    %357 = tpu.matmul %356, %260, %cst_83 {dimension_numbers = #tpu.dot_dimension_numbers<[1], [0], [0], [1], [0, 0, 1, 1], [], []>} : vector<2x32xbf16>, vector<32x128xbf16>, vector<2x128xf32> -> vector<2x128xf32>
    %358 = arith.addf %355, %357 : vector<2x128xf32>
    %359 = arith.negf %358 : vector<2x128xf32>
    %360 = math.exp %359 : vector<2x128xf32>
    %cst_84 = arith.constant 1.000000e+00 : f32
    %361 = vector.broadcast %cst_84 : f32 to vector<2x128xf32>
    %362 = arith.addf %361, %360 : vector<2x128xf32>
    %363 = arith.divf %361, %362 : vector<2x128xf32>
    %364 = math.tanh %358 : vector<2x128xf32>
    %365 = vector.extract_strided_slice %363 {offsets = [0, 0], sizes = [2, 32], strides = [1, 1]} : vector<2x128xf32> to vector<2x32xf32>
    %366 = vector.extract_strided_slice %363 {offsets = [0, 32], sizes = [2, 32], strides = [1, 1]} : vector<2x128xf32> to vector<2x32xf32>
    %367 = vector.extract_strided_slice %364 {offsets = [0, 64], sizes = [2, 32], strides = [1, 1]} : vector<2x128xf32> to vector<2x32xf32>
    %368 = vector.extract_strided_slice %363 {offsets = [0, 96], sizes = [2, 32], strides = [1, 1]} : vector<2x128xf32> to vector<2x32xf32>
    %369 = arith.mulf %366, %349 : vector<2x32xf32>
    %370 = arith.mulf %365, %367 : vector<2x32xf32>
    %371 = arith.addf %369, %370 : vector<2x32xf32>
    %372 = math.tanh %371 : vector<2x32xf32>
    %373 = arith.mulf %368, %372 : vector<2x32xf32>
    %c4_85 = arith.constant 4 : index
    %c0_86 = arith.constant 0 : index
    %c0_87 = arith.constant 0 : index
    %374 = vector.load %arg16[%c4_85, %c0_86, %c0_87] : memref<8x2x32xf32, #tpu.memory_space<vmem>>, vector<1x2x32xf32>
    %375 = vector.shape_cast %374 : vector<1x2x32xf32> to vector<2x32xf32>
    %376 = vector.shape_cast %373 : vector<2x32xf32> to vector<1x2x32xf32>
    tpu.vector_store %arg16[%c4_85, %c0_86, %c0_87], %376 {strides = array<i32>} : memref<8x2x32xf32, #tpu.memory_space<vmem>>, vector<1x2x32xf32>,
    %377 = vector.extract_strided_slice %266 {offsets = [10, 0], sizes = [2, 128], strides = [1, 1]} : vector<16x128xf32> to vector<2x128xf32>
    %378 = arith.truncf %373 : vector<2x32xf32> to vector<2x32xbf16>
    %cst_88 = arith.constant dense<0.000000e+00> : vector<2x128xf32>
    %379 = tpu.matmul %378, %260, %cst_88 {dimension_numbers = #tpu.dot_dimension_numbers<[1], [0], [0], [1], [0, 0, 1, 1], [], []>} : vector<2x32xbf16>, vector<32x128xbf16>, vector<2x128xf32> -> vector<2x128xf32>
    %380 = arith.addf %377, %379 : vector<2x128xf32>
    %381 = arith.negf %380 : vector<2x128xf32>
    %382 = math.exp %381 : vector<2x128xf32>
    %cst_89 = arith.constant 1.000000e+00 : f32
    %383 = vector.broadcast %cst_89 : f32 to vector<2x128xf32>
    %384 = arith.addf %383, %382 : vector<2x128xf32>
    %385 = arith.divf %383, %384 : vector<2x128xf32>
    %386 = math.tanh %380 : vector<2x128xf32>
    %387 = vector.extract_strided_slice %385 {offsets = [0, 0], sizes = [2, 32], strides = [1, 1]} : vector<2x128xf32> to vector<2x32xf32>
    %388 = vector.extract_strided_slice %385 {offsets = [0, 32], sizes = [2, 32], strides = [1, 1]} : vector<2x128xf32> to vector<2x32xf32>
    %389 = vector.extract_strided_slice %386 {offsets = [0, 64], sizes = [2, 32], strides = [1, 1]} : vector<2x128xf32> to vector<2x32xf32>
    %390 = vector.extract_strided_slice %385 {offsets = [0, 96], sizes = [2, 32], strides = [1, 1]} : vector<2x128xf32> to vector<2x32xf32>
    %391 = arith.mulf %388, %371 : vector<2x32xf32>
    %392 = arith.mulf %387, %389 : vector<2x32xf32>
    %393 = arith.addf %391, %392 : vector<2x32xf32>
    %394 = math.tanh %393 : vector<2x32xf32>
    %395 = arith.mulf %390, %394 : vector<2x32xf32>
    %c5_90 = arith.constant 5 : index
    %c0_91 = arith.constant 0 : index
    %c0_92 = arith.constant 0 : index
    %396 = vector.load %arg16[%c5_90, %c0_91, %c0_92] : memref<8x2x32xf32, #tpu.memory_space<vmem>>, vector<1x2x32xf32>
    %397 = vector.shape_cast %396 : vector<1x2x32xf32> to vector<2x32xf32>
    %398 = vector.shape_cast %395 : vector<2x32xf32> to vector<1x2x32xf32>
    tpu.vector_store %arg16[%c5_90, %c0_91, %c0_92], %398 {strides = array<i32>} : memref<8x2x32xf32, #tpu.memory_space<vmem>>, vector<1x2x32xf32>,
    %399 = vector.extract_strided_slice %266 {offsets = [12, 0], sizes = [2, 128], strides = [1, 1]} : vector<16x128xf32> to vector<2x128xf32>
    %400 = arith.truncf %395 : vector<2x32xf32> to vector<2x32xbf16>
    %cst_93 = arith.constant dense<0.000000e+00> : vector<2x128xf32>
    %401 = tpu.matmul %400, %260, %cst_93 {dimension_numbers = #tpu.dot_dimension_numbers<[1], [0], [0], [1], [0, 0, 1, 1], [], []>} : vector<2x32xbf16>, vector<32x128xbf16>, vector<2x128xf32> -> vector<2x128xf32>
    %402 = arith.addf %399, %401 : vector<2x128xf32>
    %403 = arith.negf %402 : vector<2x128xf32>
    %404 = math.exp %403 : vector<2x128xf32>
    %cst_94 = arith.constant 1.000000e+00 : f32
    %405 = vector.broadcast %cst_94 : f32 to vector<2x128xf32>
    %406 = arith.addf %405, %404 : vector<2x128xf32>
    %407 = arith.divf %405, %406 : vector<2x128xf32>
    %408 = math.tanh %402 : vector<2x128xf32>
    %409 = vector.extract_strided_slice %407 {offsets = [0, 0], sizes = [2, 32], strides = [1, 1]} : vector<2x128xf32> to vector<2x32xf32>
    %410 = vector.extract_strided_slice %407 {offsets = [0, 32], sizes = [2, 32], strides = [1, 1]} : vector<2x128xf32> to vector<2x32xf32>
    %411 = vector.extract_strided_slice %408 {offsets = [0, 64], sizes = [2, 32], strides = [1, 1]} : vector<2x128xf32> to vector<2x32xf32>
    %412 = vector.extract_strided_slice %407 {offsets = [0, 96], sizes = [2, 32], strides = [1, 1]} : vector<2x128xf32> to vector<2x32xf32>
    %413 = arith.mulf %410, %393 : vector<2x32xf32>
    %414 = arith.mulf %409, %411 : vector<2x32xf32>
    %415 = arith.addf %413, %414 : vector<2x32xf32>
    %416 = math.tanh %415 : vector<2x32xf32>
    %417 = arith.mulf %412, %416 : vector<2x32xf32>
    %c6_95 = arith.constant 6 : index
    %c0_96 = arith.constant 0 : index
    %c0_97 = arith.constant 0 : index
    %418 = vector.load %arg16[%c6_95, %c0_96, %c0_97] : memref<8x2x32xf32, #tpu.memory_space<vmem>>, vector<1x2x32xf32>
    %419 = vector.shape_cast %418 : vector<1x2x32xf32> to vector<2x32xf32>
    %420 = vector.shape_cast %417 : vector<2x32xf32> to vector<1x2x32xf32>
    tpu.vector_store %arg16[%c6_95, %c0_96, %c0_97], %420 {strides = array<i32>} : memref<8x2x32xf32, #tpu.memory_space<vmem>>, vector<1x2x32xf32>,
    %421 = vector.extract_strided_slice %266 {offsets = [14, 0], sizes = [2, 128], strides = [1, 1]} : vector<16x128xf32> to vector<2x128xf32>
    %422 = arith.truncf %417 : vector<2x32xf32> to vector<2x32xbf16>
    %cst_98 = arith.constant dense<0.000000e+00> : vector<2x128xf32>
    %423 = tpu.matmul %422, %260, %cst_98 {dimension_numbers = #tpu.dot_dimension_numbers<[1], [0], [0], [1], [0, 0, 1, 1], [], []>} : vector<2x32xbf16>, vector<32x128xbf16>, vector<2x128xf32> -> vector<2x128xf32>
    %424 = arith.addf %421, %423 : vector<2x128xf32>
    %425 = arith.negf %424 : vector<2x128xf32>
    %426 = math.exp %425 : vector<2x128xf32>
    %cst_99 = arith.constant 1.000000e+00 : f32
    %427 = vector.broadcast %cst_99 : f32 to vector<2x128xf32>
    %428 = arith.addf %427, %426 : vector<2x128xf32>
    %429 = arith.divf %427, %428 : vector<2x128xf32>
    %430 = math.tanh %424 : vector<2x128xf32>
    %431 = vector.extract_strided_slice %429 {offsets = [0, 0], sizes = [2, 32], strides = [1, 1]} : vector<2x128xf32> to vector<2x32xf32>
    %432 = vector.extract_strided_slice %429 {offsets = [0, 32], sizes = [2, 32], strides = [1, 1]} : vector<2x128xf32> to vector<2x32xf32>
    %433 = vector.extract_strided_slice %430 {offsets = [0, 64], sizes = [2, 32], strides = [1, 1]} : vector<2x128xf32> to vector<2x32xf32>
    %434 = vector.extract_strided_slice %429 {offsets = [0, 96], sizes = [2, 32], strides = [1, 1]} : vector<2x128xf32> to vector<2x32xf32>
    %435 = arith.mulf %432, %415 : vector<2x32xf32>
    %436 = arith.mulf %431, %433 : vector<2x32xf32>
    %437 = arith.addf %435, %436 : vector<2x32xf32>
    %438 = math.tanh %437 : vector<2x32xf32>
    %439 = arith.mulf %434, %438 : vector<2x32xf32>
    %c7_100 = arith.constant 7 : index
    %c0_101 = arith.constant 0 : index
    %c0_102 = arith.constant 0 : index
    %440 = vector.load %arg16[%c7_100, %c0_101, %c0_102] : memref<8x2x32xf32, #tpu.memory_space<vmem>>, vector<1x2x32xf32>
    %441 = vector.shape_cast %440 : vector<1x2x32xf32> to vector<2x32xf32>
    %442 = vector.shape_cast %439 : vector<2x32xf32> to vector<1x2x32xf32>
    tpu.vector_store %arg16[%c7_100, %c0_101, %c0_102], %442 {strides = array<i32>} : memref<8x2x32xf32, #tpu.memory_space<vmem>>, vector<1x2x32xf32>,
    %c0_103 = arith.constant 0 : index
    %c0_104 = arith.constant 0 : index
    %c0_105 = arith.constant 0 : index
    %443 = vector.load %arg15[%c0_103, %c0_104, %c0_105] : memref<8x2x32xf32, #tpu.memory_space<vmem>>, vector<8x2x32xf32>
    %c0_106 = arith.constant 0 : index
    %c0_107 = arith.constant 0 : index
    %c0_108 = arith.constant 0 : index
    %444 = vector.load %arg16[%c0_106, %c0_107, %c0_108] : memref<8x2x32xf32, #tpu.memory_space<vmem>>, vector<8x2x32xf32>
    %c0_109 = arith.constant 0 : index
    %c0_110 = arith.constant 0 : index
    %445 = vector.load %arg10[%c0_109, %c0_110] : memref<32x32xbf16, #tpu.memory_space<vmem>>, vector<32x32xbf16>
    %c0_111 = arith.constant 0 : index
    %c0_112 = arith.constant 0 : index
    %446 = vector.load %arg11[%c0_111, %c0_112] : memref<32x32xbf16, #tpu.memory_space<vmem>>, vector<32x32xbf16>
    %c0_113 = arith.constant 0 : index
    %c0_114 = arith.constant 0 : index
    %447 = vector.load %arg12[%c0_113, %c0_114] : memref<32x32xbf16, #tpu.memory_space<vmem>>, vector<32x32xbf16>
    %cst_115 = arith.constant 0.000000e+00 : f32
    %448 = vector.broadcast %cst_115 : f32 to vector<2x8xf32>
    %449 = arith.cmpf ogt, %0, %448 : vector<2x8xf32>
    %cst_116 = arith.constant 0.000000e+00 : f32
    %cst_117 = arith.constant -1.000000e+09 : f32
    %450 = vector.broadcast %cst_116 : f32 to vector<2x8xf32>
    %451 = vector.broadcast %cst_117 : f32 to vector<2x8xf32>
    %452 = arith.select %449, %450, %451 : vector<2x8xi1>, vector<2x8xf32>
    %453 = vector.extract_strided_slice %444 {offsets = [0, 0, 0], sizes = [8, 1, 32], strides = [1, 1, 1]} : vector<8x2x32xf32> to vector<8x1x32xf32>
    %454 = vector.shape_cast %453 : vector<8x1x32xf32> to vector<8x32xf32>
    %455 = arith.truncf %454 : vector<8x32xf32> to vector<8x32xbf16>
    %456 = vector.extract_strided_slice %443 {offsets = [0, 0, 0], sizes = [8, 1, 32], strides = [1, 1, 1]} : vector<8x2x32xf32> to vector<8x1x32xf32>
    %457 = vector.shape_cast %456 : vector<8x1x32xf32> to vector<8x32xf32>
    %458 = arith.truncf %457 : vector<8x32xf32> to vector<8x32xbf16>
    %cst_118 = arith.constant dense<0.000000e+00> : vector<8x32xf32>
    %459 = tpu.matmul %455, %445, %cst_118 {dimension_numbers = #tpu.dot_dimension_numbers<[1], [0], [0], [1], [0, 0, 1, 1], [], []>} : vector<8x32xbf16>, vector<32x32xbf16>, vector<8x32xf32> -> vector<8x32xf32>
    %460 = arith.truncf %459 : vector<8x32xf32> to vector<8x32xbf16>
    %cst_119 = arith.constant dense<0.000000e+00> : vector<8x8xf32>
    %461 = tpu.matmul %460, %458, %cst_119 {dimension_numbers = #tpu.dot_dimension_numbers<[1], [1], [0], [0], [0, 0, 1, 0], [], []>} : vector<8x32xbf16>, vector<8x32xbf16>, vector<8x8xf32> -> vector<8x8xf32>
    %462 = vector.extract_strided_slice %452 {offsets = [0, 0], sizes = [1, 8], strides = [1, 1]} : vector<2x8xf32> to vector<1x8xf32>
    %463 = vector.broadcast %462 : vector<1x8xf32> to vector<8x8xf32>
    %464 = arith.addf %461, %463 : vector<8x8xf32>
    %cst_120 = arith.constant dense<0xFF800000> : vector<8xf32>
    %465 = vector.multi_reduction <maximumf>, %464, %cst_120 [1] : vector<8x8xf32> to vector<8xf32>
    %466 = vector.shape_cast %465 : vector<8xf32> to vector<8x1xf32>
    %467 = vector.broadcast %466 : vector<8x1xf32> to vector<8x8xf32>
    %468 = arith.subf %464, %467 : vector<8x8xf32>
    %469 = math.exp %468 : vector<8x8xf32>
    %cst_121 = arith.constant dense<0.000000e+00> : vector<8xf32>
    %470 = vector.multi_reduction <add>, %469, %cst_121 [1] : vector<8x8xf32> to vector<8xf32>
    %471 = vector.shape_cast %470 : vector<8xf32> to vector<8x1xf32>
    %472 = tpu.reciprocal %471 {approx = true} : vector<8x1xf32> -> vector<8x1xf32>
    %473 = vector.broadcast %472 : vector<8x1xf32> to vector<8x8xf32>
    %474 = arith.mulf %469, %473 : vector<8x8xf32>
    %475 = arith.truncf %474 : vector<8x8xf32> to vector<8x8xbf16>
    %cst_122 = arith.constant dense<0.000000e+00> : vector<8x32xf32>
    %476 = tpu.matmul %475, %458, %cst_122 {dimension_numbers = #tpu.dot_dimension_numbers<[1], [0], [0], [1], [0, 0, 1, 1], [], []>} : vector<8x8xbf16>, vector<8x32xbf16>, vector<8x32xf32> -> vector<8x32xf32>
    %477 = arith.truncf %476 : vector<8x32xf32> to vector<8x32xbf16>
    %cst_123 = arith.constant dense<0.000000e+00> : vector<8x32xf32>
    %478 = tpu.matmul %477, %446, %cst_123 {dimension_numbers = #tpu.dot_dimension_numbers<[1], [0], [0], [1], [0, 0, 1, 1], [], []>} : vector<8x32xbf16>, vector<32x32xbf16>, vector<8x32xf32> -> vector<8x32xf32>
    %cst_124 = arith.constant dense<0.000000e+00> : vector<8x32xf32>
    %479 = tpu.matmul %455, %447, %cst_124 {dimension_numbers = #tpu.dot_dimension_numbers<[1], [0], [0], [1], [0, 0, 1, 1], [], []>} : vector<8x32xbf16>, vector<32x32xbf16>, vector<8x32xf32> -> vector<8x32xf32>
    %480 = arith.addf %478, %479 : vector<8x32xf32>
    %481 = math.tanh %480 : vector<8x32xf32>
    %482 = vector.shape_cast %481 : vector<8x32xf32> to vector<8x1x32xf32>
    %c0_125 = arith.constant 0 : index
    %c0_126 = arith.constant 0 : index
    %c0_127 = arith.constant 0 : index
    %483 = vector.load %arg13[%c0_125, %c0_126, %c0_127] : memref<8x2x32xf32, #tpu.memory_space<vmem>>, vector<8x1x32xf32>
    tpu.vector_store %arg13[%c0_125, %c0_126, %c0_127], %482 {strides = array<i32>} : memref<8x2x32xf32, #tpu.memory_space<vmem>>, vector<8x1x32xf32>,
    %484 = vector.shape_cast %474 : vector<8x8xf32> to vector<8x1x8xf32>
    %c0_128 = arith.constant 0 : index
    %c0_129 = arith.constant 0 : index
    %c0_130 = arith.constant 0 : index
    %485 = vector.load %arg14[%c0_128, %c0_129, %c0_130] : memref<8x2x8xf32, #tpu.memory_space<vmem>>, vector<8x1x8xf32>
    tpu.vector_store %arg14[%c0_128, %c0_129, %c0_130], %484 {strides = array<i32>} : memref<8x2x8xf32, #tpu.memory_space<vmem>>, vector<8x1x8xf32>,
    %486 = vector.extract_strided_slice %444 {offsets = [0, 1, 0], sizes = [8, 1, 32], strides = [1, 1, 1]} : vector<8x2x32xf32> to vector<8x1x32xf32>
    %487 = vector.shape_cast %486 : vector<8x1x32xf32> to vector<8x32xf32>
    %488 = arith.truncf %487 : vector<8x32xf32> to vector<8x32xbf16>
    %489 = vector.extract_strided_slice %443 {offsets = [0, 1, 0], sizes = [8, 1, 32], strides = [1, 1, 1]} : vector<8x2x32xf32> to vector<8x1x32xf32>
    %490 = vector.shape_cast %489 : vector<8x1x32xf32> to vector<8x32xf32>
    %491 = arith.truncf %490 : vector<8x32xf32> to vector<8x32xbf16>
    %cst_131 = arith.constant dense<0.000000e+00> : vector<8x32xf32>
    %492 = tpu.matmul %488, %445, %cst_131 {dimension_numbers = #tpu.dot_dimension_numbers<[1], [0], [0], [1], [0, 0, 1, 1], [], []>} : vector<8x32xbf16>, vector<32x32xbf16>, vector<8x32xf32> -> vector<8x32xf32>
    %493 = arith.truncf %492 : vector<8x32xf32> to vector<8x32xbf16>
    %cst_132 = arith.constant dense<0.000000e+00> : vector<8x8xf32>
    %494 = tpu.matmul %493, %491, %cst_132 {dimension_numbers = #tpu.dot_dimension_numbers<[1], [1], [0], [0], [0, 0, 1, 0], [], []>} : vector<8x32xbf16>, vector<8x32xbf16>, vector<8x8xf32> -> vector<8x8xf32>
    %495 = vector.extract_strided_slice %452 {offsets = [1, 0], sizes = [1, 8], strides = [1, 1]} : vector<2x8xf32> to vector<1x8xf32>
    %496 = vector.broadcast %495 : vector<1x8xf32> to vector<8x8xf32>
    %497 = arith.addf %494, %496 : vector<8x8xf32>
    %cst_133 = arith.constant dense<0xFF800000> : vector<8xf32>
    %498 = vector.multi_reduction <maximumf>, %497, %cst_133 [1] : vector<8x8xf32> to vector<8xf32>
    %499 = vector.shape_cast %498 : vector<8xf32> to vector<8x1xf32>
    %500 = vector.broadcast %499 : vector<8x1xf32> to vector<8x8xf32>
    %501 = arith.subf %497, %500 : vector<8x8xf32>
    %502 = math.exp %501 : vector<8x8xf32>
    %cst_134 = arith.constant dense<0.000000e+00> : vector<8xf32>
    %503 = vector.multi_reduction <add>, %502, %cst_134 [1] : vector<8x8xf32> to vector<8xf32>
    %504 = vector.shape_cast %503 : vector<8xf32> to vector<8x1xf32>
    %505 = tpu.reciprocal %504 {approx = true} : vector<8x1xf32> -> vector<8x1xf32>
    %506 = vector.broadcast %505 : vector<8x1xf32> to vector<8x8xf32>
    %507 = arith.mulf %502, %506 : vector<8x8xf32>
    %508 = arith.truncf %507 : vector<8x8xf32> to vector<8x8xbf16>
    %cst_135 = arith.constant dense<0.000000e+00> : vector<8x32xf32>
    %509 = tpu.matmul %508, %491, %cst_135 {dimension_numbers = #tpu.dot_dimension_numbers<[1], [0], [0], [1], [0, 0, 1, 1], [], []>} : vector<8x8xbf16>, vector<8x32xbf16>, vector<8x32xf32> -> vector<8x32xf32>
    %510 = arith.truncf %509 : vector<8x32xf32> to vector<8x32xbf16>
    %cst_136 = arith.constant dense<0.000000e+00> : vector<8x32xf32>
    %511 = tpu.matmul %510, %446, %cst_136 {dimension_numbers = #tpu.dot_dimension_numbers<[1], [0], [0], [1], [0, 0, 1, 1], [], []>} : vector<8x32xbf16>, vector<32x32xbf16>, vector<8x32xf32> -> vector<8x32xf32>
    %cst_137 = arith.constant dense<0.000000e+00> : vector<8x32xf32>
    %512 = tpu.matmul %488, %447, %cst_137 {dimension_numbers = #tpu.dot_dimension_numbers<[1], [0], [0], [1], [0, 0, 1, 1], [], []>} : vector<8x32xbf16>, vector<32x32xbf16>, vector<8x32xf32> -> vector<8x32xf32>
    %513 = arith.addf %511, %512 : vector<8x32xf32>
    %514 = math.tanh %513 : vector<8x32xf32>
    %515 = vector.shape_cast %514 : vector<8x32xf32> to vector<8x1x32xf32>
    %c0_138 = arith.constant 0 : index
    %c1_139 = arith.constant 1 : index
    %c0_140 = arith.constant 0 : index
    %516 = vector.load %arg13[%c0_138, %c1_139, %c0_140] : memref<8x2x32xf32, #tpu.memory_space<vmem>>, vector<8x1x32xf32>
    tpu.vector_store %arg13[%c0_138, %c1_139, %c0_140], %515 {strides = array<i32>} : memref<8x2x32xf32, #tpu.memory_space<vmem>>, vector<8x1x32xf32>,
    %517 = vector.shape_cast %507 : vector<8x8xf32> to vector<8x1x8xf32>
    %c0_141 = arith.constant 0 : index
    %c1_142 = arith.constant 1 : index
    %c0_143 = arith.constant 0 : index
    %518 = vector.load %arg14[%c0_141, %c1_142, %c0_143] : memref<8x2x8xf32, #tpu.memory_space<vmem>>, vector<8x1x8xf32>
    tpu.vector_store %arg14[%c0_141, %c1_142, %c0_143], %517 {strides = array<i32>} : memref<8x2x8xf32, #tpu.memory_space<vmem>>, vector<8x1x8xf32>,
    return
  }
  func.func @transform_0(%arg0: i32) -> (i32, i32) {
    %c0_i32 = arith.constant 0 : i32
    %c0_i32_0 = arith.constant 0 : i32
    %c0_i32_1 = arith.constant 0 : i32
    return %c0_i32, %c0_i32_0 : i32, i32
  }
  func.func @transform_1(%arg0: i32) -> (i32, i32) {
    %c0_i32 = arith.constant 0 : i32
    %c0_i32_0 = arith.constant 0 : i32
    %c0_i32_1 = arith.constant 0 : i32
    return %c0_i32, %c0_i32_0 : i32, i32
  }
  func.func @transform_2(%arg0: i32) -> (i32, i32) {
    %c0_i32 = arith.constant 0 : i32
    %c0_i32_0 = arith.constant 0 : i32
    %c0_i32_1 = arith.constant 0 : i32
    return %c0_i32, %c0_i32_0 : i32, i32
  }
  func.func @transform_3(%arg0: i32) -> (i32, i32) {
    %c0_i32 = arith.constant 0 : i32
    %c0_i32_0 = arith.constant 0 : i32
    %c0_i32_1 = arith.constant 0 : i32
    return %c0_i32, %c0_i32_0 : i32, i32
  }
  func.func @transform_4(%arg0: i32) -> (i32, i32) {
    %c0_i32 = arith.constant 0 : i32
    %c0_i32_0 = arith.constant 0 : i32
    %c0_i32_1 = arith.constant 0 : i32
    return %c0_i32, %c0_i32_0 : i32, i32
  }
  func.func @transform_5(%arg0: i32) -> (i32, i32) {
    %c0_i32 = arith.constant 0 : i32
    %c0_i32_0 = arith.constant 0 : i32
    %c0_i32_1 = arith.constant 0 : i32
    return %c0_i32, %c0_i32_0 : i32, i32
  }
  func.func @transform_6(%arg0: i32) -> (i32, i32) {
    %c0_i32 = arith.constant 0 : i32
    %c0_i32_0 = arith.constant 0 : i32
    %c0_i32_1 = arith.constant 0 : i32
    return %c0_i32, %c0_i32_0 : i32, i32
  }
  func.func @transform_7(%arg0: i32) -> (i32, i32) {
    %c0_i32 = arith.constant 0 : i32
    %c0_i32_0 = arith.constant 0 : i32
    %c0_i32_1 = arith.constant 0 : i32
    return %c0_i32, %c0_i32_0 : i32, i32
  }
  func.func @transform_8(%arg0: i32) -> (i32, i32) {
    %c0_i32 = arith.constant 0 : i32
    %c0_i32_0 = arith.constant 0 : i32
    %c0_i32_1 = arith.constant 0 : i32
    return %c0_i32, %c0_i32_0 : i32, i32
  }
  func.func @transform_9(%arg0: i32) -> (i32, i32) {
    %c0_i32 = arith.constant 0 : i32
    %c0_i32_0 = arith.constant 0 : i32
    %c0_i32_1 = arith.constant 0 : i32
    return %c0_i32, %c0_i32_0 : i32, i32
  }
  func.func @transform_10(%arg0: i32) -> (i32, i32) {
    %c0_i32 = arith.constant 0 : i32
    %c0_i32_0 = arith.constant 0 : i32
    %c0_i32_1 = arith.constant 0 : i32
    return %c0_i32, %c0_i32_0 : i32, i32
  }
  func.func @transform_11(%arg0: i32) -> (i32, i32) {
    %c0_i32 = arith.constant 0 : i32
    %c0_i32_0 = arith.constant 0 : i32
    %c0_i32_1 = arith.constant 0 : i32
    return %c0_i32, %c0_i32_0 : i32, i32
  }
  func.func @transform_12(%arg0: i32) -> (i32, i32, i32) {
    %c0_i32 = arith.constant 0 : i32
    %c0_i32_0 = arith.constant 0 : i32
    %c0_i32_1 = arith.constant 0 : i32
    %c0_i32_2 = arith.constant 0 : i32
    return %c0_i32, %c0_i32_0, %c0_i32_1 : i32, i32, i32
  }
  func.func @transform_13(%arg0: i32) -> (i32, i32, i32) {
    %c0_i32 = arith.constant 0 : i32
    %c0_i32_0 = arith.constant 0 : i32
    %c0_i32_1 = arith.constant 0 : i32
    %c0_i32_2 = arith.constant 0 : i32
    return %c0_i32, %c0_i32_0, %c0_i32_1 : i32, i32, i32
  }
}

</mosaic_0001>

<bundles_post_ra>
// kernel: nmt_forward.1
= control target key start
LH: loop header
LB: loop body
LE: loop exit
PB: predicated region body
PF: predicated region fallthrough
CT: control target
= control target key end

     0   :  { %19 = vsyncpa [#allocation5], 0  ;;  %v2270_v2 = vmov 0   ;;  %s2860_s0 = inlined_call_operand.vmem [shape: bf16[16,32], index: 0, kind: input, shape index: {}]   ;;  %s2861_s1 = inlined_call_operand.vmem [shape: bf16[16,32], index: 1, kind: input, shape index: {}]   ;;  %s2862_s2 = inlined_call_operand.vmem [shape: f32[2,8], index: 2, kind: input, shape index: {}]   ;;  %s2863_s3 = inlined_call_operand.vmem [shape: bf16[32,128], index: 3, kind: input, shape index: {}]   ;;  %s2864_s4 = inlined_call_operand.vmem [shape: bf16[32,128], index: 4, kind: input, shape index: {}]   ;;  %s2865_s5 = inlined_call_operand.vmem [shape: f32[1,128], index: 5, kind: input, shape index: {}]   ;;  %s2866_s6 = inlined_call_operand.vmem [shape: bf16[32,128], index: 6, kind: input, shape index: {}]   ;;  %s2867_s7 = inlined_call_operand.vmem [shape: bf16[32,128], index: 7, kind: input, shape index: {}]   ;;  %s2868_s8 = inlined_call_operand.vmem [shape: f32[1,128], index: 8, kind: input, shape index: {}]   ;;  %s2869_s9 = inlined_call_operand.vmem [shape: bf16[32,32], index: 9, kind: input, shape index: {}]   ;;  %s2870_s10 = inlined_call_operand.vmem [shape: bf16[32,32], index: 10, kind: input, shape index: {}]   ;;  %s2871_s11 = inlined_call_operand.vmem [shape: bf16[32,32], index: 11, kind: input, shape index: {}]   ;;  %s2872_s12 = inlined_call_operand.hbm [shape: f32[8,2,32], index: 12, kind: output, shape index: {0}]   ;;  %s2873_s13 = inlined_call_operand.hbm [shape: f32[8,2,8], index: 13, kind: output, shape index: {1}]  }
   0x1   :  { %v2020_v0 = vld [vmem:[%s2863_s3 + $0x8] sm:$0xff]  ;;  %2047 = vset.pattern.permute.xlu2 %v2270_v2  ;;  %v2019_v3 = vld [vmem:[%s2863_s3] sm:$0xff] }
   0x2   :  { %v2017_v1 = vld [vmem:[%s2864_s4 + $0x8] sm:$0xff]  ;;  %88 = vmatpush.bf16.msra.mxu0 %v2020_v0  ;;  %v2016_v4 = vld [vmem:[%s2864_s4] sm:$0xff] }
   0x3   :  { %117 = vmatpush.bf16.msra.mxu1 %v2017_v1  ;;  %189 = vmatpush.bf16.msra.mxu2 %v2017_v1 }
   0x4   :  { %284 = vmatpush.bf16.msra.mxu3 %v2017_v1 }
   0x5   :  { %20 = vsyncpa [#allocation7], 0  ;;  %v2018_v5 = vld [vmem:[%s2860_s0] sm:$0xff]  ;;  %vm78_vm0 = vcmask 261120   ;;  %s2271_s4 = smov 64   ;;  %s1892_s20 = sshll.u32 %s2873_s13, 4  ;;  %s1893_s20 = int_to_ptr.hbm [resolvable:$true] %s1892_s20 }
   0x6   :  { %89 = vmatpush.bf16.msra.mxu0 %v2019_v3  ;;  %v2376_v6 = vld [vmem:[%s2865_s5] ss:$0 sm:$0xff]  ;;  %s2272_s5 = smov 32   ;;  %s2283_s21 = smov 2  }
   0x7   :  { %118 = vmatpush.bf16.msra.mxu1 %v2016_v4  ;;  %190 = vmatpush.bf16.msra.mxu2 %v2016_v4  ;;  %s2284_s13 = smov [#allocation4]   ;;  %s1879_s25 = sshll.u32 %s2872_s12, 4  ;;  %s1880_s25 = int_to_ptr.hbm [resolvable:$true] %s1879_s25 }
   0x8   :  { %285 = vmatpush.bf16.msra.mxu3 %v2016_v4  ;;  %s1877_s22 = sshll.u32 %s2284_s13, 4  ;;  %s1878_s22 = int_to_ptr.vmem [resolvable:$true] %s1877_s22 }
   0x9   :  { %1921 = vmatmul.msk.bf16.vlgmr.msra.gmra.mxu0 %vm78_vm0, %v2018_v5 }
   0xa   :  { %370 = vmatpush.bf16.msrb.mxu0 %v2017_v1  ;;  %119 = vmatmul.bf16.vlgmr.msra.gmra.mxu1 %v2270_v2 }
   0xb   :  { %456 = vmatpush.bf16.msrb.mxu1 %v2017_v1  ;;  %535 = vmatpush.bf16.msrb.mxu2 %v2017_v1 }
   0xc   :  { %629 = vmatpush.bf16.msrb.mxu3 %v2017_v1 }
   0xe   :  { %371 = vmatpush.bf16.msrb.mxu0 %v2016_v4 }
   0xf   :  { %457 = vmatpush.bf16.msrb.mxu1 %v2016_v4  ;;  %536 = vmatpush.bf16.msrb.mxu2 %v2016_v4 }
  0x10   :  { %630 = vmatpush.bf16.msrb.mxu3 %v2016_v4 }
  0x12   :  { %714 = vmatpush.bf16.msra.mxu0 %v2017_v1 }
  0x16   :  { %715 = vmatpush.bf16.msra.mxu0 %v2016_v4 }
  0x86   :  { %v91_v7 = vpop.f32.mrf.mxu0 }
  0x87   :  { %v120_v8 = vpop.f32.mrf.mxu1  ;;  %v2379_v9 = vadd.f32 %v2376_v6, %v91_v7 }
  0x89   :  { %v124_v10 = vadd.f32 %v120_v8, %v2379_v9 }
  0x8b   :  { %2078 = vtanh.f32 %v124_v10  ;;  %v1930_v13 = vmul.f32 -1.442695, %v124_v10 }
  0x8d   :  { %2080 = vpow2.f32 %v1930_v13 }
  0x8f   :  { %v122_v11 = vpop.f32.mrf.mxu1 }
  0x91   :  { %v2079_v12 = vpop.eup %2078 }
  0x92   :  { %147 = vrot.lane.b32.xlu0 %v2079_v12, %s2271_s4 }
  0x93   :  { %v2081_v14 = vpop.eup %2080 }
  0x94   :  { %v128_v15 = vadd.f32 1.0, %v2081_v14 }
  0x96   :  { %2082 = vrcp.f32 %v128_v15  ;;  %v140_v21 = vand.u32 2147483648, %v128_v15  ;;  %vm134_vm2 = vweird.f32 %v128_v15  ;;  %v138_v22 = vand.u32 2147483647, %v128_v15 }
  0x98   :  { %v141_v24 = vor.u32 1.1754944e-38, %v140_v21  ;;  %vm139_vm4 = vcmp.eq.f32.partialorder %v138_v22, 8.507059e+37 }
  0x9c   :  { %v2083_v16 = vpop.eup %2082 }
  0x9d   :  { %v130_v17 = vmul.f32 %v2083_v16, %v128_v15  ;;  %vm135_vm1 = vweird.f32 %v2083_v16 }
  0x9e   :  { %vm136_vm3 = vmor %vm134_vm2, %vm135_vm1 }
  0x9f   :  { %v131_v18 = vsub.f32 1.0, %v130_v17 }
  0xa1   :  { %v132_v19 = vmul.f32 %v2083_v16, %v131_v18 }
  0xa3   :  { %v133_v20 = vadd.f32 %v2083_v16, %v132_v19 }
  0xa5   :  { %v137_v23 = vsel %vm136_vm3, %v2083_v16, %v133_v20 }
  0xa6   :  { %v142_v26 = vsel %vm139_vm4, %v141_v24, %v137_v23 }
  0xa7   :  { %v145_v28 = vmul.f32 0.0, %v142_v26 }
 0x104   :  { %v148_v25 = vpop.permute.xlu0 %147 }
 0x105   :  { %v150_v27 = vmul.f32 %v148_v25, %v142_v26 }
 0x107   :  { %152 = vrot.lane.b32.xlu0 %v150_v27, %s2272_s5 }
 0x179   :  { %v153_v29 = vpop.permute.xlu0 %152 }
 0x17a   :  { %v2384_v30 = vadd.f32 %v153_v29, %v145_v28 }
 0x17c   :  { %2084 = vtanh.f32 %v2384_v30  ;;  %v221_v56 = vrot.slane %v2384_v30, 6 }
 0x182   :  { %v2085_v31 = vpop.eup %2084 }
 0x183   :  { %158 = vrot.lane.b32.xlu1 %v2085_v31, %s2271_s4 }
 0x1f5   :  { %v159_v32 = vpop.permute.xlu1 %158 }
 0x1f6   :  { %v2388_v33 = vmul.f32 %v159_v32, %v142_v26 }
 0x1f8   :  { %v176_v34 = vpack.c.bf16 %v2388_v33, %v2388_v33 }
 0x1fa   :  { %178 = vrot.lane.b32.xlu1 %v176_v34, %s2272_s5 }
 0x26c   :  { %v179_v35 = vpop.permute.xlu1 %178 }
 0x26d   :  { %1931 = vmatmul.msk.bf16.vlgmr.msra.gmra.mxu2 %vm78_vm0, %v179_v35 }
 0x2f0   :  { %v192_v36 = vpop.f32.mrf.mxu2 }
 0x2f1   :  { %v197_v37 = vrot.slane %v192_v36, 6 }
 0x2f3   :  { %v199_v38 = vadd.f32 %v197_v37, %v2379_v9  ;;  %v93_v37 = vpop.f32.mrf.mxu0 }
 0x2f5   :  { %2086 = vtanh.f32 %v199_v38  ;;  %v1932_v41 = vmul.f32 -1.442695, %v199_v38 }
 0x2f7   :  { %2088 = vpow2.f32 %v1932_v41 }
 0x2f8   :  { %v194_v39 = vpop.f32.mrf.mxu2 }
 0x2fb   :  { %v2087_v40 = vpop.eup %2086 }
 0x2fc   :  { %225 = vrot.lane.b32.xlu2 %v2087_v40, %s2271_s4 }
 0x2fd   :  { %v2089_v42 = vpop.eup %2088 }
 0x2fe   :  { %v203_v43 = vadd.f32 1.0, %v2089_v42 }
 0x300   :  { %2090 = vrcp.f32 %v203_v43  ;;  %v215_v49 = vand.u32 2147483648, %v203_v43  ;;  %vm209_vm6 = vweird.f32 %v203_v43  ;;  %v213_v50 = vand.u32 2147483647, %v203_v43 }
 0x302   :  { %v216_v52 = vor.u32 1.1754944e-38, %v215_v49  ;;  %vm214_vm8 = vcmp.eq.f32.partialorder %v213_v50, 8.507059e+37 }
 0x306   :  { %v2091_v44 = vpop.eup %2090 }
 0x307   :  { %v205_v45 = vmul.f32 %v2091_v44, %v203_v43  ;;  %vm210_vm5 = vweird.f32 %v2091_v44 }
 0x308   :  { %vm211_vm7 = vmor %vm209_vm6, %vm210_vm5 }
 0x309   :  { %v206_v46 = vsub.f32 1.0, %v205_v45 }
 0x30b   :  { %v207_v47 = vmul.f32 %v2091_v44, %v206_v46 }
 0x30d   :  { %v208_v48 = vadd.f32 %v2091_v44, %v207_v47 }
 0x30f   :  { %v212_v51 = vsel %vm211_vm7, %v2091_v44, %v208_v48 }
 0x310   :  { %v217_v54 = vsel %vm214_vm8, %v216_v52, %v212_v51 }
 0x311   :  { %v223_v57 = vmul.f32 %v221_v56, %v217_v54 }
 0x356   :  { %v226_v53 = vpop.permute.xlu2 %225 }
 0x357   :  { %v228_v55 = vmul.f32 %v226_v53, %v217_v54 }
 0x359   :  { %230 = vrot.lane.b32.xlu2 %v228_v55, %s2272_s5 }
 0x3b3   :  { %v231_v58 = vpop.permute.xlu2 %230 }
 0x3b4   :  { %v2398_v59 = vadd.f32 %v231_v58, %v223_v57 }
 0x3b6   :  { %2092 = vtanh.f32 %v2398_v59  ;;  %v315_v25 = vrot.slane %v2398_v59, 6 }
 0x3bc   :  { %v2093_v60 = vpop.eup %2092 }
 0x3bd   :  { %236 = vrot.lane.b32.xlu0 %v2093_v60, %s2271_s4 }
 0x42f   :  { %v237_v61 = vpop.permute.xlu0 %236 }
 0x430   :  { %v2402_v62 = vmul.f32 %v237_v61, %v217_v54 }
 0x432   :  { %v270_v63 = vpack.c.bf16 %v2402_v62, %v2402_v62 }
 0x434   :  { %v272_v0 = vrot.slane %v270_v63, 1 }
 0x436   :  { %273 = vrot.lane.b32.xlu1 %v272_v0, %s2272_s5 }
 0x4a8   :  { %v274_v1 = vpop.permute.xlu1 %273 }
 0x4a9   :  { %1933 = vmatmul.msk.bf16.vlgmr.msra.gmra.mxu3 %vm78_vm0, %v274_v1 }
 0x52c   :  { %v287_v3 = vpop.f32.mrf.mxu3 }
 0x52d   :  { %v292_v4 = vrot.slane %v287_v3, 4 }
 0x52f   :  { %v294_v5 = vadd.f32 %v292_v4, %v2379_v9 }
 0x531   :  { %2094 = vtanh.f32 %v294_v5  ;;  %v1934_v10 = vmul.f32 -1.442695, %v294_v5 }
 0x533   :  { %2096 = vpow2.f32 %v1934_v10 }
 0x534   :  { %v289_v7 = vpop.f32.mrf.mxu3 }
 0x535   :  { %v2437_v7 = vadd.f32 %v2376_v6, %v93_v37 }
 0x537   :  { %v2095_v8 = vpop.eup %2094 }
 0x538   :  { %319 = vrot.lane.b32.xlu2 %v2095_v8, %s2271_s4 }
 0x539   :  { %v2097_v11 = vpop.eup %2096 }
 0x53a   :  { %v298_v12 = vadd.f32 1.0, %v2097_v11 }
 0x53c   :  { %2098 = vrcp.f32 %v298_v12  ;;  %v310_v18 = vand.u32 2147483648, %v298_v12  ;;  %vm304_vm10 = vweird.f32 %v298_v12  ;;  %v308_v19 = vand.u32 2147483647, %v298_v12 }
 0x53e   :  { %v311_v21 = vor.u32 1.1754944e-38, %v310_v18  ;;  %vm309_vm12 = vcmp.eq.f32.partialorder %v308_v19, 8.507059e+37 }
 0x542   :  { %v2099_v13 = vpop.eup %2098 }
 0x543   :  { %v300_v14 = vmul.f32 %v2099_v13, %v298_v12  ;;  %vm305_vm9 = vweird.f32 %v2099_v13 }
 0x544   :  { %vm306_vm11 = vmor %vm304_vm10, %vm305_vm9 }
 0x545   :  { %v301_v15 = vsub.f32 1.0, %v300_v14 }
 0x547   :  { %v302_v16 = vmul.f32 %v2099_v13, %v301_v15 }
 0x549   :  { %v303_v17 = vadd.f32 %v2099_v13, %v302_v16 }
 0x54b   :  { %v307_v20 = vsel %vm306_vm11, %v2099_v13, %v303_v17 }
 0x54c   :  { %v312_v23 = vsel %vm309_vm12, %v311_v21, %v307_v20 }
 0x54d   :  { %v317_v26 = vmul.f32 %v315_v25, %v312_v23 }
 0x592   :  { %v320_v22 = vpop.permute.xlu2 %319 }
 0x593   :  { %v322_v24 = vmul.f32 %v320_v22, %v312_v23 }
 0x595   :  { %324 = vrot.lane.b32.xlu0 %v322_v24, %s2272_s5 }
 0x607   :  { %v325_v27 = vpop.permute.xlu0 %324 }
 0x608   :  { %v2412_v28 = vadd.f32 %v325_v27, %v317_v26 }
 0x60a   :  { %2100 = vtanh.f32 %v2412_v28  ;;  %v401_v57 = vrot.slane %v2412_v28, 6 }
 0x610   :  { %v2101_v29 = vpop.eup %2100 }
 0x611   :  { %330 = vrot.lane.b32.xlu1 %v2101_v29, %s2271_s4 }
 0x683   :  { %v331_v31 = vpop.permute.xlu1 %330 }
 0x684   :  { %v2416_v32 = vmul.f32 %v331_v31, %v312_v23 }
 0x686   :  { %v356_v34 = vpack.c.bf16 %v2416_v32, %v2416_v32 }
 0x688   :  { %v358_v35 = vrot.slane %v356_v34, 2 }
 0x68a   :  { %359 = vrot.lane.b32.xlu2 %v358_v35, %s2272_s5 }
 0x6e4   :  { %v360_v36 = vpop.permute.xlu2 %359 }
 0x6e5   :  { %1935 = vmatmul.msk.bf16.vlgmr.msrb.gmra.mxu0 %vm78_vm0, %v360_v36 }
 0x762   :  { %v373_v38 = vpop.f32.mrf.mxu0 }
 0x763   :  { %v378_v39 = vrot.slane %v373_v38, 2 }
 0x765   :  { %v380_v40 = vadd.f32 %v378_v39, %v2379_v9 }
 0x767   :  { %2102 = vtanh.f32 %v380_v40  ;;  %v1936_v43 = vmul.f32 -1.442695, %v380_v40 }
 0x769   :  { %2104 = vpow2.f32 %v1936_v43 }
 0x76a   :  { %v375_v41 = vpop.f32.mrf.mxu0 }
 0x76d   :  { %v2103_v42 = vpop.eup %2102 }
 0x76e   :  { %405 = vrot.lane.b32.xlu0 %v2103_v42, %s2271_s4 }
 0x76f   :  { %v2105_v44 = vpop.eup %2104 }
 0x770   :  { %v384_v45 = vadd.f32 1.0, %v2105_v44 }
 0x772   :  { %2106 = vrcp.f32 %v384_v45  ;;  %v396_v51 = vand.u32 2147483648, %v384_v45  ;;  %vm390_vm14 = vweird.f32 %v384_v45  ;;  %v394_v52 = vand.u32 2147483647, %v384_v45 }
 0x774   :  { %v397_v53 = vor.u32 1.1754944e-38, %v396_v51  ;;  %vm395_vm1 = vcmp.eq.f32.partialorder %v394_v52, 8.507059e+37 }
 0x778   :  { %v2107_v46 = vpop.eup %2106 }
 0x779   :  { %v386_v47 = vmul.f32 %v2107_v46, %v384_v45  ;;  %vm391_vm13 = vweird.f32 %v2107_v46 }
 0x77a   :  { %vm392_vm15 = vmor %vm390_vm14, %vm391_vm13 }
 0x77b   :  { %v387_v48 = vsub.f32 1.0, %v386_v47 }
 0x77d   :  { %v388_v49 = vmul.f32 %v2107_v46, %v387_v48 }
 0x77f   :  { %v389_v50 = vadd.f32 %v2107_v46, %v388_v49 }
 0x781   :  { %v393_v9 = vsel %vm392_vm15, %v2107_v46, %v389_v50 }
 0x782   :  { %v398_v55 = vsel %vm395_vm1, %v397_v53, %v393_v9 }
 0x783   :  { %v403_v58 = vmul.f32 %v401_v57, %v398_v55 }
 0x7e0   :  { %v406_v54 = vpop.permute.xlu0 %405 }
 0x7e1   :  { %v408_v56 = vmul.f32 %v406_v54, %v398_v55 }
 0x7e3   :  { %410 = vrot.lane.b32.xlu1 %v408_v56, %s2272_s5 }
 0x855   :  { %v411_v60 = vpop.permute.xlu1 %410 }
 0x856   :  { %v2426_v61 = vadd.f32 %v411_v60, %v403_v58 }
 0x858   :  { %2108 = vtanh.f32 %v2426_v61  ;;  %v437_v27 = vrot.slane %v2426_v61, 6 }
 0x85e   :  { %v2109_v63 = vpop.eup %2108 }
 0x85f   :  { %416 = vrot.lane.b32.xlu2 %v2109_v63, %s2271_s4 }
 0x8b9   :  { %v417_v0 = vpop.permute.xlu2 %416 }
 0x8ba   :  { %v2430_v1 = vmul.f32 %v417_v0, %v398_v55 }
 0x8bc   :  { %v442_v3 = vpack.c.bf16 %v2430_v1, %v2430_v1 }
 0x8be   :  { %v444_v4 = vrot.slane %v442_v3, 3 }
 0x8c0   :  { %445 = vrot.lane.b32.xlu0 %v444_v4, %s2272_s5 }
 0x932   :  { %v446_v5 = vpop.permute.xlu0 %445 }
 0x933   :  { %1937 = vmatmul.msk.bf16.vlgmr.msrb.gmra.mxu1 %vm78_vm0, %v446_v5 }
 0x9b0   :  { %v459_v8 = vpop.f32.mrf.mxu1 }
 0x9b1   :  { %v463_v10 = vadd.f32 %v459_v8, %v2437_v7 }
 0x9b3   :  { %2110 = vtanh.f32 %v463_v10  ;;  %v1938_v13 = vmul.f32 -1.442695, %v463_v10 }
 0x9b5   :  { %2112 = vpow2.f32 %v1938_v13 }
 0x9b8   :  { %v461_v11 = vpop.f32.mrf.mxu1 }
 0x9b9   :  { %v2111_v12 = vpop.eup %2110 }
 0x9ba   :  { %487 = vrot.lane.b32.xlu1 %v2111_v12, %s2271_s4 }
 0x9bb   :  { %v2113_v14 = vpop.eup %2112 }
 0x9bc   :  { %v467_v15 = vadd.f32 1.0, %v2113_v14 }
 0x9be   :  { %2114 = vrcp.f32 %v467_v15  ;;  %v479_v6 = vand.u32 2147483648, %v467_v15  ;;  %vm473_vm3 = vweird.f32 %v467_v15  ;;  %v477_v21 = vand.u32 2147483647, %v467_v15 }
 0x9c0   :  { %v480_v23 = vor.u32 1.1754944e-38, %v479_v6  ;;  %vm478_vm5 = vcmp.eq.f32.partialorder %v477_v21, 8.507059e+37 }
 0x9c4   :  { %v2115_v16 = vpop.eup %2114 }
 0x9c5   :  { %v469_v17 = vmul.f32 %v2115_v16, %v467_v15  ;;  %vm474_vm2 = vweird.f32 %v2115_v16 }
 0x9c6   :  { %vm475_vm4 = vmor %vm473_vm3, %vm474_vm2 }
 0x9c7   :  { %v470_v18 = vsub.f32 1.0, %v469_v17 }
 0x9c9   :  { %v471_v19 = vmul.f32 %v2115_v16, %v470_v18 }
 0x9cb   :  { %v472_v20 = vadd.f32 %v2115_v16, %v471_v19 }
 0x9cd   :  { %v476_v22 = vsel %vm475_vm4, %v2115_v16, %v472_v20 }
 0x9ce   :  { %v481_v25 = vsel %vm478_vm5, %v480_v23, %v476_v22 }
 0x9cf   :  { %v485_v29 = vmul.f32 %v481_v25, %v437_v27 }
 0xa2c   :  { %v488_v24 = vpop.permute.xlu1 %487 }
 0xa2d   :  { %v490_v26 = vmul.f32 %v488_v24, %v481_v25 }
 0xa2f   :  { %492 = vrot.lane.b32.xlu2 %v490_v26, %s2272_s5 }
 0xa89   :  { %v493_v31 = vpop.permute.xlu2 %492 }
 0xa8a   :  { %v2445_v34 = vadd.f32 %v493_v31, %v485_v29 }
 0xa8c   :  { %2116 = vtanh.f32 %v2445_v34  ;;  %v567_v60 = vrot.slane %v2445_v34, 6 }
 0xa92   :  { %v2117_v35 = vpop.eup %2116 }
 0xa93   :  { %498 = vrot.lane.b32.xlu0 %v2117_v35, %s2271_s4 }
 0xb05   :  { %v499_v36 = vpop.permute.xlu0 %498 }
 0xb06   :  { %v2449_v37 = vmul.f32 %v499_v36, %v481_v25 }
 0xb08   :  { %v522_v38 = vpack.c.bf16 %v2449_v37, %v2449_v37 }
 0xb0a   :  { %524 = vrot.lane.b32.xlu1 %v522_v38, %s2272_s5 }
 0xb7c   :  { %v525_v39 = vpop.permute.xlu1 %524 }
 0xb7d   :  { %1939 = vmatmul.msk.bf16.vlgmr.msrb.gmra.mxu2 %vm78_vm0, %v525_v39 }
 0xc00   :  { %v538_v40 = vpop.f32.mrf.mxu2 }
 0xc01   :  { %v543_v41 = vrot.slane %v538_v40, 6 }
 0xc03   :  { %v545_v42 = vadd.f32 %v543_v41, %v2437_v7 }
 0xc05   :  { %2118 = vtanh.f32 %v545_v42  ;;  %v1940_v45 = vmul.f32 -1.442695, %v545_v42 }
 0xc07   :  { %2120 = vpow2.f32 %v1940_v45 }
 0xc08   :  { %v540_v43 = vpop.f32.mrf.mxu2 }
 0xc0b   :  { %v2119_v44 = vpop.eup %2118 }
 0xc0c   :  { %571 = vrot.lane.b32.xlu2 %v2119_v44, %s2271_s4  ;;  %v2479_v44 = vld [vmem:[%s2862_s2] sm:$0x3]  ;;  %s2278_s2 = smov 96  }
 0xc0d   :  { %v2121_v46 = vpop.eup %2120  ;;  %vm168_vm14 = vcmp.gt.f32.partialorder %v2479_v44, 0.0  ;;  %v2029_v44 = vld [vmem:[%s2870_s10 + $0x8] sm:$0xff] }
 0xc0e   :  { %v549_v47 = vadd.f32 1.0, %v2121_v46  ;;  %v2486_v45 = vsel %vm168_vm14, 1, %v2270_v2 }
 0xc10   :  { %2122 = vrcp.f32 %v549_v47  ;;  %v561_v9 = vand.u32 2147483648, %v549_v47  ;;  %vm555_vm7 = vweird.f32 %v549_v47  ;;  %v559_v53 = vand.u32 2147483647, %v549_v47 }
 0xc12   :  { %v562_v55 = vor.u32 1.1754944e-38, %v561_v9  ;;  %vm560_vm9 = vcmp.eq.f32.partialorder %v559_v53, 8.507059e+37  ;;  %v2273_v53 = vmov 1  }
 0xc13   :  { %2048 = vset.pattern.permute.xlu1 %v2273_v53  ;;  %v351_v53 = vrot.slane %v2412_v28, 4 }
 0xc16   :  { %v2123_v48 = vpop.eup %2122 }
 0xc17   :  { %v551_v49 = vmul.f32 %v2123_v48, %v549_v47  ;;  %vm556_vm6 = vweird.f32 %v2123_v48 }
 0xc18   :  { %vm557_vm8 = vmor %vm555_vm7, %vm556_vm6 }
 0xc19   :  { %v552_v50 = vsub.f32 1.0, %v551_v49 }
 0xc1b   :  { %v553_v51 = vmul.f32 %v2123_v48, %v552_v50 }
 0xc1d   :  { %v554_v52 = vadd.f32 %v2123_v48, %v553_v51  ;;  %v251_v51 = vrot.slane %v2402_v62, 2 }
 0xc1f   :  { %v558_v54 = vsel %vm557_vm8, %v2123_v48, %v554_v52 }
 0xc20   :  { %v563_v57 = vsel %vm560_vm9, %v562_v55, %v558_v54 }
 0xc21   :  { %v569_v63 = vmul.f32 %v567_v60, %v563_v57  ;;  %v431_v60 = vrot.slane %v2430_v1, 6 }
 0xc66   :  { %v572_v56 = vpop.permute.xlu2 %571 }
 0xc67   :  { %v574_v58 = vmul.f32 %v572_v56, %v563_v57 }
 0xc69   :  { %576 = vrot.lane.b32.xlu0 %v574_v58, %s2272_s5 }
 0xcdb   :  { %v577_v0 = vpop.permute.xlu0 %576 }
 0xcdc   :  { %v2459_v3 = vadd.f32 %v577_v0, %v569_v63  ;;  %v345_v63 = vrot.slane %v2416_v32, 4 }
 0xcde   :  { %2124 = vtanh.f32 %v2459_v3  ;;  %v660_v39 = vrot.slane %v2459_v3, 6  ;;  %v2055_v0 = vpack.i.bf16 %v431_v60, %v345_v63  ;;  %v2280_v63 = vmov 7  }
 0xce4   :  { %v2125_v4 = vpop.eup %2124 }
 0xce5   :  { %582 = vrot.lane.b32.xlu1 %v2125_v4, %s2271_s4 }
 0xd57   :  { %v583_v5 = vpop.permute.xlu1 %582 }
 0xd58   :  { %v2463_v8 = vmul.f32 %v583_v5, %v563_v57 }
 0xd5a   :  { %v615_v10 = vpack.c.bf16 %v2463_v8, %v2463_v8 }
 0xd5c   :  { %v617_v11 = vrot.slane %v615_v10, 1 }
 0xd5e   :  { %618 = vrot.lane.b32.xlu2 %v617_v11, %s2272_s5  ;;  %v2274_v11 = vmov 2  }
 0xd5f   :  { %2054 = vset.pattern.permute.xlu0 %v2274_v11  ;;  %v2021_v11 = vld [vmem:[%s2867_s7] sm:$0xff] }
 0xdb8   :  { %v619_v12 = vpop.permute.xlu2 %618 }
 0xdb9   :  { %1941 = vmatmul.msk.bf16.vlgmr.msrb.gmra.mxu3 %vm78_vm0, %v619_v12 }
 0xe3c   :  { %v632_v13 = vpop.f32.mrf.mxu3 }
 0xe3d   :  { %v637_v14 = vrot.slane %v632_v13, 4 }
 0xe3f   :  { %v639_v15 = vadd.f32 %v637_v14, %v2437_v7  ;;  %v2275_v14 = vmov 3  }
 0xe41   :  { %2126 = vtanh.f32 %v639_v15  ;;  %v1942_v18 = vmul.f32 -1.442695, %v639_v15 }
 0xe43   :  { %2128 = vpow2.f32 %v1942_v18 }
 0xe44   :  { %v634_v16 = vpop.f32.mrf.mxu3 }
 0xe47   :  { %v2127_v17 = vpop.eup %2126 }
 0xe48   :  { %664 = vrot.lane.b32.xlu0 %v2127_v17, %s2271_s4 }
 0xe49   :  { %v2129_v19 = vpop.eup %2128 }
 0xe4a   :  { %v643_v20 = vadd.f32 1.0, %v2129_v19 }
 0xe4c   :  { %2130 = vrcp.f32 %v643_v20  ;;  %v655_v25 = vand.u32 2147483648, %v643_v20  ;;  %vm649_vm11 = vweird.f32 %v643_v20  ;;  %v653_v26 = vand.u32 2147483647, %v643_v20 }
 0xe4e   :  { %v656_v31 = vor.u32 1.1754944e-38, %v655_v25  ;;  %vm654_vm13 = vcmp.eq.f32.partialorder %v653_v26, 8.507059e+37 }
 0xe52   :  { %v2131_v6 = vpop.eup %2130 }
 0xe53   :  { %v645_v21 = vmul.f32 %v2131_v6, %v643_v20  ;;  %vm650_vm10 = vweird.f32 %v2131_v6 }
 0xe54   :  { %vm651_vm12 = vmor %vm649_vm11, %vm650_vm10 }
 0xe55   :  { %v646_v22 = vsub.f32 1.0, %v645_v21 }
 0xe57   :  { %v647_v23 = vmul.f32 %v2131_v6, %v646_v22 }
 0xe59   :  { %v648_v24 = vadd.f32 %v2131_v6, %v647_v23  ;;  %v2276_v23 = vmov 4  }
 0xe5b   :  { %v652_v29 = vsel %vm651_vm12, %v2131_v6, %v648_v24  ;;  %v2277_v24 = vmov 6  }
 0xe5c   :  { %v657_v36 = vsel %vm654_vm13, %v656_v31, %v652_v29 }
 0xe5d   :  { %v662_v40 = vmul.f32 %v660_v39, %v657_v36 }
 0xeba   :  { %v665_v35 = vpop.permute.xlu0 %664 }
 0xebb   :  { %v667_v38 = vmul.f32 %v665_v35, %v657_v36 }
 0xebd   :  { %669 = vrot.lane.b32.xlu1 %v667_v38, %s2272_s5 }
 0xf2f   :  { %v670_v41 = vpop.permute.xlu1 %669 }
 0xf30   :  { %v2473_v42 = vadd.f32 %v670_v41, %v662_v40 }
 0xf32   :  { %2132 = vtanh.f32 %v2473_v42  ;;  %v745_v29 = vrot.slane %v2473_v42, 6 }
 0xf38   :  { %v2133_v43 = vpop.eup %2132 }
 0xf39   :  { %675 = vrot.lane.b32.xlu2 %v2133_v43, %s2271_s4 }
 0xf41   :  { %171 = vperm.xlu2 %2047, %v2486_v45  }
 0xf49   :  { %2060 = vset.pattern.permute.xlu2 %v2275_v14 }
 0xf93   :  { %v676_v46 = vpop.permute.xlu2 %675 }
 0xf94   :  { %v2489_v47 = vmul.f32 %v676_v46, %v657_v36 }
 0xf96   :  { %v700_v48 = vpack.c.bf16 %v2489_v47, %v2489_v47 }
 0xf98   :  { %v702_v49 = vrot.slane %v700_v48, 2 }
 0xf9a   :  { %703 = vrot.lane.b32.xlu0 %v702_v49, %s2272_s5 }
 0xf9b   :  { %v2494_v50 = vpop.permute.xlu2 %171 }
 0xf9c   :  { %vm173_vm15 = vcmp.eq.s32.totalorder %v2494_v50, 1 }
 0xf9d   :  { %v174_v2 = vsel %vm173_vm15, %v2388_v33, 0.0  ;;  %v175_v61 = vsel %vm173_vm15, %v2384_v30, 0.0  ;;  %v2023_v30 = vld [vmem:[%s2861_s1] sm:$0xff] }
 0xf9e   :  { %v2049_v52 = vpack.i.bf16 %v174_v2, %v251_v51 }
 0xfa0   :  { %2050 = vrot.lane.b32.xlu2 %v2049_v52, %s2272_s5 }
 0xfa8   :  { %428 = vperm.xlu2 %2060, %v2486_v45  }
 0xfb0   :  { %2074 = vset.pattern.permute.xlu2 %v2280_v63 }
 0xffa   :  { %v2051_v26 = vpop.permute.xlu2 %2050 }
 0xffb   :  { %v2053_v40 = vunpack.i.h.bf16 %v2051_v26  ;;  %v2052_v41 = vunpack.i.l.bf16 %v2051_v26 }
0x1002   :  { %v2516_v39 = vpop.permute.xlu2 %428 }
0x1003   :  { %vm430_vm6 = vcmp.eq.s32.totalorder %v2516_v39, 1 }
0x100c   :  { %v704_v9 = vpop.permute.xlu0 %703 }
0x100d   :  { %1943 = vmatmul.msk.bf16.vlgmr.msra.gmra.mxu0 %vm78_vm0, %v704_v9  ;;  %v2279_v9 = vmov 5  }
0x108a   :  { %v717_v54 = vpop.f32.mrf.mxu0 }
0x108b   :  { %v722_v55 = vrot.slane %v717_v54, 2  ;;  %v606_v54 = vrot.slane %v2459_v3, 2  ;;  %v261_v3 = vrot.slane %v2398_v59, 2 }
0x108d   :  { %v724_v56 = vadd.f32 %v722_v55, %v2437_v7 }
0x108f   :  { %2134 = vtanh.f32 %v724_v56  ;;  %v1944_v4 = vmul.f32 -1.442695, %v724_v56 }
0x1091   :  { %2136 = vpow2.f32 %v1944_v4  ;;  %v596_v4 = vrot.slane %v2463_v8, 2 }
0x1092   :  { %v719_v57 = vpop.f32.mrf.mxu0 }
0x1095   :  { %v2135_v58 = vpop.eup %2134 }
0x1096   :  { %749 = vrot.lane.b32.xlu1 %v2135_v58, %s2271_s4  ;;  %v689_v58 = vrot.slane %v2489_v47, 4 }
0x1097   :  { %v2137_v5 = vpop.eup %2136 }
0x1098   :  { %v728_v10 = vadd.f32 1.0, %v2137_v5 }
0x109a   :  { %2138 = vrcp.f32 %v728_v10  ;;  %v740_v17 = vand.u32 2147483648, %v728_v10  ;;  %vm734_vm2 = vweird.f32 %v728_v10  ;;  %v738_v18 = vand.u32 2147483647, %v728_v10 }
0x109c   :  { %v741_v20 = vor.u32 1.1754944e-38, %v740_v17  ;;  %vm739_vm4 = vcmp.eq.f32.partialorder %v738_v18, 8.507059e+37 }
0x109e   :  { %248 = vperm.xlu1 %2048, %v2486_v45  }
0x10a0   :  { %v2139_v7 = vpop.eup %2138 }
0x10a1   :  { %v730_v12 = vmul.f32 %v2139_v7, %v728_v10  ;;  %vm735_vm1 = vweird.f32 %v2139_v7  ;;  %v2022_v10 = vld [vmem:[%s2867_s7 + $0x8] sm:$0xff] }
0x10a2   :  { %vm736_vm3 = vmor %vm734_vm2, %vm735_vm1  ;;  %855 = vmatpush.bf16.msra.mxu2 %v2022_v10  ;;  %922 = vmatpush.bf16.msra.mxu3 %v2022_v10 }
0x10a3   :  { %v731_v13 = vsub.f32 1.0, %v730_v12  ;;  %993 = vmatpush.bf16.msrb.mxu0 %v2022_v10  ;;  %v2024_v12 = vld [vmem:[%s2866_s6] sm:$0xff] }
0x10a5   :  { %v732_v15 = vmul.f32 %v2139_v7, %v731_v13 }
0x10a6   :  { %2056 = vrot.lane.b32.xlu1 %v2055_v0, %s2272_s5  ;;  %856 = vmatpush.bf16.msra.mxu2 %v2021_v11 }
0x10a7   :  { %v733_v16 = vadd.f32 %v2139_v7, %v732_v15  ;;  %2061 = vset.pattern.permute.xlu1 %v2276_v23  ;;  %923 = vmatpush.bf16.msra.mxu3 %v2021_v11 }
0x10a8   :  { %994 = vmatpush.bf16.msrb.mxu0 %v2021_v11 }
0x10a9   :  { %v737_v19 = vsel %vm736_vm3, %v2139_v7, %v733_v16 }
0x10aa   :  { %v742_v21 = vsel %vm739_vm4, %v741_v20, %v737_v19  ;;  %1135 = vmatpush.bf16.msrb.mxu2 %v2022_v10 }
0x10ab   :  { %v747_v31 = vmul.f32 %v745_v29, %v742_v21  ;;  %1202 = vmatpush.bf16.msrb.mxu3 %v2022_v10 }
0x10ac   :  { %1273 = vmatpush.bf16.msra.mxu0 %v2022_v10 }
0x10ae   :  { %509 = vperm.xlu1 %2061, %v2486_v45   ;;  %1136 = vmatpush.bf16.msrb.mxu2 %v2021_v11 }
0x10af   :  { %1203 = vmatpush.bf16.msrb.mxu3 %v2021_v11 }
0x10b0   :  { %1274 = vmatpush.bf16.msra.mxu0 %v2021_v11 }
0x10b6   :  { %2062 = vset.pattern.permute.xlu1 %v2279_v9 }
0x10b7   :  { %593 = vperm.xlu1 %2062, %v2486_v45  }
0x1108   :  { %v750_v6 = vpop.permute.xlu1 %749 }
0x1109   :  { %v752_v22 = vmul.f32 %v750_v6, %v742_v21 }
0x110b   :  { %754 = vrot.lane.b32.xlu0 %v752_v22, %s2272_s5 }
0x1110   :  { %v2513_v25 = vpop.permute.xlu1 %248 }
0x1111   :  { %vm250_vm5 = vcmp.eq.s32.totalorder %v2513_v25, 1  ;;  %v2597_v25 = vld [vmem:[%s2868_s8] ss:$0 sm:$0xff] }
0x1112   :  { %v259_v49 = vsel %vm250_vm5, %v2052_v41, %v2053_v40 }
0x1113   :  { %342 = vperm.xlu0 %2054, %v2486_v45  }
0x1118   :  { %v2057_v38 = vpop.permute.xlu1 %2056 }
0x1119   :  { %v2058_v43 = vunpack.i.l.bf16 %v2057_v38  ;;  %v2059_v51 = vunpack.i.h.bf16 %v2057_v38  ;;  %v695_v38 = vrot.slane %v2473_v42, 4 }
0x111b   :  { %2068 = vset.pattern.permute.xlu0 %v2277_v24 }
0x1120   :  { %v2545_v0 = vpop.permute.xlu1 %509 }
0x1121   :  { %vm511_vm8 = vcmp.eq.s32.totalorder %v2545_v0, 1 }
0x117d   :  { %v755_v35 = vpop.permute.xlu0 %754 }
0x117e   :  { %v757_v36 = vadd.f32 %v755_v35, %v747_v31 }
0x1180   :  { %2140 = vtanh.f32 %v757_v36  ;;  %v780_v55 = vrot.slane %v757_v36, 6 }
0x1185   :  { %v2519_v46 = vpop.permute.xlu0 %342 }
0x1186   :  { %v2141_v48 = vpop.eup %2140  ;;  %vm344_vm7 = vcmp.eq.s32.totalorder %v2519_v46, 1 }
0x1187   :  { %v349_v2 = vsel %vm344_vm7, %v2058_v43, %v259_v49  ;;  %760 = vrot.lane.b32.xlu2 %v2141_v48, %s2271_s4 }
0x1188   :  { %v435_v52 = vsel %vm430_vm6, %v2059_v51, %v349_v2 }
0x1189   :  { %513 = vrot.lane.b32.xlu0 %v435_v52, %s2278_s2 }
0x1191   :  { %686 = vperm.xlu0 %2068, %v2486_v45  }
0x1199   :  { %352 = vrot.lane.b32.xlu0 %v351_v53, %s2278_s2 }
0x119a   :  { %2075 = vset.pattern.permute.xlu0 %v2280_v63 }
0x11a1   :  { %607 = vrot.lane.b32.xlu0 %v606_v54, %s2278_s2 }
0x11a9   :  { %781 = vrot.lane.b32.xlu0 %v780_v55, %s2278_s2 }
0x11e1   :  { %v761_v56 = vpop.permute.xlu2 %760 }
0x11e2   :  { %v2538_v57 = vmul.f32 %v761_v56, %v742_v21 }
0x11e4   :  { %v774_v60 = vrot.slane %v2538_v57, 6 }
0x11e6   :  { %v2069_v28 = vpack.i.bf16 %v774_v60, %v689_v58 }
0x11e8   :  { %2070 = vrot.lane.b32.xlu1 %v2069_v28, %s2272_s5 }
0x11f0   :  { %262 = vrot.lane.b32.xlu1 %v261_v3, %s2278_s2 }
0x11f8   :  { %438 = vrot.lane.b32.xlu1 %v437_v27, %s2278_s2  ;;  %v2025_v27 = vld [vmem:[%s2866_s6 + $0x8] sm:$0xff] }
0x11f9   :  { %825 = vmatpush.bf16.msra.mxu1 %v2025_v27 }
0x11fb   :  { %v514_v5 = vpop.permute.xlu0 %513 }
0x11fc   :  { %v516_v59 = vsel %vm511_vm8, %v2449_v37, %v514_v5 }
0x11fd   :  { %v2063_v7 = vpack.i.bf16 %v516_v59, %v596_v4  ;;  %826 = vmatpush.bf16.msra.mxu1 %v2024_v12 }
0x11ff   :  { %2064 = vrot.lane.b32.xlu2 %v2063_v7, %s2272_s5 }
0x1200   :  { %1957 = vmatmul.msk.bf16.vlgmr.msra.gmra.mxu1 %vm78_vm0, %v2023_v30 }
0x1201   :  { %1064 = vmatpush.bf16.msrb.mxu1 %v2022_v10 }
0x1203   :  { %v687_v16 = vpop.permute.xlu0 %686 }
0x1204   :  { %vm688_vm10 = vcmp.eq.s32.totalorder %v687_v16, 1 }
0x1205   :  { %1065 = vmatpush.bf16.msrb.mxu1 %v2021_v11 }
0x1207   :  { %771 = vperm.xlu2 %2074, %v2486_v45   ;;  %v594_v45 = vpop.permute.xlu1 %593 }
0x1208   :  { %vm595_vm9 = vcmp.eq.s32.totalorder %v594_v45, 1 }
0x1209   :  { %1344 = vmatpush.bf16.msra.mxu1 %v2022_v10 }
0x120b   :  { %v353_v26 = vpop.permute.xlu0 %352 }
0x120d   :  { %1345 = vmatpush.bf16.msra.mxu1 %v2021_v11 }
0x120f   :  { %266 = vrot.lane.b32.xlu2 %v175_v61, %s2278_s2 }
0x1259   :  { %v2065_v50 = vpop.permute.xlu2 %2064 }
0x125a   :  { %v2071_v13 = vpop.permute.xlu1 %2070  ;;  %v2067_v14 = vunpack.i.h.bf16 %v2065_v50  ;;  %v2066_v15 = vunpack.i.l.bf16 %v2065_v50 }
0x125b   :  { %v2072_v17 = vunpack.i.l.bf16 %v2071_v13  ;;  %v2073_v19 = vunpack.i.h.bf16 %v2071_v13 }
0x125c   :  { %v604_v18 = vsel %vm595_vm9, %v2066_v15, %v2067_v14 }
0x125d   :  { %v693_v6 = vsel %vm688_vm10, %v2072_v17, %v604_v18 }
0x1261   :  { %v772_v20 = vpop.permute.xlu2 %771 }
0x1262   :  { %vm773_vm11 = vcmp.eq.s32.totalorder %v772_v20, 1  ;;  %v263_v21 = vpop.permute.xlu1 %262 }
0x1263   :  { %v778_v22 = vsel %vm773_vm11, %v2073_v19, %v693_v6 }
0x1264   :  { %v833_v23 = vpack.c.bf16 %v778_v22, %v778_v22 }
0x1266   :  { %1966 = vmatmul.msk.bf16.vlgmr.msra.gmra.mxu2 %vm78_vm0, %v833_v23 }
0x1269   :  { %v267_v24 = vpop.permute.xlu2 %266 }
0x126a   :  { %v269_v29 = vsel %vm250_vm5, %v263_v21, %v267_v24  ;;  %v439_v31 = vpop.permute.xlu1 %438 }
0x126b   :  { %v355_v35 = vsel %vm344_vm7, %v353_v26, %v269_v29 }
0x126c   :  { %v441_v36 = vsel %vm430_vm6, %v439_v31, %v355_v35 }
0x126d   :  { %518 = vrot.lane.b32.xlu2 %v441_v36, %s2272_s5 }
0x1275   :  { %696 = vrot.lane.b32.xlu2 %v695_v38, %s2278_s2 }
0x127d   :  { %v828_v39 = vpop.f32.mrf.mxu1 }
0x127e   :  { %v2600_v43 = vadd.f32 %v2597_v25, %v828_v39 }
0x12c7   :  { %v519_v40 = vpop.permute.xlu2 %518 }
0x12c8   :  { %v521_v41 = vsel %vm511_vm8, %v2445_v34, %v519_v40  ;;  %v608_v34 = vpop.permute.xlu0 %607 }
0x12c9   :  { %611 = vrot.lane.b32.xlu1 %v521_v41, %s2278_s2 }
0x12cf   :  { %v697_v52 = vpop.permute.xlu2 %696 }
0x12d0   :  { %v782_v53 = vpop.permute.xlu0 %781 }
0x12e9   :  { %v858_v46 = vpop.f32.mrf.mxu2 }
0x12ea   :  { %v862_v42 = vadd.f32 %v858_v46, %v2600_v43 }
0x12ec   :  { %2142 = vtanh.f32 %v862_v42  ;;  %v1967_v51 = vmul.f32 -1.442695, %v862_v42 }
0x12ee   :  { %2144 = vpow2.f32 %v1967_v51 }
0x12f1   :  { %v860_v48 = vpop.f32.mrf.mxu2 }
0x12f2   :  { %v2143_v49 = vpop.eup %2142 }
0x12f3   :  { %889 = vrot.lane.b32.xlu1 %v2143_v49, %s2271_s4 }
0x12f4   :  { %v2145_v56 = vpop.eup %2144 }
0x12f5   :  { %v866_v58 = vadd.f32 1.0, %v2145_v56 }
0x12f7   :  { %2146 = vrcp.f32 %v866_v58  ;;  %v878_v4 = vand.u32 2147483648, %v866_v58  ;;  %vm872_vm13 = vweird.f32 %v866_v58  ;;  %v876_v5 = vand.u32 2147483647, %v866_v58 }
0x12f9   :  { %v879_v59 = vor.u32 1.1754944e-38, %v878_v4  ;;  %vm877_vm1 = vcmp.eq.f32.partialorder %v876_v5, 8.507059e+37 }
0x12fd   :  { %v2147_v60 = vpop.eup %2146 }
0x12fe   :  { %v868_v63 = vmul.f32 %v2147_v60, %v866_v58  ;;  %vm873_vm12 = vweird.f32 %v2147_v60 }
0x12ff   :  { %vm874_vm15 = vmor %vm872_vm13, %vm873_vm12 }
0x1300   :  { %v869_v28 = vsub.f32 1.0, %v868_v63 }
0x1302   :  { %v870_v3 = vmul.f32 %v2147_v60, %v869_v28 }
0x1304   :  { %v871_v0 = vadd.f32 %v2147_v60, %v870_v3 }
0x1306   :  { %v875_v10 = vsel %vm874_vm15, %v2147_v60, %v871_v0 }
0x1307   :  { %v880_v7 = vsel %vm877_vm1, %v879_v59, %v875_v10 }
0x133b   :  { %v612_v2 = vpop.permute.xlu1 %611 }
0x133c   :  { %v614_v9 = vsel %vm595_vm9, %v608_v34, %v612_v2 }
0x133d   :  { %v699_v54 = vsel %vm688_vm10, %v697_v52, %v614_v9 }
0x133e   :  { %v784_v55 = vsel %vm773_vm11, %v782_v53, %v699_v54 }
0x133f   :  { %884 = vrot.lane.b32.xlu2 %v784_v55, %s2272_s5 }
0x1365   :  { %v890_v61 = vpop.permute.xlu1 %889 }
0x1366   :  { %v892_v27 = vmul.f32 %v890_v61, %v880_v7 }
0x1368   :  { %894 = vrot.lane.b32.xlu0 %v892_v27, %s2272_s5 }
0x1399   :  { %v885_v11 = vpop.permute.xlu2 %884 }
0x139a   :  { %v887_v12 = vmul.f32 %v885_v11, %v880_v7 }
0x13da   :  { %v895_v30 = vpop.permute.xlu0 %894 }
0x13db   :  { %v897_v45 = vadd.f32 %v895_v30, %v887_v12 }
0x13dd   :  { %2148 = vtanh.f32 %v897_v45  ;;  %v954_v48 = vrot.slane %v897_v45, 6 }
0x13e3   :  { %v2149_v50 = vpop.eup %2148 }
0x13e4   :  { %900 = vrot.lane.b32.xlu1 %v2149_v50, %s2271_s4 }
0x1456   :  { %v901_v13 = vpop.permute.xlu1 %900 }
0x1457   :  { %v2610_v14 = vmul.f32 %v901_v13, %v880_v7 }
0x1459   :  { %v909_v15 = vpack.c.bf16 %v2610_v14, %v2610_v14 }
0x145b   :  { %911 = vrot.lane.b32.xlu2 %v909_v15, %s2272_s5 }
0x14b5   :  { %v912_v16 = vpop.permute.xlu2 %911 }
0x14b6   :  { %1968 = vmatmul.msk.bf16.vlgmr.msra.gmra.mxu3 %vm78_vm0, %v912_v16 }
0x1539   :  { %v925_v17 = vpop.f32.mrf.mxu3 }
0x153a   :  { %v930_v18 = vrot.slane %v925_v17, 6 }
0x153c   :  { %v932_v19 = vadd.f32 %v930_v18, %v2600_v43 }
0x153e   :  { %2150 = vtanh.f32 %v932_v19  ;;  %v1969_v21 = vmul.f32 -1.442695, %v932_v19 }
0x1540   :  { %2152 = vpow2.f32 %v1969_v21 }
0x1541   :  { %v927_v20 = vpop.f32.mrf.mxu3 }
0x1544   :  { %v2151_v6 = vpop.eup %2150 }
0x1545   :  { %958 = vrot.lane.b32.xlu0 %v2151_v6, %s2271_s4 }
0x1546   :  { %v2153_v22 = vpop.eup %2152 }
0x1547   :  { %v936_v23 = vadd.f32 1.0, %v2153_v22 }
0x1549   :  { %2154 = vrcp.f32 %v936_v23  ;;  %v948_v36 = vand.u32 2147483648, %v936_v23  ;;  %vm942_vm3 = vweird.f32 %v936_v23  ;;  %v946_v38 = vand.u32 2147483647, %v936_v23 }
0x154b   :  { %v949_v41 = vor.u32 1.1754944e-38, %v948_v36  ;;  %vm947_vm5 = vcmp.eq.f32.partialorder %v946_v38, 8.507059e+37 }
0x154f   :  { %v2155_v24 = vpop.eup %2154 }
0x1550   :  { %v938_v26 = vmul.f32 %v2155_v24, %v936_v23  ;;  %vm943_vm2 = vweird.f32 %v2155_v24 }
0x1551   :  { %vm944_vm4 = vmor %vm942_vm3, %vm943_vm2 }
0x1552   :  { %v939_v29 = vsub.f32 1.0, %v938_v26 }
0x1554   :  { %v940_v31 = vmul.f32 %v2155_v24, %v939_v29 }
0x1556   :  { %v941_v35 = vadd.f32 %v2155_v24, %v940_v31 }
0x1558   :  { %v945_v40 = vsel %vm944_vm4, %v2155_v24, %v941_v35  ;;  %v830_v24 = vpop.f32.mrf.mxu1 }
0x1559   :  { %v950_v46 = vsel %vm947_vm5, %v949_v41, %v945_v40 }
0x155a   :  { %v956_v49 = vmul.f32 %v954_v48, %v950_v46 }
0x15b7   :  { %v959_v39 = vpop.permute.xlu0 %958 }
0x15b8   :  { %v961_v42 = vmul.f32 %v959_v39, %v950_v46 }
0x15ba   :  { %963 = vrot.lane.b32.xlu1 %v961_v42, %s2272_s5 }
0x162c   :  { %v964_v34 = vpop.permute.xlu1 %963 }
0x162d   :  { %v966_v51 = vadd.f32 %v964_v34, %v956_v49 }
0x162f   :  { %2156 = vtanh.f32 %v966_v51  ;;  %v1025_v15 = vrot.slane %v966_v51, 6 }
0x1635   :  { %v2157_v2 = vpop.eup %2156 }
0x1636   :  { %969 = vrot.lane.b32.xlu2 %v2157_v2, %s2271_s4 }
0x1690   :  { %v970_v52 = vpop.permute.xlu2 %969 }
0x1691   :  { %v2620_v9 = vmul.f32 %v970_v52, %v950_v46 }
0x1693   :  { %v979_v53 = vpack.c.bf16 %v2620_v9, %v2620_v9 }
0x1695   :  { %v981_v54 = vrot.slane %v979_v53, 1 }
0x1697   :  { %982 = vrot.lane.b32.xlu0 %v981_v54, %s2272_s5 }
0x1709   :  { %v983_v55 = vpop.permute.xlu0 %982 }
0x170a   :  { %1970 = vmatmul.msk.bf16.vlgmr.msrb.gmra.mxu0 %vm78_vm0, %v983_v55 }
0x1787   :  { %v996_v56 = vpop.f32.mrf.mxu0 }
0x1788   :  { %v1001_v58 = vrot.slane %v996_v56, 4 }
0x178a   :  { %v1003_v60 = vadd.f32 %v1001_v58, %v2600_v43 }
0x178c   :  { %2158 = vtanh.f32 %v1003_v60  ;;  %v1971_v3 = vmul.f32 -1.442695, %v1003_v60 }
0x178e   :  { %2160 = vpow2.f32 %v1971_v3 }
0x178f   :  { %v998_v63 = vpop.f32.mrf.mxu0 }
0x1792   :  { %v2159_v28 = vpop.eup %2158 }
0x1793   :  { %1029 = vrot.lane.b32.xlu1 %v2159_v28, %s2271_s4 }
0x1794   :  { %v2161_v0 = vpop.eup %2160 }
0x1795   :  { %v1007_v4 = vadd.f32 1.0, %v2161_v0 }
0x1797   :  { %2162 = vrcp.f32 %v1007_v4  ;;  %v1019_v27 = vand.u32 2147483648, %v1007_v4  ;;  %vm1013_vm7 = vweird.f32 %v1007_v4  ;;  %v1017_v11 = vand.u32 2147483647, %v1007_v4 }
0x1799   :  { %v1020_v30 = vor.u32 1.1754944e-38, %v1019_v27  ;;  %vm1018_vm9 = vcmp.eq.f32.partialorder %v1017_v11, 8.507059e+37 }
0x179d   :  { %v2163_v5 = vpop.eup %2162 }
0x179e   :  { %v1009_v10 = vmul.f32 %v2163_v5, %v1007_v4  ;;  %vm1014_vm6 = vweird.f32 %v2163_v5 }
0x179f   :  { %vm1015_vm8 = vmor %vm1013_vm7, %vm1014_vm6 }
0x17a0   :  { %v1010_v59 = vsub.f32 1.0, %v1009_v10  ;;  %v2647_v10 = vadd.f32 %v2597_v25, %v830_v24 }
0x17a2   :  { %v1011_v7 = vmul.f32 %v2163_v5, %v1010_v59 }
0x17a4   :  { %v1012_v61 = vadd.f32 %v2163_v5, %v1011_v7 }
0x17a6   :  { %v1016_v12 = vsel %vm1015_vm8, %v2163_v5, %v1012_v61 }
0x17a7   :  { %v1021_v50 = vsel %vm1018_vm9, %v1020_v30, %v1016_v12 }
0x17a8   :  { %v1027_v16 = vmul.f32 %v1025_v15, %v1021_v50 }
0x1805   :  { %v1030_v45 = vpop.permute.xlu1 %1029 }
0x1806   :  { %v1032_v13 = vmul.f32 %v1030_v45, %v1021_v50 }
0x1808   :  { %1034 = vrot.lane.b32.xlu2 %v1032_v13, %s2272_s5 }
0x1862   :  { %v1035_v17 = vpop.permute.xlu2 %1034 }
0x1863   :  { %v1037_v18 = vadd.f32 %v1035_v17, %v1027_v16 }
0x1865   :  { %2164 = vtanh.f32 %v1037_v18  ;;  %v1096_v55 = vrot.slane %v1037_v18, 6 }
0x186b   :  { %v2165_v19 = vpop.eup %2164 }
0x186c   :  { %1040 = vrot.lane.b32.xlu0 %v2165_v19, %s2271_s4 }
0x18de   :  { %v1041_v20 = vpop.permute.xlu0 %1040 }
0x18df   :  { %v2630_v6 = vmul.f32 %v1041_v20, %v1021_v50 }
0x18e1   :  { %v1050_v21 = vpack.c.bf16 %v2630_v6, %v2630_v6 }
0x18e3   :  { %v1052_v22 = vrot.slane %v1050_v21, 2 }
0x18e5   :  { %1053 = vrot.lane.b32.xlu1 %v1052_v22, %s2272_s5 }
0x1957   :  { %v1054_v23 = vpop.permute.xlu1 %1053 }
0x1958   :  { %1972 = vmatmul.msk.bf16.vlgmr.msrb.gmra.mxu1 %vm78_vm0, %v1054_v23 }
0x19d5   :  { %v1067_v26 = vpop.f32.mrf.mxu1 }
0x19d6   :  { %v1072_v29 = vrot.slane %v1067_v26, 2 }
0x19d8   :  { %v1074_v31 = vadd.f32 %v1072_v29, %v2600_v43 }
0x19da   :  { %2166 = vtanh.f32 %v1074_v31  ;;  %v1973_v38 = vmul.f32 -1.442695, %v1074_v31 }
0x19dc   :  { %2168 = vpow2.f32 %v1973_v38 }
0x19dd   :  { %v1069_v35 = vpop.f32.mrf.mxu1 }
0x19e0   :  { %v2167_v36 = vpop.eup %2166 }
0x19e1   :  { %1100 = vrot.lane.b32.xlu2 %v2167_v36, %s2271_s4 }
0x19e2   :  { %v2169_v40 = vpop.eup %2168 }
0x19e3   :  { %v1078_v41 = vadd.f32 1.0, %v2169_v40 }
0x19e5   :  { %2170 = vrcp.f32 %v1078_v41  ;;  %v1090_v34 = vand.u32 2147483648, %v1078_v41  ;;  %vm1084_vm11 = vweird.f32 %v1078_v41  ;;  %v1088_v51 = vand.u32 2147483647, %v1078_v41 }
0x19e7   :  { %v1091_v2 = vor.u32 1.1754944e-38, %v1090_v34  ;;  %vm1089_vm13 = vcmp.eq.f32.partialorder %v1088_v51, 8.507059e+37 }
0x19eb   :  { %v2171_v39 = vpop.eup %2170 }
0x19ec   :  { %v1080_v46 = vmul.f32 %v2171_v39, %v1078_v41  ;;  %vm1085_vm10 = vweird.f32 %v2171_v39 }
0x19ed   :  { %vm1086_vm12 = vmor %vm1084_vm11, %vm1085_vm10 }
0x19ee   :  { %v1081_v42 = vsub.f32 1.0, %v1080_v46 }
0x19f0   :  { %v1082_v48 = vmul.f32 %v2171_v39, %v1081_v42 }
0x19f2   :  { %v1083_v49 = vadd.f32 %v2171_v39, %v1082_v48 }
0x19f4   :  { %v1087_v43 = vsel %vm1086_vm12, %v2171_v39, %v1083_v49 }
0x19f5   :  { %v1092_v53 = vsel %vm1089_vm13, %v1091_v2, %v1087_v43 }
0x19f6   :  { %v1098_v56 = vmul.f32 %v1096_v55, %v1092_v53 }
0x1a3b   :  { %v1101_v52 = vpop.permute.xlu2 %1100 }
0x1a3c   :  { %v1103_v54 = vmul.f32 %v1101_v52, %v1092_v53 }
0x1a3e   :  { %1105 = vrot.lane.b32.xlu0 %v1103_v54, %s2272_s5 }
0x1ab0   :  { %v1106_v58 = vpop.permute.xlu0 %1105 }
0x1ab1   :  { %v1108_v60 = vadd.f32 %v1106_v58, %v1098_v56 }
0x1ab3   :  { %2172 = vtanh.f32 %v1108_v60  ;;  %v1164_v23 = vrot.slane %v1108_v60, 6 }
0x1ab9   :  { %v2173_v63 = vpop.eup %2172 }
0x1aba   :  { %1111 = vrot.lane.b32.xlu1 %v2173_v63, %s2271_s4 }
0x1b2c   :  { %v1112_v28 = vpop.permute.xlu1 %1111 }
0x1b2d   :  { %v2640_v3 = vmul.f32 %v1112_v28, %v1092_v53 }
0x1b2f   :  { %v1121_v0 = vpack.c.bf16 %v2640_v3, %v2640_v3 }
0x1b31   :  { %v1123_v4 = vrot.slane %v1121_v0, 3 }
0x1b33   :  { %1124 = vrot.lane.b32.xlu2 %v1123_v4, %s2272_s5 }
0x1b8d   :  { %v1125_v5 = vpop.permute.xlu2 %1124 }
0x1b8e   :  { %1974 = vmatmul.msk.bf16.vlgmr.msrb.gmra.mxu2 %vm78_vm0, %v1125_v5 }
0x1c11   :  { %v1138_v59 = vpop.f32.mrf.mxu2 }
0x1c12   :  { %v1142_v7 = vadd.f32 %v1138_v59, %v2647_v10 }
0x1c14   :  { %2174 = vtanh.f32 %v1142_v7  ;;  %v1975_v11 = vmul.f32 -1.442695, %v1142_v7 }
0x1c16   :  { %2176 = vpow2.f32 %v1975_v11 }
0x1c19   :  { %v1140_v61 = vpop.f32.mrf.mxu2 }
0x1c1a   :  { %v2175_v27 = vpop.eup %2174 }
0x1c1b   :  { %1168 = vrot.lane.b32.xlu0 %v2175_v27, %s2271_s4 }
0x1c1c   :  { %v2177_v12 = vpop.eup %2176 }
0x1c1d   :  { %v1146_v30 = vadd.f32 1.0, %v2177_v12 }
0x1c1f   :  { %2178 = vrcp.f32 %v1146_v30  ;;  %v1158_v25 = vand.u32 2147483648, %v1146_v30  ;;  %vm1152_vm1 = vweird.f32 %v1146_v30  ;;  %v1156_v17 = vand.u32 2147483647, %v1146_v30 }
0x1c21   :  { %v1159_v19 = vor.u32 1.1754944e-38, %v1158_v25  ;;  %vm1157_vm3 = vcmp.eq.f32.partialorder %v1156_v17, 8.507059e+37 }
0x1c25   :  { %v2179_v45 = vpop.eup %2178 }
0x1c26   :  { %v1148_v50 = vmul.f32 %v2179_v45, %v1146_v30  ;;  %vm1153_vm15 = vweird.f32 %v2179_v45 }
0x1c27   :  { %vm1154_vm2 = vmor %vm1152_vm1, %vm1153_vm15 }
0x1c28   :  { %v1149_v13 = vsub.f32 1.0, %v1148_v50 }
0x1c2a   :  { %v1150_v15 = vmul.f32 %v2179_v45, %v1149_v13 }
0x1c2c   :  { %v1151_v16 = vadd.f32 %v2179_v45, %v1150_v15 }
0x1c2e   :  { %v1155_v18 = vsel %vm1154_vm2, %v2179_v45, %v1151_v16  ;;  %vm245_vm2 = vcmask 257026  }
0x1c2f   :  { %v1160_v21 = vsel %vm1157_vm3, %v1159_v19, %v1155_v18  ;;  %vm425_vm3 = vcmask 261126  }
0x1c30   :  { %v1166_v24 = vmul.f32 %v1164_v23, %v1160_v21 }
0x1c8d   :  { %v1169_v20 = vpop.permute.xlu0 %1168 }
0x1c8e   :  { %v1171_v22 = vmul.f32 %v1169_v20, %v1160_v21 }
0x1c90   :  { %1173 = vrot.lane.b32.xlu1 %v1171_v22, %s2272_s5 }
0x1d02   :  { %v1174_v26 = vpop.permute.xlu1 %1173 }
0x1d03   :  { %v1176_v29 = vadd.f32 %v1174_v26, %v1166_v24 }
0x1d05   :  { %2180 = vtanh.f32 %v1176_v29  ;;  %v1234_v4 = vrot.slane %v1176_v29, 6 }
0x1d0b   :  { %v2181_v31 = vpop.eup %2180 }
0x1d0c   :  { %1179 = vrot.lane.b32.xlu2 %v2181_v31, %s2271_s4 }
0x1d66   :  { %v1180_v35 = vpop.permute.xlu2 %1179 }
0x1d67   :  { %v2653_v36 = vmul.f32 %v1180_v35, %v1160_v21 }
0x1d69   :  { %v1189_v38 = vpack.c.bf16 %v2653_v36, %v2653_v36 }
0x1d6b   :  { %1191 = vrot.lane.b32.xlu0 %v1189_v38, %s2272_s5 }
0x1ddd   :  { %v1192_v40 = vpop.permute.xlu0 %1191 }
0x1dde   :  { %1976 = vmatmul.msk.bf16.vlgmr.msrb.gmra.mxu3 %vm78_vm0, %v1192_v40 }
0x1e61   :  { %v1205_v41 = vpop.f32.mrf.mxu3 }
0x1e62   :  { %v1210_v39 = vrot.slane %v1205_v41, 6 }
0x1e64   :  { %v1212_v46 = vadd.f32 %v1210_v39, %v2647_v10 }
0x1e66   :  { %2182 = vtanh.f32 %v1212_v46  ;;  %v1977_v49 = vmul.f32 -1.442695, %v1212_v46 }
0x1e68   :  { %2184 = vpow2.f32 %v1977_v49 }
0x1e69   :  { %v1207_v42 = vpop.f32.mrf.mxu3 }
0x1e6c   :  { %v2183_v48 = vpop.eup %2182 }
0x1e6d   :  { %1238 = vrot.lane.b32.xlu1 %v2183_v48, %s2271_s4 }
0x1e6e   :  { %v2185_v34 = vpop.eup %2184 }
0x1e6f   :  { %v1216_v51 = vadd.f32 1.0, %v2185_v34 }
0x1e71   :  { %2186 = vrcp.f32 %v1216_v51  ;;  %v1228_v55 = vand.u32 2147483648, %v1216_v51  ;;  %vm1222_vm5 = vweird.f32 %v1216_v51  ;;  %v1226_v56 = vand.u32 2147483647, %v1216_v51 }
0x1e73   :  { %v1229_v60 = vor.u32 1.1754944e-38, %v1228_v55  ;;  %vm1227_vm7 = vcmp.eq.f32.partialorder %v1226_v56, 8.507059e+37 }
0x1e77   :  { %v2187_v43 = vpop.eup %2186 }
0x1e78   :  { %v1218_v2 = vmul.f32 %v2187_v43, %v1216_v51  ;;  %vm1223_vm4 = vweird.f32 %v2187_v43 }
0x1e79   :  { %vm1224_vm6 = vmor %vm1222_vm5, %vm1223_vm4  ;;  %vm339_vm4 = vcmask 259076   ;;  %vm166_vm5 = vcmask 254976  }
0x1e7a   :  { %v1219_v52 = vsub.f32 1.0, %v1218_v2 }
0x1e7c   :  { %v1220_v53 = vmul.f32 %v2187_v43, %v1219_v52 }
0x1e7e   :  { %v1221_v54 = vadd.f32 %v2187_v43, %v1220_v53 }
0x1e80   :  { %v1225_v58 = vsel %vm1224_vm6, %v2187_v43, %v1221_v54  ;;  %vm1463_vm6 = vcmask 1041409  }
0x1e81   :  { %v1230_v28 = vsel %vm1227_vm7, %v1229_v60, %v1225_v58  ;;  %vm1466_vm7 = vcmask 1042434  }
0x1e82   :  { %v1236_v5 = vmul.f32 %v1234_v4, %v1230_v28 }
0x1edf   :  { %v1239_v63 = vpop.permute.xlu1 %1238 }
0x1ee0   :  { %v1241_v0 = vmul.f32 %v1239_v63, %v1230_v28 }
0x1ee2   :  { %1243 = vrot.lane.b32.xlu2 %v1241_v0, %s2272_s5 }
0x1f3c   :  { %v1244_v59 = vpop.permute.xlu2 %1243 }
0x1f3d   :  { %v1246_v7 = vadd.f32 %v1244_v59, %v1236_v5 }
0x1f3f   :  { %2188 = vtanh.f32 %v1246_v7  ;;  %v1305_v39 = vrot.slane %v1246_v7, 6 }
0x1f45   :  { %v2189_v61 = vpop.eup %2188 }
0x1f46   :  { %1249 = vrot.lane.b32.xlu0 %v2189_v61, %s2271_s4 }
0x1fb8   :  { %v1250_v27 = vpop.permute.xlu0 %1249 }
0x1fb9   :  { %v2663_v11 = vmul.f32 %v1250_v27, %v1230_v28 }
0x1fbb   :  { %v1259_v12 = vpack.c.bf16 %v2663_v11, %v2663_v11 }
0x1fbd   :  { %v1261_v30 = vrot.slane %v1259_v12, 1 }
0x1fbf   :  { %1262 = vrot.lane.b32.xlu1 %v1261_v30, %s2272_s5 }
0x2031   :  { %v1263_v45 = vpop.permute.xlu1 %1262 }
0x2032   :  { %1978 = vmatmul.msk.bf16.vlgmr.msra.gmra.mxu0 %vm78_vm0, %v1263_v45 }
0x20af   :  { %v1276_v50 = vpop.f32.mrf.mxu0 }
0x20b0   :  { %v1281_v13 = vrot.slane %v1276_v50, 4 }
0x20b2   :  { %v1283_v15 = vadd.f32 %v1281_v13, %v2647_v10 }
0x20b4   :  { %2190 = vtanh.f32 %v1283_v15  ;;  %v1979_v17 = vmul.f32 -1.442695, %v1283_v15 }
0x20b6   :  { %2192 = vpow2.f32 %v1979_v17 }
0x20b7   :  { %v1278_v16 = vpop.f32.mrf.mxu0 }
0x20ba   :  { %v2191_v25 = vpop.eup %2190 }
0x20bb   :  { %1309 = vrot.lane.b32.xlu2 %v2191_v25, %s2271_s4 }
0x20bc   :  { %v2193_v18 = vpop.eup %2192 }
0x20bd   :  { %v1287_v19 = vadd.f32 1.0, %v2193_v18 }
0x20bf   :  { %2194 = vrcp.f32 %v1287_v19  ;;  %v1299_v26 = vand.u32 2147483648, %v1287_v19  ;;  %vm1293_vm9 = vweird.f32 %v1287_v19  ;;  %v1297_v29 = vand.u32 2147483647, %v1287_v19 }
0x20c1   :  { %v1300_v35 = vor.u32 1.1754944e-38, %v1299_v26  ;;  %vm1298_vm11 = vcmp.eq.f32.partialorder %v1297_v29, 8.507059e+37 }
0x20c5   :  { %v2195_v20 = vpop.eup %2194 }
0x20c6   :  { %v1289_v21 = vmul.f32 %v2195_v20, %v1287_v19  ;;  %vm1294_vm8 = vweird.f32 %v2195_v20 }
0x20c7   :  { %vm1295_vm10 = vmor %vm1293_vm9, %vm1294_vm8  ;;  %vm1469_vm8 = vcmask 1043459   ;;  %vm1472_vm9 = vcmask 1044484  }
0x20c8   :  { %v1290_v22 = vsub.f32 1.0, %v1289_v21 }
0x20ca   :  { %v1291_v23 = vmul.f32 %v2195_v20, %v1290_v22 }
0x20cc   :  { %v1292_v24 = vadd.f32 %v2195_v20, %v1291_v23 }
0x20ce   :  { %v1296_v31 = vsel %vm1295_vm10, %v2195_v20, %v1292_v24  ;;  %vm1475_vm10 = vcmask 1045509  }
0x20cf   :  { %v1301_v40 = vsel %vm1298_vm11, %v1300_v35, %v1296_v31  ;;  %vm1478_vm11 = vcmask 1046534  }
0x20d0   :  { %v1307_v46 = vmul.f32 %v1305_v39, %v1301_v40 }
0x2115   :  { %v1310_v38 = vpop.permute.xlu2 %1309 }
0x2116   :  { %v1312_v41 = vmul.f32 %v1310_v38, %v1301_v40 }
0x2118   :  { %1314 = vrot.lane.b32.xlu0 %v1312_v41, %s2272_s5 }
0x218a   :  { %v1315_v42 = vpop.permute.xlu0 %1314 }
0x218b   :  { %v2672_v48 = vadd.f32 %v1315_v42, %v1307_v46 }
0x218d   :  { %2196 = vtanh.f32 %v2672_v48 }
0x2193   :  { %v2197_v49 = vpop.eup %2196 }
0x2194   :  { %1320 = vrot.lane.b32.xlu1 %v2197_v49, %s2271_s4 }
0x2206   :  { %v1321_v34 = vpop.permute.xlu1 %1320 }
0x2207   :  { %v1323_v51 = vmul.f32 %v1321_v34, %v1301_v40 }
0x2209   :  { %v1330_v43 = vpack.c.bf16 %v1323_v51, %v1323_v51 }
0x220b   :  { %v1332_v2 = vrot.slane %v1330_v43, 2 }
0x220d   :  { %1333 = vrot.lane.b32.xlu2 %v1332_v2, %s2272_s5 }
0x2267   :  { %v1334_v52 = vpop.permute.xlu2 %1333 }
0x2268   :  { %1980 = vmatmul.msk.bf16.vlgmr.msra.gmra.mxu1 %vm78_vm0, %v1334_v52 }
0x22e5   :  { %v1347_v53 = vpop.f32.mrf.mxu1 }
0x22e6   :  { %v1352_v54 = vrot.slane %v1347_v53, 2 }
0x22e8   :  { %v1354_v55 = vadd.f32 %v1352_v54, %v2647_v10 }
0x22ea   :  { %2198 = vtanh.f32 %v1354_v55  ;;  %v1981_v10 = vmul.f32 -1.442695, %v1354_v55 }
0x22ec   :  { %2200 = vpow2.f32 %v1981_v10 }
0x22ed   :  { %v1349_v56 = vpop.f32.mrf.mxu1 }
0x22f0   :  { %v2199_v58 = vpop.eup %2198 }
0x22f1   :  { %1380 = vrot.lane.b32.xlu0 %v2199_v58, %s2271_s4 }
0x22f2   :  { %v2201_v60 = vpop.eup %2200 }
0x22f3   :  { %v1358_v63 = vadd.f32 1.0, %v2201_v60 }
0x22f5   :  { %2202 = vrcp.f32 %v1358_v63  ;;  %v1370_v5 = vand.u32 2147483648, %v1358_v63  ;;  %vm1364_vm13 = vweird.f32 %v1358_v63 }
0x22f9   :  { %974 = vrot.lane.b32.xlu0 %v2620_v9, %s2272_s5 }
0x22fb   :  { %v2203_v9 = vpop.eup %2202 }
0x22fc   :  { %v1360_v28 = vmul.f32 %v2203_v9, %v1358_v63  ;;  %vm1365_vm12 = vweird.f32 %v2203_v9 }
0x22fd   :  { %vm1366_vm15 = vmor %vm1364_vm13, %vm1365_vm12  ;;  %vm1481_vm12 = vcmask 1047559   ;;  %vm1580_vm13 = vcmask 1043456  }
0x22fe   :  { %v1361_v0 = vsub.f32 1.0, %v1360_v28 }
0x2301   :  { %1116 = vrot.lane.b32.xlu0 %v2640_v3, %s2272_s5  ;;  %v1362_v3 = vmul.f32 %v2203_v9, %v1361_v0  ;;  %v2735_v0 = vld [vmem:[%s2869_s9 + $0x8] sm:$0xff] }
0x2302   :  { %1505 = vmatpush.bf16.msra.mxu2 %v2735_v0 }
0x2303   :  { %v1363_v4 = vadd.f32 %v2203_v9, %v1362_v3  ;;  %v2741_v3 = vld [vmem:[%s2869_s9] sm:$0xff] }
0x2305   :  { %v1367_v59 = vsel %vm1366_vm15, %v2203_v9, %v1363_v4  ;;  %v2746_v4 = vld [vmem:[%s2871_s11 + $0x8] sm:$0xff]  ;;  %vm1564_vm15 = vcmask 64512  }
0x2306   :  { %1506 = vmatpush.bf16.msra.mxu2 %v2741_v3  ;;  %1615 = vmatpush.bf16.msrb.mxu1 %v2746_v4 }
0x2309   :  { %1325 = vrot.lane.b32.xlu0 %v1323_v51, %s2272_s5 }
0x230a   :  { %1643 = vmatpush.bf16.msrb.mxu2 %v2029_v44 }
0x2311   :  { %335 = vrot.lane.b32.xlu0 %v2416_v32, %s2272_s5  ;;  %v1368_v32 = vand.u32 2147483647, %v1358_v63 }
0x2313   :  { %vm1369_vm1 = vcmp.eq.f32.partialorder %v1368_v32, 8.507059e+37 }
0x2319   :  { %503 = vrot.lane.b32.xlu0 %v2449_v37, %s2272_s5  ;;  %v1371_v37 = vor.u32 1.1754944e-38, %v1370_v5  ;;  %v2753_v5 = vld [vmem:[%s2871_s11] sm:$0xff] }
0x231a   :  { %1616 = vmatpush.bf16.msrb.mxu1 %v2753_v5 }
0x2321   :  { %765 = vrot.lane.b32.xlu0 %v2538_v57, %s2272_s5  ;;  %v1372_v57 = vsel %vm1369_vm1, %v1371_v37, %v1367_v59  ;;  %vm1666_vm1 = vcmask 253952  }
0x2363   :  { %v1381_v7 = vpop.permute.xlu0 %1380 }
0x2364   :  { %v1383_v61 = vmul.f32 %v1381_v7, %v1372_v57 }
0x2366   :  { %1385 = vrot.lane.b32.xlu1 %v1383_v61, %s2272_s5 }
0x236b   :  { %v975_v27 = vpop.permute.xlu0 %974 }
0x236c   :  { %978 = vst.msk [vmem:[#allocation3] sm:$0xc] %vm245_vm2, %v975_v27 }
0x236e   :  { %1045 = vrot.lane.b32.xlu1 %v2630_v6, %s2272_s5  ;;  %v1376_v6 = vrot.slane %v2672_v48, 6 }
0x2370   :  { %v1378_v15 = vmul.f32 %v1376_v6, %v1372_v57 }
0x2373   :  { %v1117_v12 = vpop.permute.xlu0 %1116 }
0x2374   :  { %1120 = vst.msk [vmem:[#allocation3] sm:$0xc0] %vm425_vm3, %v1117_v12 }
0x2376   :  { %1184 = vrot.lane.b32.xlu1 %v2653_v36, %s2272_s5 }
0x237b   :  { %v1326_v30 = vpop.permute.xlu0 %1325 }
0x237c   :  { %1329 = vst.msk [vmem:[#allocation3 + $0x8] sm:$0x30] %vm339_vm4, %v1326_v30 }
0x2383   :  { %v336_v45 = vpop.permute.xlu0 %335  ;;  %v1415_v38 = vld [vmem:[#allocation3 + $0xc] sm:$0x3] }
0x2384   :  { %340 = vst.msk [vmem:[#allocation2] sm:$0x30] %vm339_vm4, %v336_v45  ;;  %v1436_v42 = vpack.c.bf16 %v1415_v38, %v1415_v38 }
0x2386   :  { %v1460_v54 = vunpack.c.l.b16 %v1436_v42 }
0x2388   :  { %v1709_v10 = vrot.slane %v1460_v54, 3 }
0x238b   :  { %v504_v50 = vpop.permute.xlu0 %503 }
0x238c   :  { %507 = vst.msk [vmem:[#allocation2 + $0x8] sm:$0x3] %vm166_vm5, %v504_v50 }
0x2393   :  { %v766_v13 = vpop.permute.xlu0 %765 }
0x2394   :  { %769 = vst.msk [vmem:[#allocation2 + $0x8] sm:$0xc0] %vm425_vm3, %v766_v13 }
0x23d8   :  { %v1386_v16 = vpop.permute.xlu1 %1385 }
0x23d9   :  { %v1388_v25 = vadd.f32 %v1386_v16, %v1378_v15 }
0x23db   :  { %2204 = vtanh.f32 %v1388_v25 }
0x23e0   :  { %v1046_v36 = vpop.permute.xlu1 %1045 }
0x23e1   :  { %v2205_v17 = vpop.eup %2204  ;;  %1049 = vst.msk [vmem:[#allocation3] sm:$0x30] %vm339_vm4, %v1046_v36  ;;  %v1403_v36 = vld [vmem:[#allocation2 + $0x4] sm:$0x3] }
0x23e2   :  { %1391 = vrot.lane.b32.xlu2 %v2205_v17, %s2271_s4 }
0x23e8   :  { %v1185_v18 = vpop.permute.xlu1 %1184 }
0x23e9   :  { %1188 = vst.msk [vmem:[#allocation3 + $0x8] sm:$0x3] %vm166_vm5, %v1185_v18  ;;  %v1477_v18 = vrot.slane %v1460_v54, 2 }
0x23ea   :  { %905 = vrot.lane.b32.xlu2 %v2610_v14, %s2272_s5  ;;  %v1411_v14 = vld [vmem:[#allocation3 + $0x4] sm:$0x3] }
0x23eb   :  { %v1432_v23 = vpack.c.bf16 %v1411_v14, %v1411_v14 }
0x23ed   :  { %v1456_v35 = vunpack.c.l.b16 %v1432_v23 }
0x23ef   :  { %v1701_v48 = vrot.slane %v1456_v35, 7  ;;  %v1465_v7 = vrot.slane %v1456_v35, 6 }
0x23f0   :  { %v1413_v22 = vld [vmem:[#allocation3 + $0x8] sm:$0x3] }
0x23f1   :  { %v1434_v29 = vpack.c.bf16 %v1413_v22, %v1413_v22 }
0x23f2   :  { %1254 = vrot.lane.b32.xlu2 %v2663_v11, %s2272_s5  ;;  %v1412_v11 = vld [vmem:[#allocation3 + $0x6] sm:$0x3] }
0x23f3   :  { %v1433_v24 = vpack.c.bf16 %v1412_v11, %v1412_v11  ;;  %v1458_v41 = vunpack.c.l.b16 %v1434_v29  ;;  %v1440_v11 = vpack.c.bf16 %v1403_v36, %v1403_v36  ;;  %v1405_v29 = vld [vmem:[#allocation2 + $0x8] sm:$0x3] }
0x23f5   :  { %v1705_v52 = vrot.slane %v1458_v41, 5  ;;  %v1471_v50 = vrot.slane %v1458_v41, 4  ;;  %v1524_v35 = vunpack.c.l.b16 %v1440_v11  ;;  %v1408_v41 = vld [vmem:[#allocation2 + $0xe] sm:$0x3] }
0x23fa   :  { %241 = vrot.lane.b32.xlu2 %v2402_v62, %s2272_s5  ;;  %v1410_v62 = vld [vmem:[#allocation3 + $0x2] sm:$0x3] }
0x23fb   :  { %v1431_v31 = vpack.c.bf16 %v1410_v62, %v1410_v62 }
0x23fd   :  { %v1455_v39 = vunpack.c.l.b16 %v1431_v31 }
0x23ff   :  { %v1462_v32 = vrot.slane %v1455_v39, 7 }
0x2402   :  { %421 = vrot.lane.b32.xlu2 %v2430_v1, %s2272_s5 }
0x240a   :  { %680 = vrot.lane.b32.xlu2 %v2489_v47, %s2272_s5 }
0x243c   :  { %v1392_v19 = vpop.permute.xlu2 %1391 }
0x243d   :  { %v1394_v20 = vmul.f32 %v1392_v19, %v1372_v57 }
0x243f   :  { %1396 = vrot.lane.b32.xlu1 %v1394_v20, %s2272_s5 }
0x2444   :  { %v906_v21 = vpop.permute.xlu2 %905 }
0x2445   :  { %908 = vst.msk [vmem:[#allocation3] sm:$0x3] %vm166_vm5, %v906_v21 }
0x2447   :  { %163 = vrot.lane.b32.xlu1 %v2388_v33, %s2272_s5  ;;  %v1457_v33 = vunpack.c.l.b16 %v1433_v24 }
0x2449   :  { %v1703_v34 = vrot.slane %v1457_v33, 6  ;;  %v1468_v61 = vrot.slane %v1457_v33, 5 }
0x244c   :  { %v1255_v1 = vpop.permute.xlu2 %1254  ;;  %v1409_v26 = vld [vmem:[#allocation3] sm:$0x3] }
0x244d   :  { %1258 = vst.msk [vmem:[#allocation3 + $0x8] sm:$0xc] %vm245_vm2, %v1255_v1  ;;  %v1430_v47 = vpack.c.bf16 %v1409_v26, %v1409_v26 }
0x244f   :  { %587 = vrot.lane.b32.xlu1 %v2463_v8, %s2272_s5  ;;  %v1454_v40 = vunpack.c.l.b16 %v1430_v47 }
0x2451   :  { %v1699_v46 = vrot.slane %v1454_v40, 1  ;;  %v1464_v37 = vsel %vm1463_vm6, %v1462_v32, %v1454_v40 }
0x2452   :  { %v1467_v57 = vsel %vm1466_vm7, %v1465_v7, %v1464_v37 }
0x2453   :  { %v1700_v49 = vsel %vm1463_vm6, %v1455_v39, %v1699_v46  ;;  %v1470_v27 = vsel %vm1469_vm8, %v1468_v61, %v1467_v57  ;;  %v1442_v39 = vpack.c.bf16 %v1405_v29, %v1405_v29 }
0x2454   :  { %v242_v51 = vpop.permute.xlu2 %241  ;;  %v1414_v43 = vld [vmem:[#allocation3 + $0xa] sm:$0x3]  ;;  %v1702_v2 = vsel %vm1466_vm7, %v1701_v48, %v1700_v49  ;;  %v1473_v15 = vsel %vm1472_vm9, %v1471_v50, %v1470_v27 }
0x2455   :  { %246 = vst.msk [vmem:[#allocation2] sm:$0xc] %vm245_vm2, %v242_v51  ;;  %v1435_v8 = vpack.c.bf16 %v1414_v43, %v1414_v43  ;;  %v1704_v53 = vsel %vm1469_vm8, %v1703_v34, %v1702_v2  ;;  %v1532_v34 = vrot.slane %v1524_v35, 6  ;;  %v1734_v51 = vrot.slane %v1524_v35, 7 }
0x2456   :  { %v1706_v55 = vsel %vm1472_vm9, %v1705_v52, %v1704_v53  ;;  %v1445_v43 = vpack.c.bf16 %v1408_v41, %v1408_v41 }
0x2457   :  { %v1459_v56 = vunpack.c.l.b16 %v1435_v8  ;;  %v1526_v8 = vunpack.c.l.b16 %v1442_v39 }
0x2459   :  { %v1707_v58 = vrot.slane %v1459_v56, 4  ;;  %v1474_v12 = vrot.slane %v1459_v56, 3  ;;  %v1536_v32 = vrot.slane %v1526_v8, 4 }
0x245b   :  { %v1708_v60 = vsel %vm1475_vm10, %v1707_v58, %v1706_v55  ;;  %v1476_v25 = vsel %vm1475_vm10, %v1474_v12, %v1473_v15 }
0x245c   :  { %v422_v63 = vpop.permute.xlu2 %421  ;;  %v1710_v9 = vsel %vm1478_vm11, %v1709_v10, %v1708_v60  ;;  %v1402_v13 = vld [vmem:[#allocation2 + $0x2] sm:$0x3]  ;;  %v1479_v21 = vsel %vm1478_vm11, %v1477_v18, %v1476_v25 }
0x245d   :  { %426 = vst.msk [vmem:[#allocation2] sm:$0xc0] %vm425_vm3, %v422_v63  ;;  %v1439_v17 = vpack.c.bf16 %v1402_v13, %v1402_v13  ;;  %v1529_v63 = vunpack.c.l.b16 %v1445_v43 }
0x245f   :  { %v1523_v62 = vunpack.c.l.b16 %v1439_v17  ;;  %v1744_v13 = vrot.slane %v1529_v63, 2 }
0x2461   :  { %v1530_v33 = vrot.slane %v1523_v62, 7 }
0x2464   :  { %v681_v28 = vpop.permute.xlu2 %680  ;;  %v1404_v14 = vld [vmem:[#allocation2 + $0x6] sm:$0x3] }
0x2465   :  { %684 = vst.msk [vmem:[#allocation2 + $0x8] sm:$0x30] %vm339_vm4, %v681_v28  ;;  %v1441_v31 = vpack.c.bf16 %v1404_v14, %v1404_v14 }
0x2467   :  { %v1525_v46 = vunpack.c.l.b16 %v1441_v31 }
0x2469   :  { %v1534_v56 = vrot.slane %v1525_v46, 5  ;;  %v1736_v58 = vrot.slane %v1525_v46, 6 }
0x246c   :  { %v1407_v38 = vld [vmem:[#allocation2 + $0xc] sm:$0x3] }
0x246d   :  { %v1444_v49 = vpack.c.bf16 %v1407_v38, %v1407_v38 }
0x246f   :  { %v1528_v10 = vunpack.c.l.b16 %v1444_v49 }
0x2471   :  { %v1540_v61 = vrot.slane %v1528_v10, 2  ;;  %v1742_v12 = vrot.slane %v1528_v10, 3 }
0x24b1   :  { %v1397_v59 = vpop.permute.xlu1 %1396 }
0x24b2   :  { %1400 = vst.msk [vmem:[#allocation3 + $0x8] sm:$0xc0] %vm425_vm3, %v1397_v59  ;;  %v1738_v59 = vrot.slane %v1526_v8, 5 }
0x24b9   :  { %v164_v30 = vpop.permute.xlu1 %163  ;;  %v1416_v45 = vld [vmem:[#allocation3 + $0xe] sm:$0x3] }
0x24ba   :  { %167 = vst.msk [vmem:[#allocation2] sm:$0x3] %vm166_vm5, %v164_v30  ;;  %v1437_v6 = vpack.c.bf16 %v1416_v45, %v1416_v45  ;;  %v1542_v45 = vrot.slane %v1529_v63, 1 }
0x24bc   :  { %v1461_v16 = vunpack.c.l.b16 %v1437_v6 }
0x24be   :  { %v1480_v19 = vrot.slane %v1461_v16, 1  ;;  %v1711_v20 = vrot.slane %v1461_v16, 2 }
0x24c0   :  { %v1482_v22 = vsel %vm1481_vm12, %v1480_v19, %v1479_v21  ;;  %v2766_v23 = vsel %vm1481_vm12, %v1711_v20, %v1710_v9 }
0x24c1   :  { %v588_v24 = vpop.permute.xlu1 %587  ;;  %v1483_v1 = vpack.c.b16 %v1482_v22, %v1482_v22  ;;  %v1401_v26 = vld [vmem:[#allocation2] sm:$0x3] }
0x24c2   :  { %591 = vst.msk [vmem:[#allocation2 + $0x8] sm:$0xc] %vm245_vm2, %v588_v24  ;;  %v1438_v47 = vpack.c.bf16 %v1401_v26, %v1401_v26  ;;  %v2281_v26 = vmov -1e+09  }
0x24c3   :  { %1990 = vmatmul.msk.bf16.vlgmr.msra.gmra.mxu2 %vm78_vm0, %v1483_v1  ;;  %2001 = vmatmul.msk.bf16.vlgmr.msrb.gmra.mxu1 %vm78_vm0, %v1483_v1  ;;  %v1713_v1 = vpack.c.b16 %v2766_v23, %v2766_v23  ;;  %v1429_v29 = vsel %vm168_vm14, 0.0, %v2281_v26  ;;  %vm1690_vm14 = vcmask 57344  }
0x24c4   :  { %v1522_v40 = vunpack.c.l.b16 %v1438_v47  ;;  %v1731_v63 = vperm.slane %v1429_v29, 1 }
0x24c6   :  { %v1531_v42 = vsel %vm1463_vm6, %v1530_v33, %v1522_v40  ;;  %v1732_v48 = vrot.slane %v1522_v40, 1 }
0x24c7   :  { %v1533_v53 = vsel %vm1466_vm7, %v1532_v34, %v1531_v42 }
0x24c8   :  { %v1733_v2 = vsel %vm1463_vm6, %v1523_v62, %v1732_v48  ;;  %v1535_v9 = vsel %vm1469_vm8, %v1534_v56, %v1533_v53  ;;  %v2028_v56 = vld [vmem:[%s2870_s10] sm:$0xff]  ;;  %s2282_s10 = smov [#allocation6]  }
0x24c9   :  { %v1406_v52 = vld [vmem:[#allocation2 + $0xa] sm:$0x3]  ;;  %v1735_v54 = vsel %vm1466_vm7, %v1734_v51, %v1733_v2  ;;  %v1537_v57 = vsel %vm1472_vm9, %v1536_v32, %v1535_v9  ;;  %1644 = vmatpush.bf16.msrb.mxu2 %v2028_v56  ;;  %s1890_s18 = sshll.u32 %s2282_s10, 4  ;;  %s1891_s18 = int_to_ptr.vmem [resolvable:$true] %s1890_s18 }
0x24ca   :  { %v1443_v55 = vpack.c.bf16 %v1406_v52, %v1406_v52  ;;  %v1737_v28 = vsel %vm1469_vm8, %v1736_v58, %v1735_v54 }
0x24cb   :  { %v1739_v27 = vsel %vm1472_vm9, %v1738_v59, %v1737_v28 }
0x24cc   :  { %v1527_v60 = vunpack.c.l.b16 %v1443_v55 }
0x24cd   :  { %1803 = vmatpush.bf16.msra.mxu2 %v2746_v4 }
0x24ce   :  { %v1538_v37 = vrot.slane %v1527_v60, 3  ;;  %v1740_v7 = vrot.slane %v1527_v60, 4 }
0x24d0   :  { %v1539_v30 = vsel %vm1475_vm10, %v1538_v37, %v1537_v57  ;;  %v1741_v50 = vsel %vm1475_vm10, %v1740_v7, %v1739_v27 }
0x24d1   :  { %v1541_v6 = vsel %vm1478_vm11, %v1540_v61, %v1539_v30  ;;  %v1743_v15 = vsel %vm1478_vm11, %v1742_v12, %v1741_v50  ;;  %1804 = vmatpush.bf16.msra.mxu2 %v2753_v5 }
0x24d2   :  { %v1543_v16 = vsel %vm1481_vm12, %v1542_v45, %v1541_v6  ;;  %v1745_v25 = vsel %vm1481_vm12, %v1744_v13, %v1743_v15 }
0x24d3   :  { %v1544_v36 = vpack.c.b16 %v1543_v16, %v1543_v16  ;;  %v1746_v17 = vpack.c.b16 %v1745_v25, %v1745_v25 }
0x24d5   :  { %v1549_v18 = vsel %vm78_vm0, %v1544_v36, 0  ;;  %v1581_v19 = vsel %vm1580_vm13, %v1544_v36, 0  ;;  %v1781_v20 = vsel %vm1580_vm13, %v1746_v17, 0  ;;  %v1751_v21 = vsel %vm78_vm0, %v1746_v17, 0 }
0x24d6   :  { %1558 = vmatpush.bf16.xpose.msra.mxu3 %v1549_v18  ;;  %1590 = vmatpush.bf16.msrb.mxu0 %v1581_v19 }
0x24d7   :  { %1790 = vmatpush.bf16.msra.mxu1 %v1781_v20 }
0x24da   :  { %1760 = vmatpush.bf16.xpose.msra.mxu0 %v1751_v21 }
0x24de   :  { %1723 = vmatpush.bf16.msrb.mxu3 %v2735_v0  ;;  %v1513_v0 = vperm.slane %v1429_v29, 0 }
0x24e2   :  { %1724 = vmatpush.bf16.msrb.mxu3 %v2741_v3 }
0x2540   :  { %v2789_v14 = vpop.f32.mrf.mxu1 }
0x2546   :  { %v1508_v11 = vpop.f32.mrf.mxu2 }
0x2547   :  { %v1512_v22 = vpack.c.bf16 %v1508_v11, %v1508_v11 }
0x2548   :  { %v1620_v62 = vpop.f32.mrf.mxu1 }
0x2549   :  { %1991 = vmatmul.msk.bf16.vlgmr.msra.gmra.mxu3 %vm78_vm0, %v1512_v22 }
0x254a   :  { %1819 = vmatpush.bf16.msra.mxu3 %v2029_v44 }
0x254e   :  { %v1510_v24 = vpop.f32.mrf.mxu2  ;;  %1820 = vmatpush.bf16.msra.mxu3 %v2028_v56 }
0x2559   :  { %2011 = vmatmul.msk.bf16.vlgmr.msrb.gmra.mxu3 %vm78_vm0, %v1713_v1 }
0x25cc   :  { %v1560_v47 = vpop.f32.mrf.mxu3 }
0x25cd   :  { %v1561_v3 = vadd.f32 %v1560_v47, %v1513_v0 }
0x25cf   :  { %v1565_v31 = vsel %vm1564_vm15, %v1561_v3, -inf }
0x25d0   :  { %1566 = vmax.xlane.f32.xlu1 %v1565_v31 }
0x25d4   :  { %v1562_v35 = vpop.f32.mrf.mxu3 }
0x25dc   :  { %v1726_v38 = vpop.f32.mrf.mxu3 }
0x25dd   :  { %v1730_v55 = vpack.c.bf16 %v1726_v38, %v1726_v38 }
0x25e4   :  { %v1728_v40 = vpop.f32.mrf.mxu3 }
0x2643   :  { %v1567_v33 = vpop.xlane.xlu1 %1566 }
0x2644   :  { %v1568_v41 = vsub.f32 %v1561_v3, %v1567_v33 }
0x2646   :  { %v1569_v39 = vmul.f32 1.442695, %v1568_v41 }
0x2648   :  { %2206 = vpow2.f32 %v1569_v39 }
0x264e   :  { %v2207_v23 = vpop.eup %2206 }
0x264f   :  { %v1571_v46 = vsel %vm1564_vm15, %v2207_v23, 0.0 }
0x2650   :  { %1572 = vadd.xlane.f32.xlu2 %v1571_v46 }
0x26c3   :  { %v1573_v42 = vpop.xlane.xlu2 %1572 }
0x26c4   :  { %2208 = vrcp.f32 %v1573_v42 }
0x26ca   :  { %v2209_v48 = vpop.eup %2208 }
0x26cb   :  { %v1575_v49 = vmul.f32 %v2209_v48, %v2207_v23 }
0x26cd   :  { %v1676_v34 = vrot.slane %v1575_v49, 1  ;;  %v1677_v51 = vrot.slane %v1575_v49, 2  ;;  %v1678_v43 = vrot.slane %v1575_v49, 3  ;;  %1691 = vst.msk [vmem:[#allocation6] sm:$0x1] %vm1690_vm14, %v1575_v49  ;;  %v1679_v2 = vrot.slane %v1575_v49, 4 }
0x26ce   :  { %v1576_v52 = vpack.c.bf16 %v1575_v49, %v1575_v49  ;;  %v1680_v8 = vrot.slane %v1575_v49, 5  ;;  %v1681_v53 = vrot.slane %v1575_v49, 6  ;;  %v1682_v54 = vrot.slane %v1575_v49, 7 }
0x26cf   :  { %1692 = vst.msk [vmem:[#allocation6 + $0x2] sm:$0x1] %vm1690_vm14, %v1676_v34 }
0x26d0   :  { %1693 = vst.msk [vmem:[#allocation6 + $0x4] sm:$0x1] %vm1690_vm14, %v1677_v51  ;;  %1992 = vmatmul.msk.bf16.vlgmr.msrb.gmra.mxu0 %vm1564_vm15, %v1576_v52 }
0x26d1   :  { %1694 = vst.msk [vmem:[#allocation6 + $0x6] sm:$0x1] %vm1690_vm14, %v1678_v43 }
0x26d2   :  { %1695 = vst.msk [vmem:[#allocation6 + $0x8] sm:$0x1] %vm1690_vm14, %v1679_v2 }
0x26d3   :  { %1696 = vst.msk [vmem:[#allocation6 + $0xa] sm:$0x1] %vm1690_vm14, %v1680_v8 }
0x26d4   :  { %1697 = vst.msk [vmem:[#allocation6 + $0xc] sm:$0x1] %vm1690_vm14, %v1681_v53 }
0x26d5   :  { %1698 = vst.msk [vmem:[#allocation6 + $0xe] sm:$0x1] %vm1690_vm14, %v1682_v54 }
0x26e0   :  { %2012 = vmatmul.msk.bf16.vlgmr.msra.gmra.mxu0 %vm78_vm0, %v1730_v55 }
0x274d   :  { %v1592_v58 = vpop.f32.mrf.mxu0 }
0x274e   :  { %v1596_v10 = vpack.c.bf16 %v1592_v58, %v1592_v58 }
0x2750   :  { %2010 = vmatmul.msk.bf16.vlgmr.msrb.gmra.mxu2 %vm78_vm0, %v1596_v10 }
0x2755   :  { %v1594_v60 = vpop.f32.mrf.mxu0 }
0x275d   :  { %v1762_v9 = vpop.f32.mrf.mxu0 }
0x275e   :  { %v1763_v28 = vadd.f32 %v1762_v9, %v1731_v63 }
0x2760   :  { %2014 = vmatmul.msk.bf16.vlgmr.msra.gmra.mxu2 %vm78_vm0, %v1713_v1  ;;  %v1766_v32 = vsel %vm1564_vm15, %v1763_v28, -inf }
0x2761   :  { %1767 = vmax.xlane.f32.xlu0 %v1766_v32 }
0x2765   :  { %v1764_v59 = vpop.f32.mrf.mxu0 }
0x27d3   :  { %v1646_v37 = vpop.f32.mrf.mxu2 }
0x27d4   :  { %v1647_v7 = vadd.f32 %v1646_v37, %v2789_v14  ;;  %v1768_v4 = vpop.xlane.xlu0 %1767 }
0x27d5   :  { %v1769_v57 = vsub.f32 %v1763_v28, %v1768_v4 }
0x27d6   :  { %2210 = vtanh.f32 %v1647_v7 }
0x27d7   :  { %v1770_v5 = vmul.f32 1.442695, %v1769_v57 }
0x27d9   :  { %2212 = vpow2.f32 %v1770_v5 }
0x27db   :  { %v1648_v61 = vpop.f32.mrf.mxu2 }
0x27dc   :  { %v2211_v27 = vpop.eup %2210 }
0x27dd   :  { %v1652_v12 = vrot.slane %v2211_v27, 1  ;;  %v1653_v30 = vrot.slane %v2211_v27, 2  ;;  %v1654_v45 = vrot.slane %v2211_v27, 3  ;;  %1667 = vst.msk [vmem:[#allocation4] sm:$0x1] %vm1666_vm1, %v2211_v27  ;;  %v1655_v50 = vrot.slane %v2211_v27, 4 }
0x27de   :  { %v1656_v6 = vrot.slane %v2211_v27, 5  ;;  %v1657_v16 = vrot.slane %v2211_v27, 6  ;;  %v1658_v25 = vrot.slane %v2211_v27, 7 }
0x27df   :  { %v2213_v13 = vpop.eup %2212  ;;  %1668 = vst.msk [vmem:[#allocation4 + $0x2] sm:$0x1] %vm1666_vm1, %v1652_v12 }
0x27e0   :  { %v1772_v15 = vsel %vm1564_vm15, %v2213_v13, 0.0  ;;  %1669 = vst.msk [vmem:[#allocation4 + $0x4] sm:$0x1] %vm1666_vm1, %v1653_v30 }
0x27e1   :  { %1773 = vadd.xlane.f32.xlu2 %v1772_v15  ;;  %1670 = vst.msk [vmem:[#allocation4 + $0x6] sm:$0x1] %vm1666_vm1, %v1654_v45 }
0x27e2   :  { %1671 = vst.msk [vmem:[#allocation4 + $0x8] sm:$0x1] %vm1666_vm1, %v1655_v50 }
0x27e3   :  { %v1806_v36 = vpop.f32.mrf.mxu2  ;;  %1672 = vst.msk [vmem:[#allocation4 + $0xa] sm:$0x1] %vm1666_vm1, %v1656_v6 }
0x27e4   :  { %1673 = vst.msk [vmem:[#allocation4 + $0xc] sm:$0x1] %vm1666_vm1, %v1657_v16 }
0x27e5   :  { %1674 = vst.msk [vmem:[#allocation4 + $0xe] sm:$0x1] %vm1666_vm1, %v1658_v25 }
0x27eb   :  { %v1808_v17 = vpop.f32.mrf.mxu2 }
0x2854   :  { %v1774_v18 = vpop.xlane.xlu2 %1773 }
0x2855   :  { %2214 = vrcp.f32 %v1774_v18 }
0x285b   :  { %v2215_v19 = vpop.eup %2214 }
0x285c   :  { %v1776_v20 = vmul.f32 %v2215_v19, %v2213_v13 }
0x285e   :  { %v1851_v21 = vrot.slane %v1776_v20, 1  ;;  %v1852_v14 = vrot.slane %v1776_v20, 2  ;;  %v1853_v11 = vrot.slane %v1776_v20, 3  ;;  %1865 = vst.msk [vmem:[#allocation6 + $0x1] sm:$0x1] %vm1690_vm14, %v1776_v20  ;;  %v1854_v22 = vrot.slane %v1776_v20, 4 }
0x285f   :  { %v1777_v62 = vpack.c.bf16 %v1776_v20, %v1776_v20  ;;  %v1855_v24 = vrot.slane %v1776_v20, 5  ;;  %v1856_v1 = vrot.slane %v1776_v20, 6  ;;  %v1857_v26 = vrot.slane %v1776_v20, 7 }
0x2860   :  { %1866 = vst.msk [vmem:[#allocation6 + $0x3] sm:$0x1] %vm1690_vm14, %v1851_v21 }
0x2861   :  { %1867 = vst.msk [vmem:[#allocation6 + $0x5] sm:$0x1] %vm1690_vm14, %v1852_v14  ;;  %2013 = vmatmul.msk.bf16.vlgmr.msra.gmra.mxu1 %vm1564_vm15, %v1777_v62 }
0x2862   :  { %1868 = vst.msk [vmem:[#allocation6 + $0x7] sm:$0x1] %vm1690_vm14, %v1853_v11 }
0x2863   :  { %1869 = vst.msk [vmem:[#allocation6 + $0x9] sm:$0x1] %vm1690_vm14, %v1854_v22 }
0x2864   :  { %1870 = vst.msk [vmem:[#allocation6 + $0xb] sm:$0x1] %vm1690_vm14, %v1855_v24 }
0x2865   :  { %1871 = vst.msk [vmem:[#allocation6 + $0xd] sm:$0x1] %vm1690_vm14, %v1856_v1 }
0x2866   :  { %1872 = vst.msk [vmem:[#allocation6 + $0xf] sm:$0x1] %vm1690_vm14, %v1857_v26 }
0x2867   :  { %1898 = dma.vmem_to_hbm [thread:$0]  %s1891_s18, 256, %s1893_s20, [#allocation7], %s2272_s5, %s2272_s5, %s2283_s21  }
0x28de   :  { %v1792_v29 = vpop.f32.mrf.mxu1 }
0x28df   :  { %v1796_v0 = vpack.c.bf16 %v1792_v29, %v1792_v29 }
0x28e1   :  { %2015 = vmatmul.msk.bf16.vlgmr.msra.gmra.mxu3 %vm78_vm0, %v1796_v0 }
0x28e6   :  { %v1794_v47 = vpop.f32.mrf.mxu1 }
0x2964   :  { %v1822_v3 = vpop.f32.mrf.mxu3 }
0x2965   :  { %v1823_v31 = vadd.f32 %v1822_v3, %v1806_v36 }
0x2967   :  { %2216 = vtanh.f32 %v1823_v31 }
0x296c   :  { %v1824_v35 = vpop.f32.mrf.mxu3 }
0x296d   :  { %v2217_v38 = vpop.eup %2216 }
0x296e   :  { %v1828_v40 = vrot.slane %v2217_v38, 1  ;;  %v1829_v33 = vrot.slane %v2217_v38, 2  ;;  %v1830_v41 = vrot.slane %v2217_v38, 3  ;;  %1842 = vst.msk [vmem:[#allocation4 + $0x1] sm:$0x1] %vm1666_vm1, %v2217_v38  ;;  %v1831_v39 = vrot.slane %v2217_v38, 4 }
0x296f   :  { %v1832_v23 = vrot.slane %v2217_v38, 5  ;;  %v1833_v46 = vrot.slane %v2217_v38, 6  ;;  %v1834_v44 = vrot.slane %v2217_v38, 7 }
0x2970   :  { %1843 = vst.msk [vmem:[#allocation4 + $0x3] sm:$0x1] %vm1666_vm1, %v1828_v40 }
0x2971   :  { %1844 = vst.msk [vmem:[#allocation4 + $0x5] sm:$0x1] %vm1666_vm1, %v1829_v33 }
0x2972   :  { %1845 = vst.msk [vmem:[#allocation4 + $0x7] sm:$0x1] %vm1666_vm1, %v1830_v41 }
0x2973   :  { %1846 = vst.msk [vmem:[#allocation4 + $0x9] sm:$0x1] %vm1666_vm1, %v1831_v39 }
0x2974   :  { %1847 = vst.msk [vmem:[#allocation4 + $0xb] sm:$0x1] %vm1666_vm1, %v1832_v23 }
0x2975   :  { %1848 = vst.msk [vmem:[#allocation4 + $0xd] sm:$0x1] %vm1666_vm1, %v1833_v46 }
0x2976   :  { %1849 = vst.msk [vmem:[#allocation4 + $0xf] sm:$0x1] %vm1666_vm1, %v1834_v44 }
0x2977   :  { %1885 = dma.vmem_to_hbm [thread:$0]  %s1878_s22, 256, %s1880_s25, [#allocation5], %s2272_s5, %s2272_s5, %s2283_s21  }
0x2978   :  { %2266 = dma.done.wait [#allocation5], 256  }
0x2979   :  { %2267 = vsyncadd [#allocation5], 4294967040 }
0x297a   :  { %2268 = dma.done.wait [#allocation7], 256  }
0x297b   :  { %2269 = vsyncadd [#allocation7], 4294967040 }
0x297c   :  { %1907 = vsyncpa [#allocation5], 1 }
0x297d   :  { %1908 = vsyncpa [#allocation7], 1 }

</bundles_post_ra>
